<compile_context>
chip_gen: v7x
topology: tpu7x:2x2x1
jax: 0.10.0
libtpu: 0.0.40
codegen_flags: <defaults>
</compile_context>

<pallas_src>
import jax
import jax.numpy as jnp
from jax.experimental import pallas as pl
from jax.experimental.pallas import tpu as pltpu


_VMEM_BUDGET = 32 * 1024 * 1024   # comfortably within v5e/v6e/v7x scoped VMEM


def _round_up(x, m):
    return ((x + m - 1) // m) * m


def _pick_tile(dim, max_tile, align):
    """`max_tile` if the dim is large, else the dim rounded up to `align`."""
    return max_tile if dim >= max_tile else _round_up(dim, align)


# ---------------------------------------------------------------------------
# Kernel 1: K-tiled bf16 matmul (f32 accumulation) + fused BN partial stats
# ---------------------------------------------------------------------------
def _matmul_bn_stats_kernel(a_ref, b_ref, o_ref, sum_ref, sq_ref, acc_ref):
    k = pl.program_id(2)

    @pl.when(k == 0)
    def _():
        acc_ref[...] = jnp.zeros_like(acc_ref)

    acc_ref[...] += jnp.dot(a_ref[...], b_ref[...],
                            preferred_element_type=jnp.float32)

    @pl.when(k == pl.num_programs(2) - 1)
    def _():
        acc = acc_ref[...]
        o_ref[...] = acc.astype(o_ref.dtype)
        # Per-channel partial BatchNorm statistics emitted straight from the
        # f32 accumulator (saves a full HBM re-read of y for mean/var).
        sum_ref[...] = jnp.sum(acc, axis=0, keepdims=True)[None, :, :]
        sq_ref[...] = jnp.sum(acc * acc, axis=0, keepdims=True)[None, :, :]


def matmul_bn_stats(a, b, out_dtype=jnp.bfloat16):
    """(M, K) @ (K, N): bf16 MXU inputs, f32 accumulator, K-tiled.

    Returns (y_padded, block_sums, block_sumsqs, M):
      y_padded   : (Mp, Np) out_dtype, M/N zero-padded to tile multiples
      block_*    : (Mp//tm, 1, Np) f32 per-M-block channel sums / sums of sq.
    """
    M, K = a.shape
    K2, N = b.shape
    assert K == K2

    tm = _pick_tile(M, 512, 8)
    tn = _pick_tile(N, 256, 128)
    tk = _pick_tile(K, 512, 128)
    Mp, Np, Kp = _round_up(M, tm), _round_up(N, tn), _round_up(K, tk)

    a_p = jnp.pad(a.astype(jnp.bfloat16), ((0, Mp - M), (0, Kp - K)))
    b_p = jnp.pad(b.astype(jnp.bfloat16), ((0, Kp - K), (0, Np - N)))
    gm, gn, gk = Mp // tm, Np // tn, Kp // tk

    y, sums, sqs = pl.pallas_call(
        _matmul_bn_stats_kernel,
        out_shape=(jax.ShapeDtypeStruct((Mp, Np), out_dtype),
                   jax.ShapeDtypeStruct((gm, 1, Np), jnp.float32),
                   jax.ShapeDtypeStruct((gm, 1, Np), jnp.float32)),
        grid=(gm, gn, gk),
        in_specs=[pl.BlockSpec((tm, tk), lambda i, j, k: (i, k)),
                  pl.BlockSpec((tk, tn), lambda i, j, k: (k, j))],
        out_specs=(pl.BlockSpec((tm, tn), lambda i, j, k: (i, j)),
                   pl.BlockSpec((1, 1, tn), lambda i, j, k: (i, 0, j)),
                   pl.BlockSpec((1, 1, tn), lambda i, j, k: (i, 0, j))),
        scratch_shapes=[pltpu.VMEM((tm, tn), jnp.float32)],
        compiler_params=pltpu.CompilerParams(
            dimension_semantics=("parallel", "parallel", "arbitrary"),
            vmem_limit_bytes=_VMEM_BUDGET),
    )(a_p, b_p)
    return y, sums, sqs, M


# ---------------------------------------------------------------------------
# Kernel 2: fused BatchNorm (precomputed scale/shift) + ReLU, lane-dense
# ---------------------------------------------------------------------------
def _bn_relu_kernel(x_ref, scale_ref, shift_ref, o_ref):
    # f32 VPU math (v5e has no bf16 VPU path), narrow store to o_ref.dtype.
    y = x_ref[...].astype(jnp.float32) * scale_ref[...] + shift_ref[...]
    o_ref[...] = jnp.maximum(y, 0.0).astype(o_ref.dtype)


def bn_relu(x, scale, shift, out_dtype):
    Mp, Cp = x.shape
    tr = Mp
    for t in (1024, 512, 256, 128, 64, 32, 16, 8):
        if Mp % t == 0:
            tr = t
            break
    return pl.pallas_call(
        _bn_relu_kernel,
        out_shape=jax.ShapeDtypeStruct((Mp, Cp), out_dtype),
        grid=(Mp // tr,),
        in_specs=[pl.BlockSpec((tr, Cp), lambda i: (i, 0)),
                  pl.BlockSpec((1, Cp), lambda i: (0, 0)),
                  pl.BlockSpec((1, Cp), lambda i: (0, 0))],
        out_specs=pl.BlockSpec((tr, Cp), lambda i: (i, 0)),
        compiler_params=pltpu.CompilerParams(
            dimension_semantics=("parallel",),
            vmem_limit_bytes=_VMEM_BUDGET),
    )(x, scale.reshape(1, Cp).astype(jnp.float32),
      shift.reshape(1, Cp).astype(jnp.float32))


# ---------------------------------------------------------------------------
# Kernel 3: fused bilinear 2x upsample (align_corners=True), one HBM pass
# ---------------------------------------------------------------------------
def _bilinear_matrix(in_size, out_size):
    """1-D bilinear interpolation matrix (out, in), align_corners=True."""
    if out_size == 1:
        src = jnp.zeros((1,), jnp.float32)
    else:
        src = jnp.arange(out_size, dtype=jnp.float32) * (in_size - 1) / (out_size - 1)
    lo = jnp.clip(jnp.floor(src).astype(jnp.int32), 0, in_size - 1)
    hi = jnp.clip(lo + 1, 0, in_size - 1)
    frac = src - lo.astype(jnp.float32)
    A = jnp.zeros((out_size, in_size), jnp.float32)
    A = A.at[jnp.arange(out_size), lo].add(1.0 - frac)
    A = A.at[jnp.arange(out_size), hi].add(frac)
    return A


def _upsample_kernel(x_ref, ah_ref, awt_ref, o_ref):
    t = jnp.dot(ah_ref[...], x_ref[...], preferred_element_type=jnp.float32)
    o_ref[...] = jnp.dot(t, awt_ref[...],
                         preferred_element_type=jnp.float32).astype(o_ref.dtype)


def upsample_bilinear_2x(x_nchw, out_dtype=jnp.bfloat16):
    """nn.Upsample(scale_factor=2, mode='bilinear', align_corners=True).

    One fused kernel: per (n, c) plane, H- and W-interpolation are two small
    in-VMEM matmuls (interp math in f32) -- no intermediate HBM transpose and
    no extra kernel launches.
    """
    N, C, H, W = x_nchw.shape
    Ho, Wo = 2 * H, 2 * W
    ah = _bilinear_matrix(H, Ho)        # (Ho, H)
    awt = _bilinear_matrix(W, Wo).T     # (W, Wo)
    return pl.pallas_call(
        _upsample_kernel,
        out_shape=jax.ShapeDtypeStruct((N, C, Ho, Wo), out_dtype),
        grid=(N, C),
        in_specs=[pl.BlockSpec((None, None, H, W), lambda n, c: (n, c, 0, 0)),
                  pl.BlockSpec((Ho, H), lambda n, c: (0, 0)),
                  pl.BlockSpec((W, Wo), lambda n, c: (0, 0))],
        out_specs=pl.BlockSpec((None, None, Ho, Wo), lambda n, c: (n, c, 0, 0)),
        compiler_params=pltpu.CompilerParams(
            dimension_semantics=("parallel", "parallel"),
            vmem_limit_bytes=_VMEM_BUDGET),
    )(x_nchw.astype(jnp.float32), ah, awt)


# ------------------------------- JAX glue -----------------------------------
def im2col_3x3(x_nhwc):
    """3x3 / stride 1 / zero-pad 1 -> (N*H*W, 9*C) bf16 patch matrix."""
    # TODO(synk): fuse im2col into the conv matmul (halo'd NHWC blocks or
    # manual DMA) to avoid the ~9x im2col HBM round trip; kept as XLA glue.
    N, H, W, C = x_nhwc.shape
    xp = jnp.pad(x_nhwc, ((0, 0), (1, 1), (1, 1), (0, 0)))
    cols = [xp[:, dy:dy + H, dx:dx + W, :] for dy in range(3) for dx in range(3)]
    return jnp.concatenate(cols, axis=-1).reshape(N * H * W, 9 * C)


def conv3x3_bn_relu(x_nhwc, w, gamma=None, beta=None, *,
                    out_dtype=jnp.bfloat16, eps=1e-5):
    """Conv2d(3x3, pad=1, bias=False) -> BatchNorm2d(batch stats) -> ReLU.

    The input may carry extra zero channels (channel dim padded to 128); the
    weight's Cin is zero-padded to match so padded channels stay exactly zero.
    Returns (NHWC activation with channels padded to a multiple of 128,
             number of real output channels).
    """
    N, H, W, cin_eff = x_nhwc.shape
    cout, cin_w = w.shape[0], w.shape[1]

    wt = jnp.transpose(w, (2, 3, 1, 0)).astype(jnp.float32)   # (3,3,Cin,Cout)
    if cin_eff != cin_w:
        wt = jnp.pad(wt, ((0, 0), (0, 0), (0, cin_eff - cin_w), (0, 0)))
    wmat = wt.reshape(9 * cin_eff, cout)

    patches = im2col_3x3(x_nhwc.astype(jnp.bfloat16))         # (N*H*W, 9*Cin)
    y, sums, sqs, M = matmul_bn_stats(patches, wmat, out_dtype=jnp.bfloat16)
    Np = y.shape[1]

    # Finalize BatchNorm batch statistics (tiny per-channel reduction).
    count = float(M)                          # N*H*W, true (unpadded) rows
    mean = jnp.sum(sums[:, 0, :], axis=0) / count
    msq = jnp.sum(sqs[:, 0, :], axis=0) / count
    var = jnp.maximum(msq - mean * mean, 0.0)  # biased var, as in BN forward

    g = jnp.ones((cout,), jnp.float32) if gamma is None else gamma.astype(jnp.float32)
    b = jnp.zeros((cout,), jnp.float32) if beta is None else beta.astype(jnp.float32)
    g = jnp.pad(g, (0, Np - cout), constant_values=1.0)
    b = jnp.pad(b, (0, Np - cout))            # zero beta keeps pad channels 0
    scale = g / jnp.sqrt(var + eps)
    shift = b - mean * scale

    out = bn_relu(y, scale, shift, out_dtype)                 # (Mp, Np)
    return out[:M].reshape(N, H, W, Np), cout


def up_forward(x1, x2, w1, w2,
               gamma1=None, beta1=None, gamma2=None, beta2=None):
    """Up.forward(x1, x2): bilinear 2x upsample, pad, channel concat, DoubleConv."""
    x1u = upsample_bilinear_2x(x1)                            # NCHW bf16
    diff_y = x2.shape[2] - x1u.shape[2]
    diff_x = x2.shape[3] - x1u.shape[3]
    x1u = jnp.pad(x1u, ((0, 0), (0, 0),
                        (diff_y // 2, diff_y - diff_y // 2),
                        (diff_x // 2, diff_x - diff_x // 2)))

    # TODO(synk): the NCHW->NHWC transposes + channel concat remain XLA glue
    # (one fused copy pass); folding them into the conv input read would save
    # an additional HBM pass.
    x = jnp.concatenate([jnp.transpose(x2, (0, 2, 3, 1)).astype(jnp.bfloat16),
                         jnp.transpose(x1u, (0, 2, 3, 1))], axis=-1)

    h, _ = conv3x3_bn_relu(x, w1, gamma1, beta1, out_dtype=jnp.bfloat16)
    o, c_out = conv3x3_bn_relu(h, w2, gamma2, beta2, out_dtype=jnp.float32)
    o = o[..., :c_out]                                        # drop channel pad
    return jnp.transpose(o, (0, 3, 1, 2))                     # NHWC -> NCHW


# --------------------------------- main --------------------------------------
if __name__ == "__main__":
    key = jax.random.PRNGKey(0)
    k1, k2, k3, k4 = jax.random.split(key, 4)

    # x1: low-res feature map to be upsampled; x2: skip connection.
    N, C1, C2 = 2, 4, 4
    x1 = jax.random.normal(k1, (N, C1, 8, 8), dtype=jnp.float32)
    x2 = jax.random.normal(k2, (N, C2, 16, 16), dtype=jnp.float32)

    in_channels = C1 + C2          # channels after concat = 8
    out_channels = 4               # mid_channels defaults to out_channels
    w1 = 0.1 * jax.random.normal(k3, (out_channels, in_channels, 3, 3),
                                 dtype=jnp.float32)
    w2 = 0.1 * jax.random.normal(k4, (out_channels, out_channels, 3, 3),
                                 dtype=jnp.float32)

    out = jax.jit(up_forward)(x1, x2, w1, w2)
    out = jax.block_until_ready(out)

    assert out.shape == (N, out_channels, 16, 16), out.shape
    assert bool(jnp.all(jnp.isfinite(out)))
    print("KERNEL_OK")
</pallas_src>

<mosaic_0001>
module attributes {stable_mosaic.version = 11 : i64} {
  func.func private @main(%arg0: i32) attributes {dimension_semantics = [#tpu.dimension_semantics<core_parallel>], iteration_bounds = array<i64: 2>, tpu.core_type = #tpu.core_type<sc_scalar_subcore>, window_params = []} {
    return
  }
}

module attributes {stable_mosaic.version = 11 : i64} {
  func.func private @main(%arg0: i32) attributes {dimension_semantics = [#tpu.dimension_semantics<core_parallel>], iteration_bounds = array<i64: 2>, tpu.core_type = #tpu.core_type<sc_scalar_subcore>, window_params = []} {
    return
  }
}

module attributes {stable_mosaic.version = 11 : i64} {
  func.func @_upsample_kernel(%arg0: i32, %arg1: i32, %arg2: memref<1x1x8x8xf32, #tpu.memory_space<vmem>>, %arg3: memref<16x8xf32, #tpu.memory_space<vmem>>, %arg4: memref<8x16xf32, #tpu.memory_space<vmem>>, %arg5: memref<1x1x16x16xbf16, #tpu.memory_space<vmem>>) attributes {dimension_semantics = [#tpu.dimension_semantics<parallel>, #tpu.dimension_semantics<parallel>], iteration_bounds = array<i64: 2, 4>, scalar_prefetch = 0 : i64, scratch_operands = 0 : i64, tpu.core_type = #tpu.core_type<tc>, window_params = [{transform_indices = @transform_0, window_bounds = array<i64: 1, 1, 8, 8>}, {pipeline_mode = #tpu.pipeline_mode<synchronous>, transform_indices = @transform_1, window_bounds = array<i64: 16, 8>}, {pipeline_mode = #tpu.pipeline_mode<synchronous>, transform_indices = @transform_2, window_bounds = array<i64: 8, 16>}, {transform_indices = @transform_3, window_bounds = array<i64: 1, 1, 16, 16>}]} {
    %c0 = arith.constant 0 : index
    %c0_0 = arith.constant 0 : index
    %0 = vector.load %arg3[%c0, %c0_0] : memref<16x8xf32, #tpu.memory_space<vmem>>, vector<16x8xf32>
    %c0_1 = arith.constant 0 : index
    %c0_2 = arith.constant 0 : index
    %c0_3 = arith.constant 0 : index
    %c0_4 = arith.constant 0 : index
    %1 = vector.load %arg2[%c0_1, %c0_2, %c0_3, %c0_4] : memref<1x1x8x8xf32, #tpu.memory_space<vmem>>, vector<1x1x8x8xf32>
    %2 = vector.shape_cast %1 : vector<1x1x8x8xf32> to vector<8x8xf32>
    %cst = arith.constant dense<0.000000e+00> : vector<16x8xf32>
    %3 = tpu.matmul %0, %2, %cst {dimension_numbers = #tpu.dot_dimension_numbers<[1], [0], [0], [1], [0, 0, 1, 1], [], []>} : vector<16x8xf32>, vector<8x8xf32>, vector<16x8xf32> -> vector<16x8xf32>
    %c0_5 = arith.constant 0 : index
    %c0_6 = arith.constant 0 : index
    %4 = vector.load %arg4[%c0_5, %c0_6] : memref<8x16xf32, #tpu.memory_space<vmem>>, vector<8x16xf32>
    %cst_7 = arith.constant dense<0.000000e+00> : vector<16x16xf32>
    %5 = tpu.matmul %3, %4, %cst_7 {dimension_numbers = #tpu.dot_dimension_numbers<[1], [0], [0], [1], [0, 0, 1, 1], [], []>} : vector<16x8xf32>, vector<8x16xf32>, vector<16x16xf32> -> vector<16x16xf32>
    %6 = arith.truncf %5 : vector<16x16xf32> to vector<16x16xbf16>
    %c0_8 = arith.constant 0 : index
    %c0_9 = arith.constant 0 : index
    %c0_10 = arith.constant 0 : index
    %c0_11 = arith.constant 0 : index
    %7 = vector.load %arg5[%c0_8, %c0_9, %c0_10, %c0_11] : memref<1x1x16x16xbf16, #tpu.memory_space<vmem>>, vector<1x1x16x16xbf16>
    %8 = vector.shape_cast %7 : vector<1x1x16x16xbf16> to vector<16x16xbf16>
    %9 = vector.shape_cast %6 : vector<16x16xbf16> to vector<1x1x16x16xbf16>
    tpu.vector_store %arg5[%c0_8, %c0_9, %c0_10, %c0_11], %9 {strides = array<i32>} : memref<1x1x16x16xbf16, #tpu.memory_space<vmem>>, vector<1x1x16x16xbf16>,
    return
  }
  func.func @transform_0(%arg0: i32, %arg1: i32) -> (i32, i32, i32, i32) {
    %c0_i32 = arith.constant 0 : i32
    %c0_i32_0 = arith.constant 0 : i32
    %c0_i32_1 = arith.constant 0 : i32
    return %arg0, %arg1, %c0_i32, %c0_i32_0 : i32, i32, i32, i32
  }
  func.func @transform_1(%arg0: i32, %arg1: i32) -> (i32, i32) {
    %c0_i32 = arith.constant 0 : i32
    %c0_i32_0 = arith.constant 0 : i32
    %c0_i32_1 = arith.constant 0 : i32
    return %c0_i32, %c0_i32_0 : i32, i32
  }
  func.func @transform_2(%arg0: i32, %arg1: i32) -> (i32, i32) {
    %c0_i32 = arith.constant 0 : i32
    %c0_i32_0 = arith.constant 0 : i32
    %c0_i32_1 = arith.constant 0 : i32
    return %c0_i32, %c0_i32_0 : i32, i32
  }
  func.func @transform_3(%arg0: i32, %arg1: i32) -> (i32, i32, i32, i32) {
    %c0_i32 = arith.constant 0 : i32
    %c0_i32_0 = arith.constant 0 : i32
    %c0_i32_1 = arith.constant 0 : i32
    return %arg0, %arg1, %c0_i32, %c0_i32_0 : i32, i32, i32, i32
  }
}

module attributes {stable_mosaic.version = 11 : i64} {
  func.func @_matmul_bn_stats_kernel(%arg0: i32, %arg1: i32, %arg2: i32, %arg3: memref<512x128xbf16, #tpu.memory_space<vmem>>, %arg4: memref<128x128xbf16, #tpu.memory_space<vmem>>, %arg5: memref<512x128xbf16, #tpu.memory_space<vmem>>, %arg6: memref<1x1x128xf32, #tpu.memory_space<vmem>>, %arg7: memref<1x1x128xf32, #tpu.memory_space<vmem>>, %arg8: memref<512x128xf32, #tpu.memory_space<vmem>>) attributes {dimension_semantics = [#tpu.dimension_semantics<parallel>, #tpu.dimension_semantics<parallel>, #tpu.dimension_semantics<arbitrary>], iteration_bounds = array<i64: 1, 1, 1>, scalar_prefetch = 0 : i64, scratch_operands = 1 : i64, tpu.core_type = #tpu.core_type<tc>, window_params = [{transform_indices = @transform_0, window_bounds = array<i64: 512, 128>}, {transform_indices = @transform_1, window_bounds = array<i64: 128, 128>}, {transform_indices = @transform_2, window_bounds = array<i64: 512, 128>}, {transform_indices = @transform_3, window_bounds = array<i64: 1, 1, 128>}, {transform_indices = @transform_4, window_bounds = array<i64: 1, 1, 128>}]} {
    %c0_i32 = arith.constant 0 : i32
    %0 = arith.cmpi eq, %arg2, %c0_i32 : i32
    %1 = arith.extui %0 : i1 to i32
    %c0_i32_0 = arith.constant 0 : i32
    %2 = arith.cmpi ne, %1, %c0_i32_0 : i32
    scf.if %2 {
      %cst_10 = arith.constant 0.000000e+00 : f32
      %12 = vector.broadcast %cst_10 : f32 to vector<512x128xf32>
      %c0_11 = arith.constant 0 : index
      %c0_12 = arith.constant 0 : index
      %13 = vector.load %arg8[%c0_11, %c0_12] : memref<512x128xf32, #tpu.memory_space<vmem>>, vector<512x128xf32>
      tpu.vector_store %arg8[%c0_11, %c0_12], %12 {strides = array<i32>} : memref<512x128xf32, #tpu.memory_space<vmem>>, vector<512x128xf32>,
    } else {
    }
    %c0 = arith.constant 0 : index
    %c0_1 = arith.constant 0 : index
    %3 = vector.load %arg8[%c0, %c0_1] : memref<512x128xf32, #tpu.memory_space<vmem>>, vector<512x128xf32>
    %c0_2 = arith.constant 0 : index
    %c0_3 = arith.constant 0 : index
    %4 = vector.load %arg3[%c0_2, %c0_3] : memref<512x128xbf16, #tpu.memory_space<vmem>>, vector<512x128xbf16>
    %c0_4 = arith.constant 0 : index
    %c0_5 = arith.constant 0 : index
    %5 = vector.load %arg4[%c0_4, %c0_5] : memref<128x128xbf16, #tpu.memory_space<vmem>>, vector<128x128xbf16>
    %cst = arith.constant dense<0.000000e+00> : vector<512x128xf32>
    %6 = tpu.matmul %4, %5, %cst {dimension_numbers = #tpu.dot_dimension_numbers<[1], [0], [0], [1], [0, 0, 1, 1], [], []>} : vector<512x128xbf16>, vector<128x128xbf16>, vector<512x128xf32> -> vector<512x128xf32>
    %7 = arith.addf %3, %6 : vector<512x128xf32>
    %c0_6 = arith.constant 0 : index
    %c0_7 = arith.constant 0 : index
    %8 = vector.load %arg8[%c0_6, %c0_7] : memref<512x128xf32, #tpu.memory_space<vmem>>, vector<512x128xf32>
    tpu.vector_store %arg8[%c0_6, %c0_7], %7 {strides = array<i32>} : memref<512x128xf32, #tpu.memory_space<vmem>>, vector<512x128xf32>,
    %c0_i32_8 = arith.constant 0 : i32
    %9 = arith.cmpi eq, %arg2, %c0_i32_8 : i32
    %10 = arith.extui %9 : i1 to i32
    %c0_i32_9 = arith.constant 0 : i32
    %11 = arith.cmpi ne, %10, %c0_i32_9 : i32
    scf.if %11 {
      %c0_10 = arith.constant 0 : index
      %c0_11 = arith.constant 0 : index
      %12 = vector.load %arg8[%c0_10, %c0_11] : memref<512x128xf32, #tpu.memory_space<vmem>>, vector<512x128xf32>
      %13 = arith.truncf %12 : vector<512x128xf32> to vector<512x128xbf16>
      %c0_12 = arith.constant 0 : index
      %c0_13 = arith.constant 0 : index
      %14 = vector.load %arg5[%c0_12, %c0_13] : memref<512x128xbf16, #tpu.memory_space<vmem>>, vector<512x128xbf16>
      tpu.vector_store %arg5[%c0_12, %c0_13], %13 {strides = array<i32>} : memref<512x128xbf16, #tpu.memory_space<vmem>>, vector<512x128xbf16>,
      %cst_14 = arith.constant dense<0.000000e+00> : vector<128xf32>
      %15 = vector.multi_reduction <add>, %12, %cst_14 [0] : vector<512x128xf32> to vector<128xf32>
      %16 = vector.shape_cast %15 : vector<128xf32> to vector<1x128xf32>
      %17 = vector.shape_cast %16 : vector<1x128xf32> to vector<1x1x128xf32>
      %c0_15 = arith.constant 0 : index
      %c0_16 = arith.constant 0 : index
      %c0_17 = arith.constant 0 : index
      %18 = vector.load %arg6[%c0_15, %c0_16, %c0_17] : memref<1x1x128xf32, #tpu.memory_space<vmem>>, vector<1x1x128xf32>
      tpu.vector_store %arg6[%c0_15, %c0_16, %c0_17], %17 {strides = array<i32>} : memref<1x1x128xf32, #tpu.memory_space<vmem>>, vector<1x1x128xf32>,
      %19 = arith.mulf %12, %12 : vector<512x128xf32>
      %cst_18 = arith.constant dense<0.000000e+00> : vector<128xf32>
      %20 = vector.multi_reduction <add>, %19, %cst_18 [0] : vector<512x128xf32> to vector<128xf32>
      %21 = vector.shape_cast %20 : vector<128xf32> to vector<1x128xf32>
      %22 = vector.shape_cast %21 : vector<1x128xf32> to vector<1x1x128xf32>
      %c0_19 = arith.constant 0 : index
      %c0_20 = arith.constant 0 : index
      %c0_21 = arith.constant 0 : index
      %23 = vector.load %arg7[%c0_19, %c0_20, %c0_21] : memref<1x1x128xf32, #tpu.memory_space<vmem>>, vector<1x1x128xf32>
      tpu.vector_store %arg7[%c0_19, %c0_20, %c0_21], %22 {strides = array<i32>} : memref<1x1x128xf32, #tpu.memory_space<vmem>>, vector<1x1x128xf32>,
    } else {
    }
    return
  }
  func.func @transform_0(%arg0: i32, %arg1: i32, %arg2: i32) -> (i32, i32) {
    %c0_i32 = arith.constant 0 : i32
    return %arg0, %arg2 : i32, i32
  }
  func.func @transform_1(%arg0: i32, %arg1: i32, %arg2: i32) -> (i32, i32) {
    %c0_i32 = arith.constant 0 : i32
    return %arg2, %arg1 : i32, i32
  }
  func.func @transform_2(%arg0: i32, %arg1: i32, %arg2: i32) -> (i32, i32) {
    %c0_i32 = arith.constant 0 : i32
    return %arg0, %arg1 : i32, i32
  }
  func.func @transform_3(%arg0: i32, %arg1: i32, %arg2: i32) -> (i32, i32, i32) {
    %c0_i32 = arith.constant 0 : i32
    %c0_i32_0 = arith.constant 0 : i32
    return %arg0, %c0_i32, %arg1 : i32, i32, i32
  }
  func.func @transform_4(%arg0: i32, %arg1: i32, %arg2: i32) -> (i32, i32, i32) {
    %c0_i32 = arith.constant 0 : i32
    %c0_i32_0 = arith.constant 0 : i32
    return %arg0, %c0_i32, %arg1 : i32, i32, i32
  }
}

module attributes {stable_mosaic.version = 11 : i64} {
  func.func @_bn_relu_kernel(%arg0: i32, %arg1: memref<512x128xbf16, #tpu.memory_space<vmem>>, %arg2: memref<1x128xf32, #tpu.memory_space<vmem>>, %arg3: memref<1x128xf32, #tpu.memory_space<vmem>>, %arg4: memref<512x128xbf16, #tpu.memory_space<vmem>>) attributes {dimension_semantics = [#tpu.dimension_semantics<parallel>], iteration_bounds = array<i64: 1>, scalar_prefetch = 0 : i64, scratch_operands = 0 : i64, tpu.core_type = #tpu.core_type<tc>, window_params = [{transform_indices = @transform_0, window_bounds = array<i64: 512, 128>}, {pipeline_mode = #tpu.pipeline_mode<synchronous>, transform_indices = @transform_1, window_bounds = array<i64: 1, 128>}, {pipeline_mode = #tpu.pipeline_mode<synchronous>, transform_indices = @transform_2, window_bounds = array<i64: 1, 128>}, {transform_indices = @transform_3, window_bounds = array<i64: 512, 128>}]} {
    %c0 = arith.constant 0 : index
    %c0_0 = arith.constant 0 : index
    %0 = vector.load %arg1[%c0, %c0_0] : memref<512x128xbf16, #tpu.memory_space<vmem>>, vector<512x128xbf16>
    %1 = arith.extf %0 : vector<512x128xbf16> to vector<512x128xf32>
    %c0_1 = arith.constant 0 : index
    %c0_2 = arith.constant 0 : index
    %2 = vector.load %arg2[%c0_1, %c0_2] : memref<1x128xf32, #tpu.memory_space<vmem>>, vector<1x128xf32>
    %3 = vector.broadcast %2 : vector<1x128xf32> to vector<512x128xf32>
    %4 = arith.mulf %1, %3 : vector<512x128xf32>
    %c0_3 = arith.constant 0 : index
    %c0_4 = arith.constant 0 : index
    %5 = vector.load %arg3[%c0_3, %c0_4] : memref<1x128xf32, #tpu.memory_space<vmem>>, vector<1x128xf32>
    %6 = vector.broadcast %5 : vector<1x128xf32> to vector<512x128xf32>
    %7 = arith.addf %4, %6 : vector<512x128xf32>
    %cst = arith.constant 0.000000e+00 : f32
    %8 = vector.broadcast %cst : f32 to vector<512x128xf32>
    %9 = arith.maximumf %7, %8 : vector<512x128xf32>
    %10 = arith.truncf %9 : vector<512x128xf32> to vector<512x128xbf16>
    %c0_5 = arith.constant 0 : index
    %c0_6 = arith.constant 0 : index
    %11 = vector.load %arg4[%c0_5, %c0_6] : memref<512x128xbf16, #tpu.memory_space<vmem>>, vector<512x128xbf16>
    tpu.vector_store %arg4[%c0_5, %c0_6], %10 {strides = array<i32>} : memref<512x128xbf16, #tpu.memory_space<vmem>>, vector<512x128xbf16>,
    return
  }
  func.func @transform_0(%arg0: i32) -> (i32, i32) {
    %c0_i32 = arith.constant 0 : i32
    %c0_i32_0 = arith.constant 0 : i32
    return %arg0, %c0_i32 : i32, i32
  }
  func.func @transform_1(%arg0: i32) -> (i32, i32) {
    %c0_i32 = arith.constant 0 : i32
    %c0_i32_0 = arith.constant 0 : i32
    %c0_i32_1 = arith.constant 0 : i32
    return %c0_i32, %c0_i32_0 : i32, i32
  }
  func.func @transform_2(%arg0: i32) -> (i32, i32) {
    %c0_i32 = arith.constant 0 : i32
    %c0_i32_0 = arith.constant 0 : i32
    %c0_i32_1 = arith.constant 0 : i32
    return %c0_i32, %c0_i32_0 : i32, i32
  }
  func.func @transform_3(%arg0: i32) -> (i32, i32) {
    %c0_i32 = arith.constant 0 : i32
    %c0_i32_0 = arith.constant 0 : i32
    return %arg0, %c0_i32 : i32, i32
  }
}

module attributes {stable_mosaic.version = 11 : i64} {
  func.func @_bn_relu_kernel(%arg0: i32, %arg1: memref<512x128xbf16, #tpu.memory_space<vmem>>, %arg2: memref<1x128xf32, #tpu.memory_space<vmem>>, %arg3: memref<1x128xf32, #tpu.memory_space<vmem>>, %arg4: memref<512x128xf32, #tpu.memory_space<vmem>>) attributes {dimension_semantics = [#tpu.dimension_semantics<parallel>], iteration_bounds = array<i64: 1>, scalar_prefetch = 0 : i64, scratch_operands = 0 : i64, tpu.core_type = #tpu.core_type<tc>, window_params = [{transform_indices = @transform_0, window_bounds = array<i64: 512, 128>}, {pipeline_mode = #tpu.pipeline_mode<synchronous>, transform_indices = @transform_1, window_bounds = array<i64: 1, 128>}, {pipeline_mode = #tpu.pipeline_mode<synchronous>, transform_indices = @transform_2, window_bounds = array<i64: 1, 128>}, {transform_indices = @transform_3, window_bounds = array<i64: 512, 128>}]} {
    %c0 = arith.constant 0 : index
    %c0_0 = arith.constant 0 : index
    %0 = vector.load %arg1[%c0, %c0_0] : memref<512x128xbf16, #tpu.memory_space<vmem>>, vector<512x128xbf16>
    %1 = arith.extf %0 : vector<512x128xbf16> to vector<512x128xf32>
    %c0_1 = arith.constant 0 : index
    %c0_2 = arith.constant 0 : index
    %2 = vector.load %arg2[%c0_1, %c0_2] : memref<1x128xf32, #tpu.memory_space<vmem>>, vector<1x128xf32>
    %3 = vector.broadcast %2 : vector<1x128xf32> to vector<512x128xf32>
    %4 = arith.mulf %1, %3 : vector<512x128xf32>
    %c0_3 = arith.constant 0 : index
    %c0_4 = arith.constant 0 : index
    %5 = vector.load %arg3[%c0_3, %c0_4] : memref<1x128xf32, #tpu.memory_space<vmem>>, vector<1x128xf32>
    %6 = vector.broadcast %5 : vector<1x128xf32> to vector<512x128xf32>
    %7 = arith.addf %4, %6 : vector<512x128xf32>
    %cst = arith.constant 0.000000e+00 : f32
    %8 = vector.broadcast %cst : f32 to vector<512x128xf32>
    %9 = arith.maximumf %7, %8 : vector<512x128xf32>
    %c0_5 = arith.constant 0 : index
    %c0_6 = arith.constant 0 : index
    %10 = vector.load %arg4[%c0_5, %c0_6] : memref<512x128xf32, #tpu.memory_space<vmem>>, vector<512x128xf32>
    tpu.vector_store %arg4[%c0_5, %c0_6], %9 {strides = array<i32>} : memref<512x128xf32, #tpu.memory_space<vmem>>, vector<512x128xf32>,
    return
  }
  func.func @transform_0(%arg0: i32) -> (i32, i32) {
    %c0_i32 = arith.constant 0 : i32
    %c0_i32_0 = arith.constant 0 : i32
    return %arg0, %c0_i32 : i32, i32
  }
  func.func @transform_1(%arg0: i32) -> (i32, i32) {
    %c0_i32 = arith.constant 0 : i32
    %c0_i32_0 = arith.constant 0 : i32
    %c0_i32_1 = arith.constant 0 : i32
    return %c0_i32, %c0_i32_0 : i32, i32
  }
  func.func @transform_2(%arg0: i32) -> (i32, i32) {
    %c0_i32 = arith.constant 0 : i32
    %c0_i32_0 = arith.constant 0 : i32
    %c0_i32_1 = arith.constant 0 : i32
    return %c0_i32, %c0_i32_0 : i32, i32
  }
  func.func @transform_3(%arg0: i32) -> (i32, i32) {
    %c0_i32 = arith.constant 0 : i32
    %c0_i32_0 = arith.constant 0 : i32
    return %arg0, %c0_i32 : i32, i32
  }
}

module attributes {stable_mosaic.version = 11 : i64} {
  func.func @_matmul_bn_stats_kernel(%arg0: i32, %arg1: i32, %arg2: i32, %arg3: memref<512x512xbf16, #tpu.memory_space<vmem>>, %arg4: memref<512x128xbf16, #tpu.memory_space<vmem>>, %arg5: memref<512x128xbf16, #tpu.memory_space<vmem>>, %arg6: memref<1x1x128xf32, #tpu.memory_space<vmem>>, %arg7: memref<1x1x128xf32, #tpu.memory_space<vmem>>, %arg8: memref<512x128xf32, #tpu.memory_space<vmem>>) attributes {dimension_semantics = [#tpu.dimension_semantics<parallel>, #tpu.dimension_semantics<parallel>, #tpu.dimension_semantics<arbitrary>], iteration_bounds = array<i64: 1, 1, 3>, scalar_prefetch = 0 : i64, scratch_operands = 1 : i64, tpu.core_type = #tpu.core_type<tc>, window_params = [{transform_indices = @transform_0, window_bounds = array<i64: 512, 512>}, {transform_indices = @transform_1, window_bounds = array<i64: 512, 128>}, {transform_indices = @transform_2, window_bounds = array<i64: 512, 128>}, {transform_indices = @transform_3, window_bounds = array<i64: 1, 1, 128>}, {transform_indices = @transform_4, window_bounds = array<i64: 1, 1, 128>}]} {
    %c0_i32 = arith.constant 0 : i32
    %0 = arith.cmpi eq, %arg2, %c0_i32 : i32
    %1 = arith.extui %0 : i1 to i32
    %c0_i32_0 = arith.constant 0 : i32
    %2 = arith.cmpi ne, %1, %c0_i32_0 : i32
    scf.if %2 {
      %cst_9 = arith.constant 0.000000e+00 : f32
      %12 = vector.broadcast %cst_9 : f32 to vector<512x128xf32>
      %c0_10 = arith.constant 0 : index
      %c0_11 = arith.constant 0 : index
      %13 = vector.load %arg8[%c0_10, %c0_11] : memref<512x128xf32, #tpu.memory_space<vmem>>, vector<512x128xf32>
      tpu.vector_store %arg8[%c0_10, %c0_11], %12 {strides = array<i32>} : memref<512x128xf32, #tpu.memory_space<vmem>>, vector<512x128xf32>,
    } else {
    }
    %c0 = arith.constant 0 : index
    %c0_1 = arith.constant 0 : index
    %3 = vector.load %arg8[%c0, %c0_1] : memref<512x128xf32, #tpu.memory_space<vmem>>, vector<512x128xf32>
    %c0_2 = arith.constant 0 : index
    %c0_3 = arith.constant 0 : index
    %4 = vector.load %arg3[%c0_2, %c0_3] : memref<512x512xbf16, #tpu.memory_space<vmem>>, vector<512x512xbf16>
    %c0_4 = arith.constant 0 : index
    %c0_5 = arith.constant 0 : index
    %5 = vector.load %arg4[%c0_4, %c0_5] : memref<512x128xbf16, #tpu.memory_space<vmem>>, vector<512x128xbf16>
    %cst = arith.constant dense<0.000000e+00> : vector<512x128xf32>
    %6 = tpu.matmul %4, %5, %cst {dimension_numbers = #tpu.dot_dimension_numbers<[1], [0], [0], [1], [0, 0, 1, 1], [], []>} : vector<512x512xbf16>, vector<512x128xbf16>, vector<512x128xf32> -> vector<512x128xf32>
    %7 = arith.addf %3, %6 : vector<512x128xf32>
    %c0_6 = arith.constant 0 : index
    %c0_7 = arith.constant 0 : index
    %8 = vector.load %arg8[%c0_6, %c0_7] : memref<512x128xf32, #tpu.memory_space<vmem>>, vector<512x128xf32>
    tpu.vector_store %arg8[%c0_6, %c0_7], %7 {strides = array<i32>} : memref<512x128xf32, #tpu.memory_space<vmem>>, vector<512x128xf32>,
    %c2_i32 = arith.constant 2 : i32
    %9 = arith.cmpi eq, %arg2, %c2_i32 : i32
    %10 = arith.extui %9 : i1 to i32
    %c0_i32_8 = arith.constant 0 : i32
    %11 = arith.cmpi ne, %10, %c0_i32_8 : i32
    scf.if %11 {
      %c0_9 = arith.constant 0 : index
      %c0_10 = arith.constant 0 : index
      %12 = vector.load %arg8[%c0_9, %c0_10] : memref<512x128xf32, #tpu.memory_space<vmem>>, vector<512x128xf32>
      %13 = arith.truncf %12 : vector<512x128xf32> to vector<512x128xbf16>
      %c0_11 = arith.constant 0 : index
      %c0_12 = arith.constant 0 : index
      %14 = vector.load %arg5[%c0_11, %c0_12] : memref<512x128xbf16, #tpu.memory_space<vmem>>, vector<512x128xbf16>
      tpu.vector_store %arg5[%c0_11, %c0_12], %13 {strides = array<i32>} : memref<512x128xbf16, #tpu.memory_space<vmem>>, vector<512x128xbf16>,
      %cst_13 = arith.constant dense<0.000000e+00> : vector<128xf32>
      %15 = vector.multi_reduction <add>, %12, %cst_13 [0] : vector<512x128xf32> to vector<128xf32>
      %16 = vector.shape_cast %15 : vector<128xf32> to vector<1x128xf32>
      %17 = vector.shape_cast %16 : vector<1x128xf32> to vector<1x1x128xf32>
      %c0_14 = arith.constant 0 : index
      %c0_15 = arith.constant 0 : index
      %c0_16 = arith.constant 0 : index
      %18 = vector.load %arg6[%c0_14, %c0_15, %c0_16] : memref<1x1x128xf32, #tpu.memory_space<vmem>>, vector<1x1x128xf32>
      tpu.vector_store %arg6[%c0_14, %c0_15, %c0_16], %17 {strides = array<i32>} : memref<1x1x128xf32, #tpu.memory_space<vmem>>, vector<1x1x128xf32>,
      %19 = arith.mulf %12, %12 : vector<512x128xf32>
      %cst_17 = arith.constant dense<0.000000e+00> : vector<128xf32>
      %20 = vector.multi_reduction <add>, %19, %cst_17 [0] : vector<512x128xf32> to vector<128xf32>
      %21 = vector.shape_cast %20 : vector<128xf32> to vector<1x128xf32>
      %22 = vector.shape_cast %21 : vector<1x128xf32> to vector<1x1x128xf32>
      %c0_18 = arith.constant 0 : index
      %c0_19 = arith.constant 0 : index
      %c0_20 = arith.constant 0 : index
      %23 = vector.load %arg7[%c0_18, %c0_19, %c0_20] : memref<1x1x128xf32, #tpu.memory_space<vmem>>, vector<1x1x128xf32>
      tpu.vector_store %arg7[%c0_18, %c0_19, %c0_20], %22 {strides = array<i32>} : memref<1x1x128xf32, #tpu.memory_space<vmem>>, vector<1x1x128xf32>,
    } else {
    }
    return
  }
  func.func @transform_0(%arg0: i32, %arg1: i32, %arg2: i32) -> (i32, i32) {
    %c0_i32 = arith.constant 0 : i32
    return %arg0, %arg2 : i32, i32
  }
  func.func @transform_1(%arg0: i32, %arg1: i32, %arg2: i32) -> (i32, i32) {
    %c0_i32 = arith.constant 0 : i32
    return %arg2, %arg1 : i32, i32
  }
  func.func @transform_2(%arg0: i32, %arg1: i32, %arg2: i32) -> (i32, i32) {
    %c0_i32 = arith.constant 0 : i32
    return %arg0, %arg1 : i32, i32
  }
  func.func @transform_3(%arg0: i32, %arg1: i32, %arg2: i32) -> (i32, i32, i32) {
    %c0_i32 = arith.constant 0 : i32
    %c0_i32_0 = arith.constant 0 : i32
    return %arg0, %c0_i32, %arg1 : i32, i32, i32
  }
  func.func @transform_4(%arg0: i32, %arg1: i32, %arg2: i32) -> (i32, i32, i32) {
    %c0_i32 = arith.constant 0 : i32
    %c0_i32_0 = arith.constant 0 : i32
    return %arg0, %c0_i32, %arg1 : i32, i32, i32
  }
}

</mosaic_0001>

<bundles_post_ra>
// kernel: up_forward.5
= control target key start
LH: loop header
LB: loop body
LE: loop exit
PB: predicated region body
PF: predicated region fallthrough
CT: control target
= control target key end

     0   :  { %8 = vsyncpa [#allocation3], 0  ;;  %s682_s12 = smov 0   ;;  %s684_s13 = smov 0   ;;  %s790_s0 = inlined_call_operand.vmem [shape: f32[2,4,8,8], index: 0, kind: input, shape index: {}]   ;;  %s791_s1 = inlined_call_operand.vmem [shape: f32[16,8], index: 1, kind: input, shape index: {}]   ;;  %s792_s2 = inlined_call_operand.hbm [shape: f32[8,16], index: 2, kind: input, shape index: {}]   ;;  %s793_s3 = inlined_call_operand.vmem [shape: bf16[2,4,16,16], index: 3, kind: output, shape index: {}]  }
   0x1   :  { %s686_s14 = smov 0   ;;  %s688_s15 = smov 0  }
   0x2   :  { %s690_s16 = smov 0  }
   0x3 LB: > { %s500_s17 = sadd.s32 4294967295, %s659_s16   ;;  %s23_s18 = sadd.s32 1, %s651_s14  ;;  %s659_s16 = sphi %s690_s16, %s14_s16   ;;  %s655_s15 = sphi %s688_s15, %s805_s15   ;;  %s651_s14 = sphi %s686_s14, %s804_s14   ;;  %s647_s13 = sphi %s684_s13, %s803_s13   ;;  %s643_s12 = sphi %s682_s12, %s802_s12  }
   0x4   : > { %p24_p0 = scmp.ge.s32.totalorder %s23_s18, 4  ;;  %s26_s19 = sadd.s32 1, %s655_s15 }
   0x5   : > { %p502_p1 = scmp.ge.s32.totalorder %s659_s16, 1  ;;  %p129_p2 = scmp.lt.s32.totalorder %s659_s16, 9 }
   0x6   : > { %s807_s18 = smov (%p24_p0, %s23_s18), 0  ;;  %s809_s19 = smov (!%p24_p0, %s26_s19), %s655_s15 }
   0x7   : > { %p715_p3 = pnand %p502_p1, %p129_p2  ;;  %p28_p4 = scmp.ge.s32.totalorder %s809_s19, 2 }
   0x8   : > { %p719_p5 = scmp.eq.s32.totalorder %s500_s17, 0  ;;  %s661_s22 = smov [#allocation2]  }
   0x9   : > { %s797_s20 = scalar_select %p715_p3, 1, 0 }
   0xa   : > { %s798_s21 = scalar_select %p719_p5, 1, 0 }
   0xb   : > { %p542_p6 = pneg %p715_p3  ;;  %s811_s19 = smov (%p28_p4, %s809_s19), 0 }
   0xc   : > { %s145_s23 = sshll.u32 %s661_s22, 4  ;;  %s589_s27 = scalar_lea.hbm %s792_s2, 128  ;;  %s146_s23 = int_to_ptr.vmem [resolvable:$true] %s145_s23 }
   0xd   : > { %p729_p7 = pnand %p719_p5, %p542_p6  ;;  %p590_p8 = scmp.ne.s32.totalorder %s792_s2, %s589_s27 }
   0xe   : > { %p596_p12 = scmp.lt.u32.totalorder %s589_s27, %s792_s2 }
   0xf   : > { %p591_p9 = pneg %p729_p7 }
  0x11   : > { %p592_p10 = pnand %p591_p9, %p590_p8 }
  0x13   : > { %p593_p11 = pneg %p592_p10 }
  0x15   : > { %p598_p13 = pnand %p596_p12, %p593_p11 }
  0x17   : > { %601 = shalt.err (!%p598_p13)
}
  0x18   : > { %s602_s5 = scalar_lea.vmem %s146_s23, 128  ;;  %p610_p4 = scmp.lt.s32.totalorder %s146_s23, %s146_s23 }
  0x19   : > { %p603_p0 = scmp.ne.s32.totalorder %s146_s23, %s602_s5  ;;  %p611_p6 = scmp.lt.s32.totalorder %s602_s5, %s602_s5 }
  0x1b   : > { %p605_p1 = pnand %p603_p0, %p591_p9  ;;  %p612_p5 = por %p611_p6, %p610_p4 }
  0x1d   : > { %p606_p2 = pneg %p605_p1 }
  0x1f   : > { %p613_p3 = pnand %p612_p5, %p606_p2 }
  0x21   : > { %616 = shalt.err (!%p613_p3)
}
  0x22   : > { %545 = dma.hbm_to_vmem [thread:$0]  (!%p729_p7), %s792_s2, 128, %s146_s23, [#allocation3]  }
  0x23   : > { %p800_p8 = scmp.ne.s32.totalorder %s797_s20, 0 }
  0x24   : > { %p801_p10 = scmp.ne.s32.totalorder (!%p800_p8), %s798_s21, 0 }
  0x25   : > { %169 = sbr.rel (%p800_p8) target bundleno = 485 (0x1e5), region = 32 }
  0x2c   : > { %638 = dma.done.wait (%p801_p10), [#allocation3], 128  }
  0x2d   : > { %640 = vsyncadd (%p801_p10), [#allocation3], 4294967168  ;;  %p200_p3 = scmp.lt.s32.totalorder %s647_s13, 1  ;;  %p202_p5 = scmp.lt.s32.totalorder %s643_s12, 3  ;;  %vm220_vm0 = vcmask 64512   ;;  %v217_v0 = vld [vmem:[%s791_s1] sm:$0xff] }
  0x2e   : > { %530 = vmatprep.mubr.msk.f32.mxu0 %vm220_vm0, %v217_v0  ;;  %v218_v2 = vld [vmem:[%s791_s1 + $0x8] sm:$0xff]  ;;  %v302_v3 = vld [vmem:[#allocation2] sm:$0xff]  ;;  %vm392_vm1 = vcmask 125952  }
  0x2f   : > { %s813_s13 = smov (!%p200_p3, %s647_s13), 1  ;;  %s815_s12 = smov (!%p202_p5, %s643_s12), 3  ;;  %533 = vmatprep.subr.mxu1 %v302_v3 }
  0x30   : > { %s507_s8 = sshll.u32 %s813_s13, 2  ;;  %s510_s9 = sshll.u32 %s813_s13, 3  ;;  %534 = vmatpush3.msra.mxu1 %v302_v3 }
  0x31   : > { %s205_s10 = sadd.s32 %s507_s8, %s815_s12  ;;  %s509_s11 = sshll.u32 %s815_s12, 1 }
  0x32   : > { %s508_s17 = sshll.u32 %s205_s10, 3  ;;  %s214_s20 = sadd.s32 %s510_s9, %s509_s11 }
  0x33   : > { %s207_s21 = scalar_lea.vmem %s790_s0, %s508_s17  ;;  %s511_s12 = sshll.u32 %s214_s20, 2 }
  0x34   : > { %v219_v1 = vld [vmem:[%s207_s21] sm:$0xff]  ;;  %s216_s29 = scalar_lea.vmem %s793_s3, %s511_s12 }
  0x35   : > { %528 = vmatprep.subr.mxu0 %v219_v1 }
  0x36   : > { %529 = vmatpush3.msra.mxu0 %v219_v1 }
  0x37   : > { %531 = vmatmul.mubr.msk.f32.vlgmr.msra.gmra.mrb[0].mxu0 %vm220_vm0, %v218_v2 }
 0x10a   : > { %v532_v4 = vpop.f32.mrb[0].mxu0 }
 0x10b   : > { %v293_v5 = vpop.f32.mrb[1].mxu0 }
 0x10c   : > { %535 = vmatprep.mubr.msk.f32.mxu1 %vm220_vm0, %v293_v5 }
 0x10d   : > { %536 = vmatmul.mubr.msk.f32.vlgmr.msra.gmra.mrb[0].mxu1 %vm220_vm0, %v532_v4 }
 0x1e0   : > { %v537_v6 = vpop.f32.mrb[0].mxu1 }
 0x1e1   : > { %v521_v7 = vpack.c.bf16 %v537_v6, %v537_v6  ;;  %v375_v8 = vpop.f32.mrb[1].mxu1 }
 0x1e2   : > { %v520_v9 = vpack.c.bf16 %v375_v8, %v375_v8 }
 0x1e3   : > { %394 = vst.msk [vmem:[%s216_s29 + $0x4] sm:$0xf] %vm392_vm1, %v521_v7 }
 0x1e4   : > { %393 = vst.msk [vmem:[%s216_s29] sm:$0xf] %vm392_vm1, %v520_v9 }
 0x1e5 PF: > { %s14_s16 = sadd.s32 1, %s659_s16   ;;  %s802_s12 = smov %s651_s14 }
 0x1e6   : > { %p11_p7 = scmp.ge.s32.totalorder %s14_s16, 10   ;;  %s803_s13 = smov %s655_s15 }
 0x1e7   : > { %s804_s14 = smov %s807_s18  ;;  %s805_s15 = smov %s811_s19 }
 0x1e8   :  { %13 = sbr.rel (!%p11_p7) target bundleno = 3 (0x3), region = 67 }
 0x1ef   :  { %424 = vsyncpa [#allocation3], 1 }
 0x1f0   :  { %426 = vsyncpa [#allocation3 + $0x1], 1 }

// kernel: up_forward.7
= control target key start
LH: loop header
LB: loop body
LE: loop exit
PB: predicated region body
PF: predicated region fallthrough
CT: control target
= control target key end

     0   :  { %s1502_s0 = inlined_call_operand.vmem [shape: bf16[512,128], index: 0, kind: input, shape index: {}]   ;;  %s1503_s1 = inlined_call_operand.vmem [shape: f32[1,128], index: 1, kind: input, shape index: {}]   ;;  %s1504_s2 = inlined_call_operand.vmem [shape: f32[1,128], index: 2, kind: input, shape index: {}]   ;;  %s1505_s3 = inlined_call_operand.vmem [shape: bf16[512,128], index: 3, kind: output, shape index: {}]  }
   0x1   :  { %v803_v0 = vld [vmem:[%s1502_s0] sm:$0xff]   ;;  %v1090_v4 = vld [vmem:[%s1502_s0 + $0x8] sm:$0xff]   ;;  %v1091_v5 = vld [vmem:[%s1502_s0 + $0x10] sm:$0xff]  }
   0x2   :  { %v1178_v1 = vld [vmem:[%s1503_s1] ss:$0 sm:$0xff]  ;;  %v804_v2 = vunpack.c.l.bf16 %v803_v0  ;;  %v805_v3 = vunpack.c.h.bf16 %v803_v0  ;;  %v1092_v6 = vld [vmem:[%s1502_s0 + $0x18] sm:$0xff]   ;;  %v808_v8 = vunpack.c.l.bf16 %v1090_v4  ;;  %v809_v9 = vunpack.c.h.bf16 %v1090_v4  ;;  %v1094_v33 = vld [vmem:[%s1502_s0 + $0x28] sm:$0xff]  }
   0x3   :  { %v1192_v7 = vld [vmem:[%s1504_s2] ss:$0 sm:$0xff]  ;;  %v812_v10 = vunpack.c.l.bf16 %v1091_v5  ;;  %v813_v11 = vunpack.c.h.bf16 %v1091_v5  ;;  %v816_v14 = vunpack.c.l.bf16 %v1092_v6  ;;  %v817_v15 = vunpack.c.h.bf16 %v1092_v6  ;;  %v1095_v38 = vld [vmem:[%s1502_s0 + $0x30] sm:$0xff]   ;;  %v1096_v43 = vld [vmem:[%s1502_s0 + $0x38] sm:$0xff]  }
   0x4   :  { %v149_v12 = vmul.f32 %v804_v2, %v1178_v1  ;;  %v150_v13 = vmul.f32 %v805_v3, %v1178_v1  ;;  %v151_v16 = vmul.f32 %v808_v8, %v1178_v1  ;;  %v152_v17 = vmul.f32 %v809_v9, %v1178_v1  ;;  %v1093_v28 = vld [vmem:[%s1502_s0 + $0x20] sm:$0xff]  }
   0x5   :  { %v153_v18 = vmul.f32 %v812_v10, %v1178_v1  ;;  %v154_v19 = vmul.f32 %v813_v11, %v1178_v1  ;;  %v155_v22 = vmul.f32 %v816_v14, %v1178_v1  ;;  %v156_v23 = vmul.f32 %v817_v15, %v1178_v1  ;;  %v1097_v0 = vld [vmem:[%s1502_s0 + $0x40] sm:$0xff]   ;;  %v1098_v11 = vld [vmem:[%s1502_s0 + $0x48] sm:$0xff]  }
   0x6   :  { %v220_v20 = vadd.f32 %v1192_v7, %v149_v12  ;;  %v221_v21 = vadd.f32 %v1192_v7, %v150_v13  ;;  %v222_v24 = vadd.f32 %v1192_v7, %v151_v16  ;;  %v223_v25 = vadd.f32 %v1192_v7, %v152_v17  ;;  %v1099_v16 = vld [vmem:[%s1502_s0 + $0x50] sm:$0xff]  }
   0x7   :  { %v224_v26 = vadd.f32 %v1192_v7, %v153_v18  ;;  %v225_v27 = vadd.f32 %v1192_v7, %v154_v19  ;;  %v226_v31 = vadd.f32 %v1192_v7, %v155_v22  ;;  %v227_v32 = vadd.f32 %v1192_v7, %v156_v23 }
   0x8   :  { %v284_v29 = vmax.f32 %v220_v20, 0.0  ;;  %v285_v30 = vmax.f32 %v221_v21, 0.0  ;;  %v286_v34 = vmax.f32 %v222_v24, 0.0  ;;  %v287_v35 = vmax.f32 %v223_v25, 0.0  ;;  %v1100_v25 = vld [vmem:[%s1502_s0 + $0x58] sm:$0xff]  }
   0x9   :  { %v288_v36 = vmax.f32 %v224_v26, 0.0  ;;  %v289_v37 = vmax.f32 %v225_v27, 0.0  ;;  %v290_v40 = vmax.f32 %v226_v31, 0.0  ;;  %v291_v41 = vmax.f32 %v227_v32, 0.0 }
   0xa   :  { %v933_v39 = vpack.c.bf16 %v285_v30, %v284_v29  ;;  %v820_v42 = vunpack.c.l.bf16 %v1093_v28  ;;  %v938_v44 = vpack.c.bf16 %v287_v35, %v286_v34  ;;  %v821_v46 = vunpack.c.h.bf16 %v1093_v28 }
   0xb   :  { %v943_v45 = vpack.c.bf16 %v289_v37, %v288_v36  ;;  %v824_v47 = vunpack.c.l.bf16 %v1094_v33  ;;  %v948_v48 = vpack.c.bf16 %v291_v41, %v290_v40  ;;  %v825_v50 = vunpack.c.h.bf16 %v1094_v33 }
   0xc   :  { %934 = vst [vmem:[%s1505_s3] sm:$0xff] %v933_v39   ;;  %v157_v49 = vmul.f32 %v820_v42, %v1178_v1  ;;  %v828_v51 = vunpack.c.l.bf16 %v1095_v38  ;;  %1121 = vst [vmem:[%s1505_s3 + $0x8] sm:$0xff] %v938_v44   ;;  %v158_v52 = vmul.f32 %v821_v46, %v1178_v1  ;;  %v829_v54 = vunpack.c.h.bf16 %v1095_v38  ;;  %v1101_v38 = vld [vmem:[%s1502_s0 + $0x60] sm:$0xff]  }
   0xd   :  { %1122 = vst [vmem:[%s1505_s3 + $0x10] sm:$0xff] %v943_v45   ;;  %v159_v53 = vmul.f32 %v824_v47, %v1178_v1  ;;  %v832_v55 = vunpack.c.l.bf16 %v1096_v43  ;;  %1123 = vst [vmem:[%s1505_s3 + $0x18] sm:$0xff] %v948_v48   ;;  %v160_v57 = vmul.f32 %v825_v50, %v1178_v1  ;;  %v833_v59 = vunpack.c.h.bf16 %v1096_v43 }
   0xe   :  { %v228_v56 = vadd.f32 %v1192_v7, %v157_v49  ;;  %v161_v58 = vmul.f32 %v828_v51, %v1178_v1  ;;  %v229_v60 = vadd.f32 %v1192_v7, %v158_v52  ;;  %v162_v62 = vmul.f32 %v829_v54, %v1178_v1  ;;  %v1102_v51 = vld [vmem:[%s1502_s0 + $0x68] sm:$0xff]  }
   0xf   :  { %v230_v61 = vadd.f32 %v1192_v7, %v159_v53  ;;  %v163_v63 = vmul.f32 %v832_v55, %v1178_v1  ;;  %v231_v3 = vadd.f32 %v1192_v7, %v160_v57  ;;  %v164_v5 = vmul.f32 %v833_v59, %v1178_v1 }
  0x10   :  { %v292_v2 = vmax.f32 %v228_v56, 0.0  ;;  %v232_v4 = vadd.f32 %v1192_v7, %v161_v58  ;;  %v293_v6 = vmax.f32 %v229_v60, 0.0  ;;  %v233_v9 = vadd.f32 %v1192_v7, %v162_v62  ;;  %v1103_v60 = vld [vmem:[%s1502_s0 + $0x70] sm:$0xff]  }
  0x11   :  { %v294_v8 = vmax.f32 %v230_v61, 0.0  ;;  %v234_v10 = vadd.f32 %v1192_v7, %v163_v63  ;;  %v295_v12 = vmax.f32 %v231_v3, 0.0  ;;  %v235_v14 = vadd.f32 %v1192_v7, %v164_v5 }
  0x12   :  { %v296_v13 = vmax.f32 %v232_v4, 0.0  ;;  %v836_v15 = vunpack.c.l.bf16 %v1097_v0  ;;  %v953_v17 = vpack.c.bf16 %v293_v6, %v292_v2  ;;  %v297_v18 = vmax.f32 %v233_v9, 0.0  ;;  %v1104_v2 = vld [vmem:[%s1502_s0 + $0x78] sm:$0xff]  }
  0x13   :  { %v298_v19 = vmax.f32 %v234_v10, 0.0  ;;  %v837_v20 = vunpack.c.h.bf16 %v1097_v0  ;;  %v958_v21 = vpack.c.bf16 %v295_v12, %v294_v8  ;;  %v299_v22 = vmax.f32 %v235_v14, 0.0  ;;  %v1105_v12 = vld [vmem:[%s1502_s0 + $0x80] sm:$0xff]  }
  0x14   :  { %v165_v23 = vmul.f32 %v836_v15, %v1178_v1  ;;  %v840_v24 = vunpack.c.l.bf16 %v1098_v11  ;;  %1124 = vst [vmem:[%s1505_s3 + $0x20] sm:$0xff] %v953_v17   ;;  %v963_v26 = vpack.c.bf16 %v297_v18, %v296_v13  ;;  %v841_v28 = vunpack.c.h.bf16 %v1098_v11 }
  0x15   :  { %v166_v27 = vmul.f32 %v837_v20, %v1178_v1  ;;  %v844_v29 = vunpack.c.l.bf16 %v1099_v16  ;;  %1125 = vst [vmem:[%s1505_s3 + $0x28] sm:$0xff] %v958_v21   ;;  %v968_v30 = vpack.c.bf16 %v299_v22, %v298_v19  ;;  %v845_v33 = vunpack.c.h.bf16 %v1099_v16 }
  0x16   :  { %v236_v31 = vadd.f32 %v1192_v7, %v165_v23  ;;  %v167_v32 = vmul.f32 %v840_v24, %v1178_v1  ;;  %1126 = vst [vmem:[%s1505_s3 + $0x30] sm:$0xff] %v963_v26   ;;  %v168_v35 = vmul.f32 %v841_v28, %v1178_v1  ;;  %v848_v37 = vunpack.c.l.bf16 %v1100_v25 }
  0x17   :  { %v237_v34 = vadd.f32 %v1192_v7, %v166_v27  ;;  %v169_v36 = vmul.f32 %v844_v29, %v1178_v1  ;;  %1127 = vst [vmem:[%s1505_s3 + $0x38] sm:$0xff] %v968_v30   ;;  %v170_v41 = vmul.f32 %v845_v33, %v1178_v1  ;;  %v849_v42 = vunpack.c.h.bf16 %v1100_v25  ;;  %v1106_v29 = vld [vmem:[%s1502_s0 + $0x88] sm:$0xff]  }
  0x18   :  { %v300_v39 = vmax.f32 %v236_v31, 0.0  ;;  %v238_v40 = vadd.f32 %v1192_v7, %v167_v32  ;;  %v239_v44 = vadd.f32 %v1192_v7, %v168_v35  ;;  %v171_v46 = vmul.f32 %v848_v37, %v1178_v1 }
  0x19   :  { %v301_v43 = vmax.f32 %v237_v34, 0.0  ;;  %v240_v45 = vadd.f32 %v1192_v7, %v169_v36  ;;  %v241_v48 = vadd.f32 %v1192_v7, %v170_v41  ;;  %v172_v49 = vmul.f32 %v849_v42, %v1178_v1  ;;  %v1107_v34 = vld [vmem:[%s1502_s0 + $0x90] sm:$0xff]  }
  0x1a   :  { %v302_v47 = vmax.f32 %v238_v40, 0.0  ;;  %v852_v50 = vunpack.c.l.bf16 %v1101_v38  ;;  %v303_v53 = vmax.f32 %v239_v44, 0.0  ;;  %v242_v55 = vadd.f32 %v1192_v7, %v171_v46 }
  0x1b   :  { %v973_v52 = vpack.c.bf16 %v301_v43, %v300_v39  ;;  %v304_v54 = vmax.f32 %v240_v45, 0.0  ;;  %v305_v56 = vmax.f32 %v241_v48, 0.0  ;;  %v243_v57 = vadd.f32 %v1192_v7, %v172_v49  ;;  %v1108_v43 = vld [vmem:[%s1502_s0 + $0x98] sm:$0xff]  }
  0x1c   :  { %v853_v58 = vunpack.c.h.bf16 %v1101_v38  ;;  %v173_v59 = vmul.f32 %v852_v50, %v1178_v1  ;;  %v978_v61 = vpack.c.bf16 %v303_v53, %v302_v47  ;;  %v306_v62 = vmax.f32 %v242_v55, 0.0 }
  0x1d   :  { %1128 = vst [vmem:[%s1505_s3 + $0x40] sm:$0xff] %v973_v52   ;;  %v856_v63 = vunpack.c.l.bf16 %v1102_v51  ;;  %v857_v0 = vunpack.c.h.bf16 %v1102_v51  ;;  %v983_v3 = vpack.c.bf16 %v305_v56, %v304_v54  ;;  %v307_v4 = vmax.f32 %v243_v57, 0.0  ;;  %v1109_v56 = vld [vmem:[%s1502_s0 + $0xa0] sm:$0xff]  }
  0x1e   :  { %v174_v5 = vmul.f32 %v853_v58, %v1178_v1  ;;  %v244_v6 = vadd.f32 %v1192_v7, %v173_v59  ;;  %1129 = vst [vmem:[%s1505_s3 + $0x48] sm:$0xff] %v978_v61   ;;  %v860_v10 = vunpack.c.l.bf16 %v1103_v60  ;;  %v861_v11 = vunpack.c.h.bf16 %v1103_v60 }
  0x1f   :  { %v175_v8 = vmul.f32 %v856_v63, %v1178_v1  ;;  %v176_v9 = vmul.f32 %v857_v0, %v1178_v1  ;;  %1130 = vst [vmem:[%s1505_s3 + $0x50] sm:$0xff] %v983_v3   ;;  %v988_v13 = vpack.c.bf16 %v307_v4, %v306_v62  ;;  %v864_v16 = vunpack.c.l.bf16 %v1104_v2 }
  0x20   :  { %v245_v14 = vadd.f32 %v1192_v7, %v174_v5  ;;  %v308_v15 = vmax.f32 %v244_v6, 0.0  ;;  %v177_v19 = vmul.f32 %v860_v10, %v1178_v1  ;;  %v178_v20 = vmul.f32 %v861_v11, %v1178_v1 }
  0x21   :  { %v246_v17 = vadd.f32 %v1192_v7, %v175_v8  ;;  %v247_v18 = vadd.f32 %v1192_v7, %v176_v9  ;;  %1131 = vst [vmem:[%s1505_s3 + $0x58] sm:$0xff] %v988_v13   ;;  %v865_v22 = vunpack.c.h.bf16 %v1104_v2  ;;  %v179_v23 = vmul.f32 %v864_v16, %v1178_v1  ;;  %v1110_v2 = vld [vmem:[%s1502_s0 + $0xa8] sm:$0xff]   ;;  %v1111_v16 = vld [vmem:[%s1502_s0 + $0xb0] sm:$0xff]  }
  0x22   :  { %v309_v21 = vmax.f32 %v245_v14, 0.0  ;;  %v868_v24 = vunpack.c.l.bf16 %v1105_v12  ;;  %v248_v27 = vadd.f32 %v1192_v7, %v177_v19  ;;  %v249_v28 = vadd.f32 %v1192_v7, %v178_v20 }
  0x23   :  { %v310_v25 = vmax.f32 %v246_v17, 0.0  ;;  %v311_v26 = vmax.f32 %v247_v18, 0.0  ;;  %v180_v31 = vmul.f32 %v865_v22, %v1178_v1  ;;  %v250_v32 = vadd.f32 %v1192_v7, %v179_v23 }
  0x24   :  { %v993_v30 = vpack.c.bf16 %v309_v21, %v308_v15  ;;  %v869_v33 = vunpack.c.h.bf16 %v1105_v12  ;;  %v312_v36 = vmax.f32 %v248_v27, 0.0  ;;  %v313_v37 = vmax.f32 %v249_v28, 0.0  ;;  %v1112_v21 = vld [vmem:[%s1502_s0 + $0xb8] sm:$0xff]  }
  0x25   :  { %v998_v35 = vpack.c.bf16 %v311_v26, %v310_v25  ;;  %v181_v38 = vmul.f32 %v868_v24, %v1178_v1  ;;  %v251_v39 = vadd.f32 %v1192_v7, %v180_v31  ;;  %v314_v40 = vmax.f32 %v250_v32, 0.0 }
  0x26   :  { %1132 = vst [vmem:[%s1505_s3 + $0x60] sm:$0xff] %v993_v30   ;;  %v182_v41 = vmul.f32 %v869_v33, %v1178_v1  ;;  %v872_v42 = vunpack.c.l.bf16 %v1106_v29  ;;  %v1003_v44 = vpack.c.bf16 %v313_v37, %v312_v36  ;;  %v873_v46 = vunpack.c.h.bf16 %v1106_v29 }
  0x27   :  { %1133 = vst [vmem:[%s1505_s3 + $0x68] sm:$0xff] %v998_v35   ;;  %v252_v45 = vadd.f32 %v1192_v7, %v181_v38  ;;  %v876_v47 = vunpack.c.l.bf16 %v1107_v34  ;;  %v315_v48 = vmax.f32 %v251_v39, 0.0  ;;  %v877_v51 = vunpack.c.h.bf16 %v1107_v34  ;;  %v1113_v34 = vld [vmem:[%s1502_s0 + $0xc0] sm:$0xff]  }
  0x28   :  { %v253_v49 = vadd.f32 %v1192_v7, %v182_v41  ;;  %v183_v50 = vmul.f32 %v872_v42, %v1178_v1  ;;  %1134 = vst [vmem:[%s1505_s3 + $0x70] sm:$0xff] %v1003_v44   ;;  %v184_v53 = vmul.f32 %v873_v46, %v1178_v1  ;;  %v880_v55 = vunpack.c.l.bf16 %v1108_v43 }
  0x29   :  { %v316_v52 = vmax.f32 %v252_v45, 0.0  ;;  %v185_v54 = vmul.f32 %v876_v47, %v1178_v1  ;;  %v1008_v57 = vpack.c.bf16 %v315_v48, %v314_v40  ;;  %v186_v60 = vmul.f32 %v877_v51, %v1178_v1  ;;  %v1114_v47 = vld [vmem:[%s1502_s0 + $0xc8] sm:$0xff]  }
  0x2a   :  { %v317_v58 = vmax.f32 %v253_v49, 0.0  ;;  %v254_v59 = vadd.f32 %v1192_v7, %v183_v50  ;;  %v255_v61 = vadd.f32 %v1192_v7, %v184_v53  ;;  %v881_v63 = vunpack.c.h.bf16 %v1108_v43 }
  0x2b   :  { %v256_v62 = vadd.f32 %v1192_v7, %v185_v54  ;;  %v187_v0 = vmul.f32 %v880_v55, %v1178_v1  ;;  %1135 = vst [vmem:[%s1505_s3 + $0x78] sm:$0xff] %v1008_v57   ;;  %v257_v5 = vadd.f32 %v1192_v7, %v186_v60  ;;  %v884_v6 = vunpack.c.l.bf16 %v1109_v56 }
  0x2c   :  { %v1013_v3 = vpack.c.bf16 %v317_v58, %v316_v52  ;;  %v318_v4 = vmax.f32 %v254_v59, 0.0  ;;  %v319_v8 = vmax.f32 %v255_v61, 0.0  ;;  %v188_v10 = vmul.f32 %v881_v63, %v1178_v1  ;;  %v1115_v52 = vld [vmem:[%s1502_s0 + $0xd0] sm:$0xff]   ;;  %v1116_v61 = vld [vmem:[%s1502_s0 + $0xd8] sm:$0xff]  }
  0x2d   :  { %v320_v9 = vmax.f32 %v256_v62, 0.0  ;;  %v258_v11 = vadd.f32 %v1192_v7, %v187_v0  ;;  %v321_v12 = vmax.f32 %v257_v5, 0.0  ;;  %v885_v13 = vunpack.c.h.bf16 %v1109_v56 }
  0x2e   :  { %1136 = vst [vmem:[%s1505_s3 + $0x80] sm:$0xff] %v1013_v3   ;;  %v189_v14 = vmul.f32 %v884_v6, %v1178_v1  ;;  %v888_v15 = vunpack.c.l.bf16 %v1110_v2  ;;  %v1018_v17 = vpack.c.bf16 %v319_v8, %v318_v4  ;;  %v259_v18 = vadd.f32 %v1192_v7, %v188_v10 }
  0x2f   :  { %v322_v19 = vmax.f32 %v258_v11, 0.0  ;;  %v889_v20 = vunpack.c.h.bf16 %v1110_v2  ;;  %v1023_v22 = vpack.c.bf16 %v321_v12, %v320_v9  ;;  %v190_v23 = vmul.f32 %v885_v13, %v1178_v1  ;;  %v1117_v12 = vld [vmem:[%s1502_s0 + $0xe0] sm:$0xff]  }
  0x30   :  { %v260_v24 = vadd.f32 %v1192_v7, %v189_v14  ;;  %v191_v25 = vmul.f32 %v888_v15, %v1178_v1  ;;  %1137 = vst [vmem:[%s1505_s3 + $0x88] sm:$0xff] %v1018_v17   ;;  %v323_v26 = vmax.f32 %v259_v18, 0.0  ;;  %v892_v28 = vunpack.c.l.bf16 %v1111_v16 }
  0x31   :  { %v192_v27 = vmul.f32 %v889_v20, %v1178_v1  ;;  %v893_v29 = vunpack.c.h.bf16 %v1111_v16  ;;  %1138 = vst [vmem:[%s1505_s3 + $0x90] sm:$0xff] %v1023_v22   ;;  %v261_v30 = vadd.f32 %v1192_v7, %v190_v23  ;;  %v896_v33 = vunpack.c.l.bf16 %v1112_v21 }
  0x32   :  { %v324_v31 = vmax.f32 %v260_v24, 0.0  ;;  %v262_v32 = vadd.f32 %v1192_v7, %v191_v25  ;;  %v1028_v35 = vpack.c.bf16 %v323_v26, %v322_v19  ;;  %v193_v37 = vmul.f32 %v892_v28, %v1178_v1 }
  0x33   :  { %v263_v36 = vadd.f32 %v1192_v7, %v192_v27  ;;  %v194_v38 = vmul.f32 %v893_v29, %v1178_v1  ;;  %v325_v39 = vmax.f32 %v261_v30, 0.0  ;;  %v897_v41 = vunpack.c.h.bf16 %v1112_v21  ;;  %v1118_v21 = vld [vmem:[%s1502_s0 + $0xe8] sm:$0xff]  }
  0x34   :  { %v326_v40 = vmax.f32 %v262_v32, 0.0  ;;  %v195_v42 = vmul.f32 %v896_v33, %v1178_v1  ;;  %1139 = vst [vmem:[%s1505_s3 + $0x98] sm:$0xff] %v1028_v35   ;;  %v264_v44 = vadd.f32 %v1192_v7, %v193_v37  ;;  %v900_v46 = vunpack.c.l.bf16 %v1113_v34 }
  0x35   :  { %v327_v43 = vmax.f32 %v263_v36, 0.0  ;;  %v265_v45 = vadd.f32 %v1192_v7, %v194_v38  ;;  %v1033_v48 = vpack.c.bf16 %v325_v39, %v324_v31  ;;  %v196_v49 = vmul.f32 %v897_v41, %v1178_v1  ;;  %v1120_v39 = vld [vmem:[%s1502_s0 + $0xf8] sm:$0xff]  }
  0x36   :  { %v266_v50 = vadd.f32 %v1192_v7, %v195_v42  ;;  %v901_v51 = vunpack.c.h.bf16 %v1113_v34  ;;  %v328_v54 = vmax.f32 %v264_v44, 0.0  ;;  %v197_v56 = vmul.f32 %v900_v46, %v1178_v1  ;;  %v1119_v34 = vld [vmem:[%s1502_s0 + $0xf0] sm:$0xff]  }
  0x37   :  { %v1038_v53 = vpack.c.bf16 %v327_v43, %v326_v40  ;;  %v329_v55 = vmax.f32 %v265_v45, 0.0  ;;  %1140 = vst [vmem:[%s1505_s3 + $0xa0] sm:$0xff] %v1033_v48   ;;  %v267_v57 = vadd.f32 %v1192_v7, %v196_v49  ;;  %v904_v60 = vunpack.c.l.bf16 %v1114_v47 }
  0x38   :  { %v330_v58 = vmax.f32 %v266_v50, 0.0  ;;  %v198_v59 = vmul.f32 %v901_v51, %v1178_v1  ;;  %v268_v63 = vadd.f32 %v1192_v7, %v197_v56  ;;  %v905_v0 = vunpack.c.h.bf16 %v1114_v47 }
  0x39   :  { %1141 = vst [vmem:[%s1505_s3 + $0xa8] sm:$0xff] %v1038_v53   ;;  %v1043_v62 = vpack.c.bf16 %v329_v55, %v328_v54  ;;  %v908_v2 = vunpack.c.l.bf16 %v1115_v52  ;;  %v331_v3 = vmax.f32 %v267_v57, 0.0  ;;  %v199_v5 = vmul.f32 %v904_v60, %v1178_v1 }
  0x3a   :  { %v269_v4 = vadd.f32 %v1192_v7, %v198_v59  ;;  %v909_v6 = vunpack.c.h.bf16 %v1115_v52  ;;  %v332_v8 = vmax.f32 %v268_v63, 0.0  ;;  %v200_v9 = vmul.f32 %v905_v0, %v1178_v1 }
  0x3b   :  { %1142 = vst [vmem:[%s1505_s3 + $0xb0] sm:$0xff] %v1043_v62   ;;  %v201_v10 = vmul.f32 %v908_v2, %v1178_v1  ;;  %v912_v11 = vunpack.c.l.bf16 %v1116_v61  ;;  %v1048_v13 = vpack.c.bf16 %v331_v3, %v330_v58  ;;  %v270_v15 = vadd.f32 %v1192_v7, %v199_v5 }
  0x3c   :  { %v333_v14 = vmax.f32 %v269_v4, 0.0  ;;  %v202_v16 = vmul.f32 %v909_v6, %v1178_v1  ;;  %v271_v17 = vadd.f32 %v1192_v7, %v200_v9  ;;  %v913_v19 = vunpack.c.h.bf16 %v1116_v61 }
  0x3d   :  { %v272_v18 = vadd.f32 %v1192_v7, %v201_v10  ;;  %v203_v20 = vmul.f32 %v912_v11, %v1178_v1  ;;  %1143 = vst [vmem:[%s1505_s3 + $0xb8] sm:$0xff] %v1048_v13   ;;  %v334_v23 = vmax.f32 %v270_v15, 0.0  ;;  %v916_v25 = vunpack.c.l.bf16 %v1117_v12 }
  0x3e   :  { %v1053_v22 = vpack.c.bf16 %v333_v14, %v332_v8  ;;  %v273_v24 = vadd.f32 %v1192_v7, %v202_v16  ;;  %v335_v26 = vmax.f32 %v271_v17, 0.0  ;;  %v204_v28 = vmul.f32 %v913_v19, %v1178_v1 }
  0x3f   :  { %v336_v27 = vmax.f32 %v272_v18, 0.0  ;;  %v274_v29 = vadd.f32 %v1192_v7, %v203_v20  ;;  %v917_v31 = vunpack.c.h.bf16 %v1117_v12  ;;  %v205_v32 = vmul.f32 %v916_v25, %v1178_v1 }
  0x40   :  { %1144 = vst [vmem:[%s1505_s3 + $0xc0] sm:$0xff] %v1053_v22   ;;  %v337_v30 = vmax.f32 %v273_v24, 0.0  ;;  %v920_v33 = vunpack.c.l.bf16 %v1118_v21  ;;  %v1058_v35 = vpack.c.bf16 %v335_v26, %v334_v23  ;;  %v275_v36 = vadd.f32 %v1192_v7, %v204_v28 }
  0x41   :  { %v338_v37 = vmax.f32 %v274_v29, 0.0  ;;  %v921_v38 = vunpack.c.h.bf16 %v1118_v21  ;;  %v206_v41 = vmul.f32 %v917_v31, %v1178_v1  ;;  %v276_v42 = vadd.f32 %v1192_v7, %v205_v32 }
  0x42   :  { %v1063_v40 = vpack.c.bf16 %v337_v30, %v336_v27  ;;  %v207_v43 = vmul.f32 %v920_v33, %v1178_v1  ;;  %1145 = vst [vmem:[%s1505_s3 + $0xc8] sm:$0xff] %v1058_v35   ;;  %v339_v44 = vmax.f32 %v275_v36, 0.0  ;;  %v924_v46 = vunpack.c.l.bf16 %v1119_v34 }
  0x43   :  { %v208_v45 = vmul.f32 %v921_v38, %v1178_v1  ;;  %v925_v47 = vunpack.c.h.bf16 %v1119_v34  ;;  %v277_v48 = vadd.f32 %v1192_v7, %v206_v41  ;;  %v340_v49 = vmax.f32 %v276_v42, 0.0 }
  0x44   :  { %1146 = vst [vmem:[%s1505_s3 + $0xd0] sm:$0xff] %v1063_v40   ;;  %v278_v50 = vadd.f32 %v1192_v7, %v207_v43  ;;  %v928_v51 = vunpack.c.l.bf16 %v1120_v39  ;;  %v1068_v52 = vpack.c.bf16 %v339_v44, %v338_v37  ;;  %v209_v54 = vmul.f32 %v924_v46, %v1178_v1 }
  0x45   :  { %v279_v53 = vadd.f32 %v1192_v7, %v208_v45  ;;  %v210_v55 = vmul.f32 %v925_v47, %v1178_v1  ;;  %v341_v56 = vmax.f32 %v277_v48, 0.0  ;;  %v929_v58 = vunpack.c.h.bf16 %v1120_v39 }
  0x46   :  { %v342_v57 = vmax.f32 %v278_v50, 0.0  ;;  %v211_v59 = vmul.f32 %v928_v51, %v1178_v1  ;;  %1147 = vst [vmem:[%s1505_s3 + $0xd8] sm:$0xff] %v1068_v52   ;;  %v280_v61 = vadd.f32 %v1192_v7, %v209_v54 }
  0x47   :  { %v343_v60 = vmax.f32 %v279_v53, 0.0  ;;  %v281_v62 = vadd.f32 %v1192_v7, %v210_v55  ;;  %v1073_v63 = vpack.c.bf16 %v341_v56, %v340_v49  ;;  %v212_v0 = vmul.f32 %v929_v58, %v1178_v1 }
  0x48   :  { %v282_v2 = vadd.f32 %v1192_v7, %v211_v59  ;;  %v344_v4 = vmax.f32 %v280_v61, 0.0 }
  0x49   :  { %v1078_v3 = vpack.c.bf16 %v343_v60, %v342_v57  ;;  %v345_v5 = vmax.f32 %v281_v62, 0.0  ;;  %1148 = vst [vmem:[%s1505_s3 + $0xe0] sm:$0xff] %v1073_v63   ;;  %v283_v6 = vadd.f32 %v1192_v7, %v212_v0 }
  0x4a   :  { %v346_v8 = vmax.f32 %v282_v2, 0.0 }
  0x4b   :  { %1149 = vst [vmem:[%s1505_s3 + $0xe8] sm:$0xff] %v1078_v3   ;;  %v1083_v9 = vpack.c.bf16 %v345_v5, %v344_v4  ;;  %v347_v10 = vmax.f32 %v283_v6, 0.0 }
  0x4d   :  { %1150 = vst [vmem:[%s1505_s3 + $0xf0] sm:$0xff] %v1083_v9   ;;  %v1088_v1 = vpack.c.bf16 %v347_v10, %v346_v8 }
  0x4f   :  { %1151 = vst [vmem:[%s1505_s3 + $0xf8] sm:$0xff] %v1088_v1  }

// kernel: up_forward.6
= control target key start
LH: loop header
LB: loop body
LE: loop exit
PB: predicated region body
PF: predicated region fallthrough
CT: control target
= control target key end

     0   :  { %s2461_s1 = inlined_call_operand.vmem [shape: bf16[128,128], index: 1, kind: input, shape index: {}]   ;;  %s2462_s0 = inlined_call_operand.vmem [shape: bf16[512,128], index: 0, kind: input, shape index: {}]   ;;  %s2463_s2 = inlined_call_operand.vmem [shape: bf16[512,128], index: 2, kind: output, shape index: {0}]   ;;  %s2464_s3 = inlined_call_operand.vmem [shape: f32[1,1,128], index: 3, kind: output, shape index: {1}]   ;;  %s2465_s4 = inlined_call_operand.vmem [shape: f32[1,1,128], index: 4, kind: output, shape index: {2}]  }
   0x1   :  { %v1982_v0 = vld [vmem:[%s2461_s1] sm:$0xff]   ;;  %v1983_v1 = vld [vmem:[%s2461_s1 + $0x8] sm:$0xff]   ;;  %v1984_v2 = vld [vmem:[%s2461_s1 + $0x10] sm:$0xff]  }
   0x2   :  { %1886 = vmatprep.subr.bf16.mxu0 %v1982_v0  ;;  %1966 = vmatprep.subr.bf16.mxu1 %v1982_v0  ;;  %v1985_v3 = vld [vmem:[%s2461_s1 + $0x18] sm:$0xff]   ;;  %v1990_v4 = vld [vmem:[%s2462_s0] sm:$0xff]   ;;  %v1987_v6 = vld [vmem:[%s2461_s1 + $0x28] sm:$0xff]  }
   0x3   :  { %1887 = vmatpush3.bf16.msra.mxu0 %v1982_v0  ;;  %1974 = vmatpush3.bf16.msra.mxu1 %v1982_v0  ;;  %v1986_v5 = vld [vmem:[%s2461_s1 + $0x20] sm:$0xff]   ;;  %v1988_v7 = vld [vmem:[%s2461_s1 + $0x30] sm:$0xff]   ;;  %v1989_v8 = vld [vmem:[%s2461_s1 + $0x38] sm:$0xff]  }
   0x4   :  { %1888 = vmatprep.subr.bf16.mxu0 %v1983_v1  ;;  %1967 = vmatprep.subr.bf16.mxu1 %v1983_v1  ;;  %v2006_v9 = vld [vmem:[%s2462_s0 + $0x80] sm:$0xff]   ;;  %v1991_v10 = vld [vmem:[%s2462_s0 + $0x8] sm:$0xff]   ;;  %v1992_v11 = vld [vmem:[%s2462_s0 + $0x10] sm:$0xff]  }
   0x5   :  { %1902 = vmatprep.mubr.bf16.mxu0 %v1990_v4  ;;  %1934 = vmatprep.mubr.bf16.mxu1 %v2006_v9  ;;  %v2007_v12 = vld [vmem:[%s2462_s0 + $0x88] sm:$0xff]   ;;  %v2008_v13 = vld [vmem:[%s2462_s0 + $0x90] sm:$0xff]   ;;  %v1993_v14 = vld [vmem:[%s2462_s0 + $0x18] sm:$0xff]  }
   0x6   :  { %v1994_v15 = vld [vmem:[%s2462_s0 + $0x20] sm:$0xff]   ;;  %v2009_v16 = vld [vmem:[%s2462_s0 + $0x98] sm:$0xff]   ;;  %v1995_v18 = vld [vmem:[%s2462_s0 + $0x28] sm:$0xff]  }
   0x7   :  { %1889 = vmatpush3.bf16.msra.mxu0 %v1983_v1  ;;  %1975 = vmatpush3.bf16.msra.mxu1 %v1983_v1  ;;  %v2010_v17 = vld [vmem:[%s2462_s0 + $0xa0] sm:$0xff]   ;;  %v2011_v19 = vld [vmem:[%s2462_s0 + $0xa8] sm:$0xff]   ;;  %v1996_v20 = vld [vmem:[%s2462_s0 + $0x30] sm:$0xff]  }
   0x8   :  { %1890 = vmatprep.subr.bf16.mxu0 %v1984_v2  ;;  %1968 = vmatprep.subr.bf16.mxu1 %v1984_v2  ;;  %v2012_v21 = vld [vmem:[%s2462_s0 + $0xb0] sm:$0xff]   ;;  %v1997_v22 = vld [vmem:[%s2462_s0 + $0x38] sm:$0xff]   ;;  %v1998_v24 = vld [vmem:[%s2462_s0 + $0x40] sm:$0xff]  }
   0x9   :  { %v2013_v23 = vld [vmem:[%s2462_s0 + $0xb8] sm:$0xff]   ;;  %v2014_v25 = vld [vmem:[%s2462_s0 + $0xc0] sm:$0xff]   ;;  %v1999_v26 = vld [vmem:[%s2462_s0 + $0x48] sm:$0xff]  }
   0xa   :  { %v2015_v27 = vld [vmem:[%s2462_s0 + $0xc8] sm:$0xff]   ;;  %v2000_v28 = vld [vmem:[%s2462_s0 + $0x50] sm:$0xff]   ;;  %v2001_v30 = vld [vmem:[%s2462_s0 + $0x58] sm:$0xff]  }
   0xb   :  { %1891 = vmatpush3.bf16.msra.mxu0 %v1984_v2  ;;  %1976 = vmatpush3.bf16.msra.mxu1 %v1984_v2  ;;  %v2016_v29 = vld [vmem:[%s2462_s0 + $0xd0] sm:$0xff]   ;;  %v2017_v31 = vld [vmem:[%s2462_s0 + $0xd8] sm:$0xff]   ;;  %v2002_v32 = vld [vmem:[%s2462_s0 + $0x60] sm:$0xff]  }
   0xc   :  { %1892 = vmatprep.subr.bf16.mxu0 %v1985_v3  ;;  %1969 = vmatprep.subr.bf16.mxu1 %v1985_v3  ;;  %v2018_v33 = vld [vmem:[%s2462_s0 + $0xe0] sm:$0xff]   ;;  %v2003_v34 = vld [vmem:[%s2462_s0 + $0x68] sm:$0xff]   ;;  %v2004_v36 = vld [vmem:[%s2462_s0 + $0x70] sm:$0xff]  }
   0xd   :  { %v2019_v35 = vld [vmem:[%s2462_s0 + $0xe8] sm:$0xff]   ;;  %v2020_v37 = vld [vmem:[%s2462_s0 + $0xf0] sm:$0xff]   ;;  %v2005_v38 = vld [vmem:[%s2462_s0 + $0x78] sm:$0xff]  }
   0xe   :  { %v2021_v39 = vld [vmem:[%s2462_s0 + $0xf8] sm:$0xff]  }
   0xf   :  { %1893 = vmatpush3.bf16.msra.mxu0 %v1985_v3  ;;  %1977 = vmatpush3.bf16.msra.mxu1 %v1985_v3 }
  0x10   :  { %1894 = vmatprep.subr.bf16.mxu0 %v1986_v5  ;;  %1970 = vmatprep.subr.bf16.mxu1 %v1986_v5 }
  0x13   :  { %1895 = vmatpush3.bf16.msra.mxu0 %v1986_v5  ;;  %1978 = vmatpush3.bf16.msra.mxu1 %v1986_v5 }
  0x14   :  { %1896 = vmatprep.subr.bf16.mxu0 %v1987_v6  ;;  %1971 = vmatprep.subr.bf16.mxu1 %v1987_v6 }
  0x17   :  { %1897 = vmatpush3.bf16.msra.mxu0 %v1987_v6  ;;  %1979 = vmatpush3.bf16.msra.mxu1 %v1987_v6 }
  0x18   :  { %1898 = vmatprep.subr.bf16.mxu0 %v1988_v7  ;;  %1972 = vmatprep.subr.bf16.mxu1 %v1988_v7 }
  0x1b   :  { %1899 = vmatpush3.bf16.msra.mxu0 %v1988_v7  ;;  %1980 = vmatpush3.bf16.msra.mxu1 %v1988_v7 }
  0x1c   :  { %1900 = vmatprep.subr.bf16.mxu0 %v1989_v8  ;;  %1973 = vmatprep.subr.bf16.mxu1 %v1989_v8 }
  0x1f   :  { %1901 = vmatpush3.bf16.msra.mxu0 %v1989_v8  ;;  %1981 = vmatpush3.bf16.msra.mxu1 %v1989_v8 }
  0x22   :  { %1903 = vmatmul.mubr.bf16.vlgmr.msra.gmra.mrb[0].mxu0 %v1991_v10  ;;  %1935 = vmatmul.mubr.bf16.vlgmr.msra.gmra.mrb[0].mxu1 %v2007_v12 }
  0x23   :  { %1906 = vmatprep.mubr.bf16.mxu0 %v1992_v11  ;;  %1938 = vmatprep.mubr.bf16.mxu1 %v2008_v13 }
  0x2a   :  { %1907 = vmatmul.mubr.bf16.gmra.mrb[4].mxu0 %v1993_v14  ;;  %1939 = vmatmul.mubr.bf16.gmra.mrb[4].mxu1 %v2009_v16 }
  0x2b   :  { %1910 = vmatprep.mubr.bf16.mxu0 %v1994_v15  ;;  %1942 = vmatprep.mubr.bf16.mxu1 %v2010_v17 }
  0x32   :  { %1911 = vmatmul.mubr.bf16.gmra.mrb[8].mxu0 %v1995_v18  ;;  %1943 = vmatmul.mubr.bf16.gmra.mrb[8].mxu1 %v2011_v19 }
  0x33   :  { %1914 = vmatprep.mubr.bf16.mxu0 %v1996_v20  ;;  %1946 = vmatprep.mubr.bf16.mxu1 %v2012_v21 }
  0x3a   :  { %1915 = vmatmul.mubr.bf16.gmra.mrb[12].mxu0 %v1997_v22  ;;  %1947 = vmatmul.mubr.bf16.gmra.mrb[12].mxu1 %v2013_v23 }
  0x3b   :  { %1918 = vmatprep.mubr.bf16.mxu0 %v1998_v24  ;;  %1950 = vmatprep.mubr.bf16.mxu1 %v2014_v25 }
  0x42   :  { %1919 = vmatmul.mubr.bf16.gmra.mrb[16].mxu0 %v1999_v26  ;;  %1951 = vmatmul.mubr.bf16.gmra.mrb[16].mxu1 %v2015_v27 }
  0x43   :  { %1922 = vmatprep.mubr.bf16.mxu0 %v2000_v28  ;;  %1954 = vmatprep.mubr.bf16.mxu1 %v2016_v29 }
  0x4a   :  { %1923 = vmatmul.mubr.bf16.gmra.mrb[20].mxu0 %v2001_v30  ;;  %1955 = vmatmul.mubr.bf16.gmra.mrb[20].mxu1 %v2017_v31 }
  0x4b   :  { %1926 = vmatprep.mubr.bf16.mxu0 %v2002_v32  ;;  %1958 = vmatprep.mubr.bf16.mxu1 %v2018_v33 }
  0x52   :  { %1927 = vmatmul.mubr.bf16.gmra.mrb[24].mxu0 %v2003_v34  ;;  %1959 = vmatmul.mubr.bf16.gmra.mrb[24].mxu1 %v2019_v35 }
  0x53   :  { %1930 = vmatprep.mubr.bf16.mxu0 %v2004_v36  ;;  %1962 = vmatprep.mubr.bf16.mxu1 %v2020_v37 }
  0x5a   :  { %1931 = vmatmul.mubr.bf16.gmra.mrb[28].mxu0 %v2005_v38  ;;  %1963 = vmatmul.mubr.bf16.gmra.mrb[28].mxu1 %v2021_v39 }
  0xf5   :  { %v1904_v40 = vpop.f32.mrb[0].mxu0  ;;  %v2167_v41 = vpop.f32.mrb[0].mxu1 }
  0xf6   :  { %v501_v42 = vpop.f32.mrb[1].mxu0  ;;  %v2169_v43 = vpop.f32.mrb[1].mxu1  ;;  %v1343_v55 = vmul.f32 %v1904_v40, %v1904_v40 }
  0xf7   :  { %v1905_v44 = vpop.f32.mrb[2].mxu0  ;;  %v2171_v45 = vpop.f32.mrb[2].mxu1  ;;  %v1341_v46 = vmul.f32 %v501_v42, %v501_v42 }
  0xf8   :  { %v1663_v47 = vpack.c.bf16 %v1905_v44, %v1904_v40  ;;  %v504_v48 = vpop.f32.mrb[3].mxu0  ;;  %v1743_v49 = vpack.c.bf16 %v2171_v45, %v2167_v41  ;;  %v2175_v50 = vpop.f32.mrb[3].mxu1  ;;  %v1344_v58 = vmul.f32 %v1905_v44, %v1905_v44 }
  0xf9   :  { %v1658_v51 = vpack.c.bf16 %v504_v48, %v501_v42  ;;  %v1271_v52 = vadd.f32 %v504_v48, %v501_v42  ;;  %v1342_v53 = vmul.f32 %v504_v48, %v504_v48  ;;  %v1738_v54 = vpack.c.bf16 %v2175_v50, %v2169_v43 }
  0xfa   :  { %1815 = vst [vmem:[%s2463_s2 + $0x8] sm:$0xff] %v1663_v47   ;;  %1831 = vst [vmem:[%s2463_s2 + $0x88] sm:$0xff] %v1743_v49  }
  0xfb   :  { %1659 = vst [vmem:[%s2463_s2] sm:$0xff] %v1658_v51   ;;  %v1272_v56 = vadd.f32 %v1904_v40, %v1271_v52  ;;  %v1405_v57 = vadd.f32 %v1342_v53, %v1341_v46  ;;  %1830 = vst [vmem:[%s2463_s2 + $0x80] sm:$0xff] %v1738_v54  }
  0xfd   :  { %v1406_v59 = vadd.f32 %v1405_v57, %v1343_v55  ;;  %v1908_v60 = vpop.f32.mrb[4].mxu0  ;;  %v1273_v61 = vadd.f32 %v1905_v44, %v1272_v56  ;;  %v2191_v62 = vpop.f32.mrb[4].mxu1 }
  0xfe   :  { %v517_v63 = vpop.f32.mrb[5].mxu0  ;;  %v2193_v0 = vpop.f32.mrb[5].mxu1  ;;  %v1347_v15 = vmul.f32 %v1908_v60, %v1908_v60 }
  0xff   :  { %v1274_v1 = vadd.f32 %v1273_v61, %v517_v63  ;;  %v1345_v2 = vmul.f32 %v517_v63, %v517_v63  ;;  %v1407_v3 = vadd.f32 %v1406_v59, %v1344_v58  ;;  %v1909_v4 = vpop.f32.mrb[6].mxu0  ;;  %v2195_v5 = vpop.f32.mrb[6].mxu1 }
 0x100   :  { %v1673_v6 = vpack.c.bf16 %v1909_v4, %v1908_v60  ;;  %v520_v7 = vpop.f32.mrb[7].mxu0  ;;  %v1753_v8 = vpack.c.bf16 %v2195_v5, %v2191_v62  ;;  %v2199_v9 = vpop.f32.mrb[7].mxu1  ;;  %v1348_v18 = vmul.f32 %v1909_v4, %v1909_v4 }
 0x101   :  { %v1408_v10 = vadd.f32 %v1407_v3, %v1345_v2  ;;  %v1668_v11 = vpack.c.bf16 %v520_v7, %v517_v63  ;;  %v1275_v12 = vadd.f32 %v1274_v1, %v520_v7  ;;  %v1346_v13 = vmul.f32 %v520_v7, %v520_v7 }
 0x102   :  { %1817 = vst [vmem:[%s2463_s2 + $0x18] sm:$0xff] %v1673_v6   ;;  %1833 = vst [vmem:[%s2463_s2 + $0x98] sm:$0xff] %v1753_v8   ;;  %v1748_v14 = vpack.c.bf16 %v2199_v9, %v2193_v0 }
 0x103   :  { %1816 = vst [vmem:[%s2463_s2 + $0x10] sm:$0xff] %v1668_v11   ;;  %v1276_v16 = vadd.f32 %v1908_v60, %v1275_v12  ;;  %v1409_v17 = vadd.f32 %v1408_v10, %v1346_v13 }
 0x104   :  { %1832 = vst [vmem:[%s2463_s2 + $0x90] sm:$0xff] %v1748_v14  }
 0x105   :  { %v1410_v19 = vadd.f32 %v1409_v17, %v1347_v15  ;;  %v1912_v20 = vpop.f32.mrb[8].mxu0  ;;  %v1277_v21 = vadd.f32 %v1909_v4, %v1276_v16  ;;  %v2215_v22 = vpop.f32.mrb[8].mxu1 }
 0x106   :  { %v533_v23 = vpop.f32.mrb[9].mxu0  ;;  %v2217_v24 = vpop.f32.mrb[9].mxu1  ;;  %v1351_v39 = vmul.f32 %v1912_v20, %v1912_v20 }
 0x107   :  { %v1278_v25 = vadd.f32 %v1277_v21, %v533_v23  ;;  %v1349_v26 = vmul.f32 %v533_v23, %v533_v23  ;;  %v1411_v27 = vadd.f32 %v1410_v19, %v1348_v18  ;;  %v1913_v28 = vpop.f32.mrb[10].mxu0  ;;  %v2219_v29 = vpop.f32.mrb[10].mxu1 }
 0x108   :  { %v1683_v30 = vpack.c.bf16 %v1913_v28, %v1912_v20  ;;  %v536_v31 = vpop.f32.mrb[11].mxu0  ;;  %v1763_v32 = vpack.c.bf16 %v2219_v29, %v2215_v22  ;;  %v2223_v33 = vpop.f32.mrb[11].mxu1  ;;  %v1352_v44 = vmul.f32 %v1913_v28, %v1913_v28 }
 0x109   :  { %v1412_v34 = vadd.f32 %v1411_v27, %v1349_v26  ;;  %v1678_v35 = vpack.c.bf16 %v536_v31, %v533_v23  ;;  %v1279_v36 = vadd.f32 %v1278_v25, %v536_v31  ;;  %v1350_v37 = vmul.f32 %v536_v31, %v536_v31 }
 0x10a   :  { %1819 = vst [vmem:[%s2463_s2 + $0x28] sm:$0xff] %v1683_v30   ;;  %1835 = vst [vmem:[%s2463_s2 + $0xa8] sm:$0xff] %v1763_v32   ;;  %v1758_v38 = vpack.c.bf16 %v2223_v33, %v2217_v24 }
 0x10b   :  { %1818 = vst [vmem:[%s2463_s2 + $0x20] sm:$0xff] %v1678_v35   ;;  %v1280_v40 = vadd.f32 %v1912_v20, %v1279_v36  ;;  %v1413_v42 = vadd.f32 %v1412_v34, %v1350_v37 }
 0x10c   :  { %1834 = vst [vmem:[%s2463_s2 + $0xa0] sm:$0xff] %v1758_v38  }
 0x10d   :  { %v1414_v46 = vadd.f32 %v1413_v42, %v1351_v39  ;;  %v1916_v47 = vpop.f32.mrb[12].mxu0  ;;  %v1281_v48 = vadd.f32 %v1913_v28, %v1280_v40  ;;  %v2239_v49 = vpop.f32.mrb[12].mxu1 }
 0x10e   :  { %v549_v51 = vpop.f32.mrb[13].mxu0  ;;  %v2241_v52 = vpop.f32.mrb[13].mxu1  ;;  %v1355_v6 = vmul.f32 %v1916_v47, %v1916_v47 }
 0x10f   :  { %v1282_v53 = vadd.f32 %v1281_v48, %v549_v51  ;;  %v1353_v54 = vmul.f32 %v549_v51, %v549_v51  ;;  %v1415_v55 = vadd.f32 %v1414_v46, %v1352_v44  ;;  %v1917_v56 = vpop.f32.mrb[14].mxu0  ;;  %v2243_v57 = vpop.f32.mrb[14].mxu1 }
 0x110   :  { %v1693_v58 = vpack.c.bf16 %v1917_v56, %v1916_v47  ;;  %v552_v59 = vpop.f32.mrb[15].mxu0  ;;  %v1773_v60 = vpack.c.bf16 %v2243_v57, %v2239_v49  ;;  %v2247_v61 = vpop.f32.mrb[15].mxu1  ;;  %v1356_v10 = vmul.f32 %v1917_v56, %v1917_v56 }
 0x111   :  { %v1416_v63 = vadd.f32 %v1415_v55, %v1353_v54  ;;  %v1688_v1 = vpack.c.bf16 %v552_v59, %v549_v51  ;;  %v1283_v2 = vadd.f32 %v1282_v53, %v552_v59  ;;  %v1354_v3 = vmul.f32 %v552_v59, %v552_v59 }
 0x112   :  { %1821 = vst [vmem:[%s2463_s2 + $0x38] sm:$0xff] %v1693_v58   ;;  %1837 = vst [vmem:[%s2463_s2 + $0xb8] sm:$0xff] %v1773_v60   ;;  %v1768_v4 = vpack.c.bf16 %v2247_v61, %v2241_v52 }
 0x113   :  { %1820 = vst [vmem:[%s2463_s2 + $0x30] sm:$0xff] %v1688_v1   ;;  %v1284_v7 = vadd.f32 %v1916_v47, %v1283_v2  ;;  %v1417_v8 = vadd.f32 %v1416_v63, %v1354_v3 }
 0x114   :  { %1836 = vst [vmem:[%s2463_s2 + $0xb0] sm:$0xff] %v1768_v4  }
 0x115   :  { %v1418_v11 = vadd.f32 %v1417_v8, %v1355_v6  ;;  %v1920_v12 = vpop.f32.mrb[16].mxu0  ;;  %v1285_v13 = vadd.f32 %v1917_v56, %v1284_v7  ;;  %v2263_v14 = vpop.f32.mrb[16].mxu1 }
 0x116   :  { %v565_v15 = vpop.f32.mrb[17].mxu0  ;;  %v2265_v16 = vpop.f32.mrb[17].mxu1  ;;  %v1359_v35 = vmul.f32 %v1920_v12, %v1920_v12 }
 0x117   :  { %v1286_v17 = vadd.f32 %v1285_v13, %v565_v15  ;;  %v1357_v18 = vmul.f32 %v565_v15, %v565_v15  ;;  %v1419_v19 = vadd.f32 %v1418_v11, %v1356_v10  ;;  %v1921_v20 = vpop.f32.mrb[18].mxu0  ;;  %v2267_v21 = vpop.f32.mrb[18].mxu1 }
 0x118   :  { %v1703_v23 = vpack.c.bf16 %v1921_v20, %v1920_v12  ;;  %v568_v25 = vpop.f32.mrb[19].mxu0  ;;  %v1783_v26 = vpack.c.bf16 %v2267_v21, %v2263_v14  ;;  %v2271_v27 = vpop.f32.mrb[19].mxu1  ;;  %v1360_v38 = vmul.f32 %v1921_v20, %v1921_v20 }
 0x119   :  { %v1420_v28 = vadd.f32 %v1419_v19, %v1357_v18  ;;  %v1698_v30 = vpack.c.bf16 %v568_v25, %v565_v15  ;;  %v1287_v31 = vadd.f32 %v1286_v17, %v568_v25  ;;  %v1358_v32 = vmul.f32 %v568_v25, %v568_v25 }
 0x11a   :  { %1823 = vst [vmem:[%s2463_s2 + $0x48] sm:$0xff] %v1703_v23   ;;  %1839 = vst [vmem:[%s2463_s2 + $0xc8] sm:$0xff] %v1783_v26   ;;  %v1778_v34 = vpack.c.bf16 %v2271_v27, %v2265_v16 }
 0x11b   :  { %1822 = vst [vmem:[%s2463_s2 + $0x40] sm:$0xff] %v1698_v30   ;;  %v1288_v36 = vadd.f32 %v1920_v12, %v1287_v31  ;;  %v1421_v37 = vadd.f32 %v1420_v28, %v1358_v32 }
 0x11c   :  { %1838 = vst [vmem:[%s2463_s2 + $0xc0] sm:$0xff] %v1778_v34  }
 0x11d   :  { %v1422_v39 = vadd.f32 %v1421_v37, %v1359_v35  ;;  %v1924_v40 = vpop.f32.mrb[20].mxu0  ;;  %v1289_v42 = vadd.f32 %v1921_v20, %v1288_v36  ;;  %v2287_v44 = vpop.f32.mrb[20].mxu1 }
 0x11e   :  { %v581_v46 = vpop.f32.mrb[21].mxu0  ;;  %v2289_v47 = vpop.f32.mrb[21].mxu1  ;;  %v1363_v6 = vmul.f32 %v1924_v40, %v1924_v40 }
 0x11f   :  { %v1290_v48 = vadd.f32 %v1289_v42, %v581_v46  ;;  %v1361_v51 = vmul.f32 %v581_v46, %v581_v46  ;;  %v1423_v53 = vadd.f32 %v1422_v39, %v1360_v38  ;;  %v1925_v54 = vpop.f32.mrb[22].mxu0  ;;  %v2291_v55 = vpop.f32.mrb[22].mxu1 }
 0x120   :  { %v1713_v56 = vpack.c.bf16 %v1925_v54, %v1924_v40  ;;  %v584_v58 = vpop.f32.mrb[23].mxu0  ;;  %v1793_v59 = vpack.c.bf16 %v2291_v55, %v2287_v44  ;;  %v2295_v60 = vpop.f32.mrb[23].mxu1  ;;  %v1364_v10 = vmul.f32 %v1925_v54, %v1925_v54 }
 0x121   :  { %v1424_v63 = vadd.f32 %v1423_v53, %v1361_v51  ;;  %v1708_v1 = vpack.c.bf16 %v584_v58, %v581_v46  ;;  %v1291_v2 = vadd.f32 %v1290_v48, %v584_v58  ;;  %v1362_v3 = vmul.f32 %v584_v58, %v584_v58 }
 0x122   :  { %1825 = vst [vmem:[%s2463_s2 + $0x58] sm:$0xff] %v1713_v56   ;;  %1841 = vst [vmem:[%s2463_s2 + $0xd8] sm:$0xff] %v1793_v59   ;;  %v1788_v4 = vpack.c.bf16 %v2295_v60, %v2289_v47 }
 0x123   :  { %1824 = vst [vmem:[%s2463_s2 + $0x50] sm:$0xff] %v1708_v1   ;;  %v1292_v7 = vadd.f32 %v1924_v40, %v1291_v2  ;;  %v1425_v8 = vadd.f32 %v1424_v63, %v1362_v3 }
 0x124   :  { %1840 = vst [vmem:[%s2463_s2 + $0xd0] sm:$0xff] %v1788_v4  }
 0x125   :  { %v1426_v11 = vadd.f32 %v1425_v8, %v1363_v6  ;;  %v1928_v12 = vpop.f32.mrb[24].mxu0  ;;  %v1293_v13 = vadd.f32 %v1925_v54, %v1292_v7  ;;  %v2311_v15 = vpop.f32.mrb[24].mxu1 }
 0x126   :  { %v597_v17 = vpop.f32.mrb[25].mxu0  ;;  %v2313_v18 = vpop.f32.mrb[25].mxu1  ;;  %v1367_v39 = vmul.f32 %v1928_v12, %v1928_v12 }
 0x127   :  { %v1294_v19 = vadd.f32 %v1293_v13, %v597_v17  ;;  %v1365_v20 = vmul.f32 %v597_v17, %v597_v17  ;;  %v1427_v23 = vadd.f32 %v1426_v11, %v1364_v10  ;;  %v1929_v25 = vpop.f32.mrb[26].mxu0  ;;  %v2315_v26 = vpop.f32.mrb[26].mxu1 }
 0x128   :  { %v1723_v28 = vpack.c.bf16 %v1929_v25, %v1928_v12  ;;  %v600_v30 = vpop.f32.mrb[27].mxu0  ;;  %v1803_v31 = vpack.c.bf16 %v2315_v26, %v2311_v15  ;;  %v2319_v32 = vpop.f32.mrb[27].mxu1  ;;  %v1368_v46 = vmul.f32 %v1929_v25, %v1929_v25 }
 0x129   :  { %v1428_v34 = vadd.f32 %v1427_v23, %v1365_v20  ;;  %v1718_v35 = vpack.c.bf16 %v600_v30, %v597_v17  ;;  %v1295_v36 = vadd.f32 %v1294_v19, %v600_v30  ;;  %v1366_v37 = vmul.f32 %v600_v30, %v600_v30 }
 0x12a   :  { %1827 = vst [vmem:[%s2463_s2 + $0x68] sm:$0xff] %v1723_v28   ;;  %1843 = vst [vmem:[%s2463_s2 + $0xe8] sm:$0xff] %v1803_v31   ;;  %v1798_v38 = vpack.c.bf16 %v2319_v32, %v2313_v18  ;;  %v1373_v31 = vmul.f32 %v2169_v43, %v2169_v43 }
 0x12b   :  { %1826 = vst [vmem:[%s2463_s2 + $0x60] sm:$0xff] %v1718_v35   ;;  %v1296_v40 = vadd.f32 %v1928_v12, %v1295_v36  ;;  %v1429_v42 = vadd.f32 %v1428_v34, %v1366_v37 }
 0x12c   :  { %1842 = vst [vmem:[%s2463_s2 + $0xe0] sm:$0xff] %v1798_v38   ;;  %v1374_v38 = vmul.f32 %v2175_v50, %v2175_v50 }
 0x12d   :  { %v1430_v48 = vadd.f32 %v1429_v42, %v1367_v39  ;;  %v1932_v51 = vpop.f32.mrb[28].mxu0  ;;  %v1297_v53 = vadd.f32 %v1929_v25, %v1296_v40  ;;  %v2335_v54 = vpop.f32.mrb[28].mxu1  ;;  %v1375_v39 = vmul.f32 %v2167_v41, %v2167_v41 }
 0x12e   :  { %v613_v56 = vpop.f32.mrb[29].mxu0  ;;  %v2337_v58 = vpop.f32.mrb[29].mxu1  ;;  %v1371_v19 = vmul.f32 %v1932_v51, %v1932_v51 }
 0x12f   :  { %v1298_v59 = vadd.f32 %v1297_v53, %v613_v56  ;;  %v1369_v63 = vmul.f32 %v613_v56, %v613_v56  ;;  %v1431_v1 = vadd.f32 %v1430_v48, %v1368_v46  ;;  %v1933_v2 = vpop.f32.mrb[30].mxu0  ;;  %v2339_v3 = vpop.f32.mrb[30].mxu1  ;;  %v1376_v46 = vmul.f32 %v2171_v45, %v2171_v45 }
 0x130   :  { %v1733_v4 = vpack.c.bf16 %v1933_v2, %v1932_v51  ;;  %v616_v6 = vpop.f32.mrb[31].mxu0  ;;  %v1813_v7 = vpack.c.bf16 %v2339_v3, %v2335_v54  ;;  %v2343_v8 = vpop.f32.mrb[31].mxu1  ;;  %v1372_v25 = vmul.f32 %v1933_v2, %v1933_v2 }
 0x131   :  { %v1432_v10 = vadd.f32 %v1431_v1, %v1369_v63  ;;  %v1728_v11 = vpack.c.bf16 %v616_v6, %v613_v56  ;;  %v1299_v12 = vadd.f32 %v1298_v59, %v616_v6  ;;  %v1370_v13 = vmul.f32 %v616_v6, %v616_v6 }
 0x132   :  { %1829 = vst [vmem:[%s2463_s2 + $0x78] sm:$0xff] %v1733_v4   ;;  %1845 = vst [vmem:[%s2463_s2 + $0xf8] sm:$0xff] %v1813_v7   ;;  %v1808_v17 = vpack.c.bf16 %v2343_v8, %v2337_v58  ;;  %v1378_v63 = vmul.f32 %v2199_v9, %v2199_v9 }
 0x133   :  { %1828 = vst [vmem:[%s2463_s2 + $0x70] sm:$0xff] %v1728_v11   ;;  %v1300_v20 = vadd.f32 %v1932_v51, %v1299_v12  ;;  %v1433_v23 = vadd.f32 %v1432_v10, %v1370_v13  ;;  %v1382_v12 = vmul.f32 %v2223_v33, %v2223_v33 }
 0x134   :  { %1844 = vst [vmem:[%s2463_s2 + $0xf0] sm:$0xff] %v1808_v17  }
 0x135   :  { %v1434_v28 = vadd.f32 %v1433_v23, %v1371_v19  ;;  %v1301_v30 = vadd.f32 %v1933_v2, %v1300_v20 }
 0x137   :  { %v1302_v34 = vadd.f32 %v1301_v30, %v2169_v43  ;;  %v1435_v35 = vadd.f32 %v1434_v28, %v1372_v25  ;;  %v1377_v43 = vmul.f32 %v2193_v0, %v2193_v0  ;;  %v1386_v30 = vmul.f32 %v2247_v61, %v2247_v61 }
 0x139   :  { %v1436_v36 = vadd.f32 %v1435_v35, %v1373_v31  ;;  %v1303_v37 = vadd.f32 %v1302_v34, %v2175_v50 }
 0x13b   :  { %v1304_v40 = vadd.f32 %v2167_v41, %v1303_v37  ;;  %v1437_v42 = vadd.f32 %v1436_v36, %v1374_v38  ;;  %v1379_v41 = vmul.f32 %v2191_v62, %v2191_v62 }
 0x13d   :  { %v1438_v48 = vadd.f32 %v1437_v42, %v1375_v39  ;;  %v1305_v51 = vadd.f32 %v2171_v45, %v1304_v40  ;;  %v1380_v45 = vmul.f32 %v2195_v5, %v2195_v5  ;;  %v1390_v40 = vmul.f32 %v2271_v27, %v2271_v27 }
 0x13f   :  { %v1306_v53 = vadd.f32 %v1305_v51, %v2193_v0  ;;  %v1439_v56 = vadd.f32 %v1438_v48, %v1376_v46  ;;  %v1381_v0 = vmul.f32 %v2217_v24, %v2217_v24 }
 0x141   :  { %v1440_v59 = vadd.f32 %v1439_v56, %v1377_v43  ;;  %v1307_v50 = vadd.f32 %v1306_v53, %v2199_v9 }
 0x143   :  { %v1308_v1 = vadd.f32 %v2191_v62, %v1307_v50  ;;  %v1441_v2 = vadd.f32 %v1440_v59, %v1378_v63  ;;  %v1383_v62 = vmul.f32 %v2215_v22, %v2215_v22  ;;  %v1394_v59 = vmul.f32 %v2295_v60, %v2295_v60 }
 0x145   :  { %v1442_v4 = vadd.f32 %v1441_v2, %v1379_v41  ;;  %v1309_v6 = vadd.f32 %v2195_v5, %v1308_v1  ;;  %v1384_v5 = vmul.f32 %v2219_v29, %v2219_v29 }
 0x147   :  { %v1310_v7 = vadd.f32 %v1309_v6, %v2217_v24  ;;  %v1443_v10 = vadd.f32 %v1442_v4, %v1380_v45  ;;  %v1385_v24 = vmul.f32 %v2241_v52, %v2241_v52  ;;  %v1398_v6 = vmul.f32 %v2319_v32, %v2319_v32 }
 0x149   :  { %v1444_v11 = vadd.f32 %v1443_v10, %v1381_v0  ;;  %v1311_v9 = vadd.f32 %v1310_v7, %v2223_v33 }
 0x14b   :  { %v1312_v13 = vadd.f32 %v2215_v22, %v1311_v9  ;;  %v1445_v17 = vadd.f32 %v1444_v11, %v1382_v12  ;;  %v1387_v22 = vmul.f32 %v2239_v49, %v2239_v49 }
 0x14d   :  { %v1446_v19 = vadd.f32 %v1445_v17, %v1383_v62  ;;  %v1313_v20 = vadd.f32 %v2219_v29, %v1312_v13  ;;  %v1388_v29 = vmul.f32 %v2243_v57, %v2243_v57  ;;  %v1402_v13 = vmul.f32 %v2343_v8, %v2343_v8 }
 0x14f   :  { %v1314_v23 = vadd.f32 %v1313_v20, %v2241_v52  ;;  %v1447_v25 = vadd.f32 %v1446_v19, %v1384_v5  ;;  %v1389_v52 = vmul.f32 %v2265_v16, %v2265_v16 }
 0x151   :  { %v1448_v28 = vadd.f32 %v1447_v25, %v1385_v24  ;;  %v1315_v33 = vadd.f32 %v1314_v23, %v2247_v61 }
 0x153   :  { %v1316_v31 = vadd.f32 %v2239_v49, %v1315_v33  ;;  %v1449_v34 = vadd.f32 %v1448_v28, %v1386_v30  ;;  %v1391_v49 = vmul.f32 %v2263_v14, %v2263_v14 }
 0x155   :  { %v1450_v35 = vadd.f32 %v1449_v34, %v1387_v22  ;;  %v1317_v36 = vadd.f32 %v2243_v57, %v1316_v31  ;;  %v1392_v57 = vmul.f32 %v2267_v21, %v2267_v21 }
 0x157   :  { %v1318_v37 = vadd.f32 %v1317_v36, %v2265_v16  ;;  %v1451_v38 = vadd.f32 %v1450_v35, %v1388_v29  ;;  %v1393_v16 = vmul.f32 %v2289_v47, %v2289_v47 }
 0x159   :  { %v1452_v39 = vadd.f32 %v1451_v38, %v1389_v52  ;;  %v1319_v61 = vadd.f32 %v1318_v37, %v2271_v27 }
 0x15b   :  { %v1320_v42 = vadd.f32 %v2263_v14, %v1319_v61  ;;  %v1453_v46 = vadd.f32 %v1452_v39, %v1390_v40  ;;  %v1395_v14 = vmul.f32 %v2287_v44, %v2287_v44 }
 0x15d   :  { %v1454_v48 = vadd.f32 %v1453_v46, %v1391_v49  ;;  %v1321_v51 = vadd.f32 %v2267_v21, %v1320_v42  ;;  %v1396_v21 = vmul.f32 %v2291_v55, %v2291_v55 }
 0x15f   :  { %v1322_v43 = vadd.f32 %v1321_v51, %v2289_v47  ;;  %v1455_v53 = vadd.f32 %v1454_v48, %v1392_v57  ;;  %v1397_v47 = vmul.f32 %v2313_v18, %v2313_v18 }
 0x161   :  { %v1456_v56 = vadd.f32 %v1455_v53, %v1393_v16  ;;  %v1323_v27 = vadd.f32 %v1322_v43, %v2295_v60 }
 0x163   :  { %v1324_v50 = vadd.f32 %v2287_v44, %v1323_v27  ;;  %v1457_v63 = vadd.f32 %v1456_v56, %v1394_v59  ;;  %v1399_v44 = vmul.f32 %v2311_v15, %v2311_v15 }
 0x165   :  { %v1458_v41 = vadd.f32 %v1457_v63, %v1395_v14  ;;  %v1325_v1 = vadd.f32 %v2291_v55, %v1324_v50  ;;  %v1400_v55 = vmul.f32 %v2315_v26, %v2315_v26 }
 0x167   :  { %v1326_v2 = vadd.f32 %v1325_v1, %v2313_v18  ;;  %v1459_v45 = vadd.f32 %v1458_v41, %v1396_v21  ;;  %v1401_v18 = vmul.f32 %v2337_v58, %v2337_v58 }
 0x169   :  { %v1460_v4 = vadd.f32 %v1459_v45, %v1397_v47  ;;  %v1327_v60 = vadd.f32 %v1326_v2, %v2319_v32 }
 0x16b   :  { %v1328_v0 = vadd.f32 %v2311_v15, %v1327_v60  ;;  %v1461_v7 = vadd.f32 %v1460_v4, %v1398_v6  ;;  %v1403_v15 = vmul.f32 %v2335_v54, %v2335_v54 }
 0x16d   :  { %v1462_v10 = vadd.f32 %v1461_v7, %v1399_v44  ;;  %v1329_v11 = vadd.f32 %v2315_v26, %v1328_v0  ;;  %v1404_v26 = vmul.f32 %v2339_v3, %v2339_v3 }
 0x16f   :  { %v1330_v9 = vadd.f32 %v1329_v11, %v2337_v58  ;;  %v1463_v12 = vadd.f32 %v1462_v10, %v1400_v55 }
 0x171   :  { %v1464_v62 = vadd.f32 %v1463_v12, %v1401_v18  ;;  %v1331_v32 = vadd.f32 %v1330_v9, %v2343_v8 }
 0x173   :  { %v1332_v17 = vadd.f32 %v2335_v54, %v1331_v32  ;;  %v1465_v5 = vadd.f32 %v1464_v62, %v1402_v13 }
 0x175   :  { %v1333_v19 = vadd.f32 %v2339_v3, %v1332_v17  ;;  %v1466_v20 = vadd.f32 %v1465_v5, %v1403_v15 }
 0x177   :  { %v1334_v58 = vrot.slane %v1333_v19, 4  ;;  %v1467_v24 = vadd.f32 %v1466_v20, %v1404_v26 }
 0x179   :  { %v1335_v23 = vadd.f32 %v1334_v58, %v1333_v19  ;;  %v1468_v25 = vrot.slane %v1467_v24, 4 }
 0x17b   :  { %v1336_v28 = vrot.slane %v1335_v23, 2  ;;  %v1469_v33 = vadd.f32 %v1468_v25, %v1467_v24 }
 0x17d   :  { %v1337_v30 = vadd.f32 %v1336_v28, %v1335_v23  ;;  %v1470_v8 = vrot.slane %v1469_v33, 2 }
 0x17f   :  { %v1338_v22 = vrot.slane %v1337_v30, 1  ;;  %v1471_v31 = vadd.f32 %v1470_v8, %v1469_v33 }
 0x181   :  { %v1339_v34 = vadd.f32 %v1338_v22, %v1337_v30  ;;  %v1472_v29 = vrot.slane %v1471_v31, 1 }
 0x183   :  { %1340 = vst [vmem:[%s2464_s3] sm:$0x1] %v1339_v34  ;;  %v1473_v54 = vadd.f32 %v1472_v29, %v1471_v31 }
 0x185   :  { %1474 = vst [vmem:[%s2465_s4] sm:$0x1] %v1473_v54 }

// kernel: up_forward.9
= control target key start
LH: loop header
LB: loop body
LE: loop exit
PB: predicated region body
PF: predicated region fallthrough
CT: control target
= control target key end

     0   :  { %s1023_s0 = inlined_call_operand.vmem [shape: bf16[512,128], index: 0, kind: input, shape index: {}]   ;;  %s1024_s1 = inlined_call_operand.vmem [shape: f32[1,128], index: 1, kind: input, shape index: {}]   ;;  %s1025_s2 = inlined_call_operand.vmem [shape: f32[1,128], index: 2, kind: input, shape index: {}]   ;;  %s1026_s3 = inlined_call_operand.vmem [shape: f32[512,128], index: 3, kind: output, shape index: {}]  }
   0x1   :  { %v419_v0 = vld [vmem:[%s1023_s0] sm:$0xff]   ;;  %v546_v4 = vld [vmem:[%s1023_s0 + $0x8] sm:$0xff]   ;;  %v547_v5 = vld [vmem:[%s1023_s0 + $0x10] sm:$0xff]  }
   0x2   :  { %v603_v1 = vld [vmem:[%s1024_s1] ss:$0 sm:$0xff]  ;;  %v420_v2 = vunpack.c.l.bf16 %v419_v0  ;;  %v421_v3 = vunpack.c.h.bf16 %v419_v0  ;;  %v548_v6 = vld [vmem:[%s1023_s0 + $0x18] sm:$0xff]   ;;  %v424_v8 = vunpack.c.l.bf16 %v546_v4  ;;  %v425_v9 = vunpack.c.h.bf16 %v546_v4  ;;  %v550_v33 = vld [vmem:[%s1023_s0 + $0x28] sm:$0xff]  }
   0x3   :  { %v617_v7 = vld [vmem:[%s1025_s2] ss:$0 sm:$0xff]  ;;  %v428_v10 = vunpack.c.l.bf16 %v547_v5  ;;  %v429_v11 = vunpack.c.h.bf16 %v547_v5  ;;  %v432_v14 = vunpack.c.l.bf16 %v548_v6  ;;  %v433_v15 = vunpack.c.h.bf16 %v548_v6  ;;  %v551_v34 = vld [vmem:[%s1023_s0 + $0x30] sm:$0xff]   ;;  %v552_v39 = vld [vmem:[%s1023_s0 + $0x38] sm:$0xff]  }
   0x4   :  { %v149_v12 = vmul.f32 %v420_v2, %v603_v1  ;;  %v150_v13 = vmul.f32 %v421_v3, %v603_v1  ;;  %v151_v16 = vmul.f32 %v424_v8, %v603_v1  ;;  %v152_v17 = vmul.f32 %v425_v9, %v603_v1  ;;  %v549_v28 = vld [vmem:[%s1023_s0 + $0x20] sm:$0xff]   ;;  %v554_v6 = vld [vmem:[%s1023_s0 + $0x48] sm:$0xff]   ;;  %v555_v8 = vld [vmem:[%s1023_s0 + $0x50] sm:$0xff]  }
   0x5   :  { %v153_v18 = vmul.f32 %v428_v10, %v603_v1  ;;  %v154_v19 = vmul.f32 %v429_v11, %v603_v1  ;;  %v155_v22 = vmul.f32 %v432_v14, %v603_v1  ;;  %v156_v23 = vmul.f32 %v433_v15, %v603_v1  ;;  %v553_v0 = vld [vmem:[%s1023_s0 + $0x40] sm:$0xff]  }
   0x6   :  { %v220_v20 = vadd.f32 %v617_v7, %v149_v12  ;;  %v221_v21 = vadd.f32 %v617_v7, %v150_v13  ;;  %v222_v24 = vadd.f32 %v617_v7, %v151_v16  ;;  %v223_v25 = vadd.f32 %v617_v7, %v152_v17  ;;  %v556_v13 = vld [vmem:[%s1023_s0 + $0x58] sm:$0xff]  }
   0x7   :  { %v224_v26 = vadd.f32 %v617_v7, %v153_v18  ;;  %v225_v27 = vadd.f32 %v617_v7, %v154_v19  ;;  %v226_v31 = vadd.f32 %v617_v7, %v155_v22  ;;  %v227_v32 = vadd.f32 %v617_v7, %v156_v23 }
   0x8   :  { %v284_v29 = vmax.f32 %v220_v20, 0.0  ;;  %v285_v30 = vmax.f32 %v221_v21, 0.0  ;;  %v286_v35 = vmax.f32 %v222_v24, 0.0  ;;  %v287_v36 = vmax.f32 %v223_v25, 0.0 }
   0x9   :  { %v288_v37 = vmax.f32 %v224_v26, 0.0  ;;  %v289_v38 = vmax.f32 %v225_v27, 0.0  ;;  %v290_v40 = vmax.f32 %v226_v31, 0.0  ;;  %v291_v41 = vmax.f32 %v227_v32, 0.0 }
   0xa   :  { %348 = vst [vmem:[%s1026_s3] sm:$0xff] %v284_v29  ;;  %349 = vst [vmem:[%s1026_s3 + $0x8] sm:$0xff] %v285_v30  ;;  %v436_v42 = vunpack.c.l.bf16 %v549_v28  ;;  %v437_v43 = vunpack.c.h.bf16 %v549_v28  ;;  %v440_v44 = vunpack.c.l.bf16 %v550_v33  ;;  %v441_v45 = vunpack.c.h.bf16 %v550_v33 }
   0xb   :  { %350 = vst [vmem:[%s1026_s3 + $0x10] sm:$0xff] %v286_v35  ;;  %351 = vst [vmem:[%s1026_s3 + $0x18] sm:$0xff] %v287_v36  ;;  %v444_v46 = vunpack.c.l.bf16 %v551_v34  ;;  %v445_v47 = vunpack.c.h.bf16 %v551_v34  ;;  %v448_v50 = vunpack.c.l.bf16 %v552_v39  ;;  %v449_v51 = vunpack.c.h.bf16 %v552_v39 }
   0xc   :  { %352 = vst [vmem:[%s1026_s3 + $0x20] sm:$0xff] %v288_v37  ;;  %353 = vst [vmem:[%s1026_s3 + $0x28] sm:$0xff] %v289_v38  ;;  %v157_v48 = vmul.f32 %v436_v42, %v603_v1  ;;  %v158_v49 = vmul.f32 %v437_v43, %v603_v1  ;;  %v159_v52 = vmul.f32 %v440_v44, %v603_v1  ;;  %v452_v16 = vunpack.c.l.bf16 %v553_v0  ;;  %v557_v38 = vld [vmem:[%s1023_s0 + $0x60] sm:$0xff]   ;;  %v558_v43 = vld [vmem:[%s1023_s0 + $0x68] sm:$0xff]  }
   0xd   :  { %354 = vst [vmem:[%s1026_s3 + $0x30] sm:$0xff] %v290_v40  ;;  %355 = vst [vmem:[%s1026_s3 + $0x38] sm:$0xff] %v291_v41  ;;  %v160_v53 = vmul.f32 %v441_v45, %v603_v1  ;;  %v161_v54 = vmul.f32 %v444_v46, %v603_v1  ;;  %v162_v55 = vmul.f32 %v445_v47, %v603_v1  ;;  %v453_v17 = vunpack.c.h.bf16 %v553_v0  ;;  %v559_v44 = vld [vmem:[%s1023_s0 + $0x70] sm:$0xff]  }
   0xe   :  { %v228_v56 = vadd.f32 %v617_v7, %v157_v48  ;;  %v229_v57 = vadd.f32 %v617_v7, %v158_v49  ;;  %v163_v58 = vmul.f32 %v448_v50, %v603_v1  ;;  %v164_v59 = vmul.f32 %v449_v51, %v603_v1  ;;  %v560_v49 = vld [vmem:[%s1023_s0 + $0x78] sm:$0xff]  }
   0xf   :  { %v230_v60 = vadd.f32 %v617_v7, %v159_v52  ;;  %v231_v61 = vadd.f32 %v617_v7, %v160_v53  ;;  %v232_v62 = vadd.f32 %v617_v7, %v161_v54  ;;  %v233_v63 = vadd.f32 %v617_v7, %v162_v55 }
  0x10   :  { %v292_v2 = vmax.f32 %v228_v56, 0.0  ;;  %v293_v3 = vmax.f32 %v229_v57, 0.0  ;;  %v234_v4 = vadd.f32 %v617_v7, %v163_v58  ;;  %v235_v5 = vadd.f32 %v617_v7, %v164_v59 }
  0x11   :  { %v294_v9 = vmax.f32 %v230_v60, 0.0  ;;  %v295_v10 = vmax.f32 %v231_v61, 0.0  ;;  %v296_v11 = vmax.f32 %v232_v62, 0.0  ;;  %v297_v12 = vmax.f32 %v233_v63, 0.0 }
  0x12   :  { %356 = vst [vmem:[%s1026_s3 + $0x40] sm:$0xff] %v292_v2  ;;  %357 = vst [vmem:[%s1026_s3 + $0x48] sm:$0xff] %v293_v3  ;;  %v298_v14 = vmax.f32 %v234_v4, 0.0  ;;  %v299_v15 = vmax.f32 %v235_v5, 0.0  ;;  %v456_v18 = vunpack.c.l.bf16 %v554_v6  ;;  %v457_v19 = vunpack.c.h.bf16 %v554_v6 }
  0x13   :  { %358 = vst [vmem:[%s1026_s3 + $0x50] sm:$0xff] %v294_v9  ;;  %359 = vst [vmem:[%s1026_s3 + $0x58] sm:$0xff] %v295_v10  ;;  %v460_v20 = vunpack.c.l.bf16 %v555_v8  ;;  %v461_v21 = vunpack.c.h.bf16 %v555_v8  ;;  %v165_v22 = vmul.f32 %v452_v16, %v603_v1  ;;  %v166_v23 = vmul.f32 %v453_v17, %v603_v1  ;;  %v562_v17 = vld [vmem:[%s1023_s0 + $0x88] sm:$0xff]  }
  0x14   :  { %360 = vst [vmem:[%s1026_s3 + $0x60] sm:$0xff] %v296_v11  ;;  %361 = vst [vmem:[%s1026_s3 + $0x68] sm:$0xff] %v297_v12  ;;  %v464_v24 = vunpack.c.l.bf16 %v556_v13  ;;  %v465_v25 = vunpack.c.h.bf16 %v556_v13  ;;  %v167_v26 = vmul.f32 %v456_v18, %v603_v1  ;;  %v168_v27 = vmul.f32 %v457_v19, %v603_v1  ;;  %v561_v12 = vld [vmem:[%s1023_s0 + $0x80] sm:$0xff]   ;;  %v563_v18 = vld [vmem:[%s1023_s0 + $0x90] sm:$0xff]  }
  0x15   :  { %362 = vst [vmem:[%s1026_s3 + $0x70] sm:$0xff] %v298_v14  ;;  %363 = vst [vmem:[%s1026_s3 + $0x78] sm:$0xff] %v299_v15  ;;  %v169_v28 = vmul.f32 %v460_v20, %v603_v1  ;;  %v170_v29 = vmul.f32 %v461_v21, %v603_v1  ;;  %v236_v30 = vadd.f32 %v617_v7, %v165_v22  ;;  %v468_v52 = vunpack.c.l.bf16 %v557_v38 }
  0x16   :  { %v237_v31 = vadd.f32 %v617_v7, %v166_v23  ;;  %v171_v32 = vmul.f32 %v464_v24, %v603_v1  ;;  %v172_v33 = vmul.f32 %v465_v25, %v603_v1  ;;  %v238_v34 = vadd.f32 %v617_v7, %v167_v26  ;;  %v564_v23 = vld [vmem:[%s1023_s0 + $0x98] sm:$0xff]  }
  0x17   :  { %v239_v35 = vadd.f32 %v617_v7, %v168_v27  ;;  %v240_v36 = vadd.f32 %v617_v7, %v169_v28  ;;  %v241_v37 = vadd.f32 %v617_v7, %v170_v29  ;;  %v300_v39 = vmax.f32 %v236_v30, 0.0 }
  0x18   :  { %v301_v40 = vmax.f32 %v237_v31, 0.0  ;;  %v242_v41 = vadd.f32 %v617_v7, %v171_v32  ;;  %v243_v42 = vadd.f32 %v617_v7, %v172_v33  ;;  %v302_v45 = vmax.f32 %v238_v34, 0.0 }
  0x19   :  { %v303_v46 = vmax.f32 %v239_v35, 0.0  ;;  %v304_v47 = vmax.f32 %v240_v36, 0.0  ;;  %v305_v48 = vmax.f32 %v241_v37, 0.0  ;;  %364 = vst [vmem:[%s1026_s3 + $0x80] sm:$0xff] %v300_v39  ;;  %v469_v53 = vunpack.c.h.bf16 %v557_v38 }
  0x1a   :  { %365 = vst [vmem:[%s1026_s3 + $0x88] sm:$0xff] %v301_v40  ;;  %v306_v50 = vmax.f32 %v242_v41, 0.0  ;;  %v307_v51 = vmax.f32 %v243_v42, 0.0  ;;  %366 = vst [vmem:[%s1026_s3 + $0x90] sm:$0xff] %v302_v45  ;;  %v472_v54 = vunpack.c.l.bf16 %v558_v43  ;;  %v473_v55 = vunpack.c.h.bf16 %v558_v43 }
  0x1b   :  { %367 = vst [vmem:[%s1026_s3 + $0x98] sm:$0xff] %v303_v46  ;;  %368 = vst [vmem:[%s1026_s3 + $0xa0] sm:$0xff] %v304_v47  ;;  %v476_v56 = vunpack.c.l.bf16 %v559_v44  ;;  %v477_v57 = vunpack.c.h.bf16 %v559_v44  ;;  %v173_v58 = vmul.f32 %v468_v52, %v603_v1  ;;  %v174_v59 = vmul.f32 %v469_v53, %v603_v1  ;;  %v566_v53 = vld [vmem:[%s1023_s0 + $0xa8] sm:$0xff]  }
  0x1c   :  { %369 = vst [vmem:[%s1026_s3 + $0xa8] sm:$0xff] %v305_v48  ;;  %370 = vst [vmem:[%s1026_s3 + $0xb0] sm:$0xff] %v306_v50  ;;  %v480_v60 = vunpack.c.l.bf16 %v560_v49  ;;  %v481_v61 = vunpack.c.h.bf16 %v560_v49  ;;  %v175_v62 = vmul.f32 %v472_v54, %v603_v1  ;;  %v176_v63 = vmul.f32 %v473_v55, %v603_v1  ;;  %v565_v48 = vld [vmem:[%s1023_s0 + $0xa0] sm:$0xff]   ;;  %v567_v54 = vld [vmem:[%s1023_s0 + $0xb0] sm:$0xff]  }
  0x1d   :  { %371 = vst [vmem:[%s1026_s3 + $0xb8] sm:$0xff] %v307_v51  ;;  %v177_v0 = vmul.f32 %v476_v56, %v603_v1  ;;  %v178_v2 = vmul.f32 %v477_v57, %v603_v1  ;;  %v244_v3 = vadd.f32 %v617_v7, %v173_v58  ;;  %v245_v4 = vadd.f32 %v617_v7, %v174_v59  ;;  %v568_v59 = vld [vmem:[%s1023_s0 + $0xb8] sm:$0xff]  }
  0x1e   :  { %v179_v5 = vmul.f32 %v480_v60, %v603_v1  ;;  %v180_v6 = vmul.f32 %v481_v61, %v603_v1  ;;  %v246_v8 = vadd.f32 %v617_v7, %v175_v62  ;;  %v247_v9 = vadd.f32 %v617_v7, %v176_v63 }
  0x1f   :  { %v248_v10 = vadd.f32 %v617_v7, %v177_v0  ;;  %v249_v11 = vadd.f32 %v617_v7, %v178_v2  ;;  %v308_v13 = vmax.f32 %v244_v3, 0.0  ;;  %v309_v14 = vmax.f32 %v245_v4, 0.0 }
  0x20   :  { %v250_v15 = vadd.f32 %v617_v7, %v179_v5  ;;  %v251_v16 = vadd.f32 %v617_v7, %v180_v6  ;;  %v310_v19 = vmax.f32 %v246_v8, 0.0  ;;  %v311_v20 = vmax.f32 %v247_v9, 0.0 }
  0x21   :  { %v312_v21 = vmax.f32 %v248_v10, 0.0  ;;  %v313_v22 = vmax.f32 %v249_v11, 0.0  ;;  %372 = vst [vmem:[%s1026_s3 + $0xc0] sm:$0xff] %v308_v13  ;;  %373 = vst [vmem:[%s1026_s3 + $0xc8] sm:$0xff] %v309_v14  ;;  %v484_v26 = vunpack.c.l.bf16 %v561_v12  ;;  %v485_v27 = vunpack.c.h.bf16 %v561_v12 }
  0x22   :  { %v314_v24 = vmax.f32 %v250_v15, 0.0  ;;  %v315_v25 = vmax.f32 %v251_v16, 0.0  ;;  %374 = vst [vmem:[%s1026_s3 + $0xd0] sm:$0xff] %v310_v19  ;;  %375 = vst [vmem:[%s1026_s3 + $0xd8] sm:$0xff] %v311_v20  ;;  %v488_v28 = vunpack.c.l.bf16 %v562_v17  ;;  %v489_v29 = vunpack.c.h.bf16 %v562_v17 }
  0x23   :  { %376 = vst [vmem:[%s1026_s3 + $0xe0] sm:$0xff] %v312_v21  ;;  %377 = vst [vmem:[%s1026_s3 + $0xe8] sm:$0xff] %v313_v22  ;;  %v492_v30 = vunpack.c.l.bf16 %v563_v18  ;;  %v493_v31 = vunpack.c.h.bf16 %v563_v18  ;;  %v181_v32 = vmul.f32 %v484_v26, %v603_v1  ;;  %v182_v33 = vmul.f32 %v485_v27, %v603_v1  ;;  %v569_v22 = vld [vmem:[%s1023_s0 + $0xc0] sm:$0xff]   ;;  %v570_v27 = vld [vmem:[%s1023_s0 + $0xc8] sm:$0xff]  }
  0x24   :  { %378 = vst [vmem:[%s1026_s3 + $0xf0] sm:$0xff] %v314_v24  ;;  %379 = vst [vmem:[%s1026_s3 + $0xf8] sm:$0xff] %v315_v25  ;;  %v496_v34 = vunpack.c.l.bf16 %v564_v23  ;;  %v497_v35 = vunpack.c.h.bf16 %v564_v23  ;;  %v183_v36 = vmul.f32 %v488_v28, %v603_v1  ;;  %v184_v37 = vmul.f32 %v489_v29, %v603_v1  ;;  %v571_v28 = vld [vmem:[%s1023_s0 + $0xd0] sm:$0xff]  }
  0x25   :  { %v185_v38 = vmul.f32 %v492_v30, %v603_v1  ;;  %v186_v39 = vmul.f32 %v493_v31, %v603_v1  ;;  %v252_v40 = vadd.f32 %v617_v7, %v181_v32  ;;  %v253_v41 = vadd.f32 %v617_v7, %v182_v33  ;;  %v572_v33 = vld [vmem:[%s1023_s0 + $0xd8] sm:$0xff]  }
  0x26   :  { %v187_v42 = vmul.f32 %v496_v34, %v603_v1  ;;  %v188_v43 = vmul.f32 %v497_v35, %v603_v1  ;;  %v254_v44 = vadd.f32 %v617_v7, %v183_v36  ;;  %v255_v45 = vadd.f32 %v617_v7, %v184_v37 }
  0x27   :  { %v256_v46 = vadd.f32 %v617_v7, %v185_v38  ;;  %v257_v47 = vadd.f32 %v617_v7, %v186_v39  ;;  %v316_v49 = vmax.f32 %v252_v40, 0.0  ;;  %v317_v50 = vmax.f32 %v253_v41, 0.0 }
  0x28   :  { %v258_v51 = vadd.f32 %v617_v7, %v187_v42  ;;  %v259_v52 = vadd.f32 %v617_v7, %v188_v43  ;;  %v318_v55 = vmax.f32 %v254_v44, 0.0  ;;  %v319_v56 = vmax.f32 %v255_v45, 0.0 }
  0x29   :  { %v320_v57 = vmax.f32 %v256_v46, 0.0  ;;  %v321_v58 = vmax.f32 %v257_v47, 0.0  ;;  %380 = vst [vmem:[%s1026_s3 + $0x100] sm:$0xff] %v316_v49  ;;  %381 = vst [vmem:[%s1026_s3 + $0x108] sm:$0xff] %v317_v50  ;;  %v500_v62 = vunpack.c.l.bf16 %v565_v48  ;;  %v501_v63 = vunpack.c.h.bf16 %v565_v48 }
  0x2a   :  { %v322_v60 = vmax.f32 %v258_v51, 0.0  ;;  %v323_v61 = vmax.f32 %v259_v52, 0.0  ;;  %382 = vst [vmem:[%s1026_s3 + $0x110] sm:$0xff] %v318_v55  ;;  %383 = vst [vmem:[%s1026_s3 + $0x118] sm:$0xff] %v319_v56  ;;  %v504_v0 = vunpack.c.l.bf16 %v566_v53  ;;  %v505_v2 = vunpack.c.h.bf16 %v566_v53 }
  0x2b   :  { %384 = vst [vmem:[%s1026_s3 + $0x120] sm:$0xff] %v320_v57  ;;  %385 = vst [vmem:[%s1026_s3 + $0x128] sm:$0xff] %v321_v58  ;;  %v508_v3 = vunpack.c.l.bf16 %v567_v54  ;;  %v509_v4 = vunpack.c.h.bf16 %v567_v54  ;;  %v189_v5 = vmul.f32 %v500_v62, %v603_v1  ;;  %v190_v6 = vmul.f32 %v501_v63, %v603_v1  ;;  %v573_v58 = vld [vmem:[%s1023_s0 + $0xe0] sm:$0xff]   ;;  %v574_v63 = vld [vmem:[%s1023_s0 + $0xe8] sm:$0xff]  }
  0x2c   :  { %386 = vst [vmem:[%s1026_s3 + $0x130] sm:$0xff] %v322_v60  ;;  %387 = vst [vmem:[%s1026_s3 + $0x138] sm:$0xff] %v323_v61  ;;  %v512_v8 = vunpack.c.l.bf16 %v568_v59  ;;  %v513_v9 = vunpack.c.h.bf16 %v568_v59  ;;  %v191_v10 = vmul.f32 %v504_v0, %v603_v1  ;;  %v192_v11 = vmul.f32 %v505_v2, %v603_v1  ;;  %v575_v0 = vld [vmem:[%s1023_s0 + $0xf0] sm:$0xff]  }
  0x2d   :  { %v193_v12 = vmul.f32 %v508_v3, %v603_v1  ;;  %v194_v13 = vmul.f32 %v509_v4, %v603_v1  ;;  %v260_v14 = vadd.f32 %v617_v7, %v189_v5  ;;  %v261_v15 = vadd.f32 %v617_v7, %v190_v6  ;;  %v576_v6 = vld [vmem:[%s1023_s0 + $0xf8] sm:$0xff]  }
  0x2e   :  { %v195_v16 = vmul.f32 %v512_v8, %v603_v1  ;;  %v196_v17 = vmul.f32 %v513_v9, %v603_v1  ;;  %v262_v18 = vadd.f32 %v617_v7, %v191_v10  ;;  %v263_v19 = vadd.f32 %v617_v7, %v192_v11 }
  0x2f   :  { %v264_v20 = vadd.f32 %v617_v7, %v193_v12  ;;  %v265_v21 = vadd.f32 %v617_v7, %v194_v13  ;;  %v324_v23 = vmax.f32 %v260_v14, 0.0  ;;  %v325_v24 = vmax.f32 %v261_v15, 0.0 }
  0x30   :  { %v266_v25 = vadd.f32 %v617_v7, %v195_v16  ;;  %v267_v26 = vadd.f32 %v617_v7, %v196_v17  ;;  %v326_v29 = vmax.f32 %v262_v18, 0.0  ;;  %v327_v30 = vmax.f32 %v263_v19, 0.0 }
  0x31   :  { %v328_v31 = vmax.f32 %v264_v20, 0.0  ;;  %v329_v32 = vmax.f32 %v265_v21, 0.0  ;;  %388 = vst [vmem:[%s1026_s3 + $0x140] sm:$0xff] %v324_v23  ;;  %389 = vst [vmem:[%s1026_s3 + $0x148] sm:$0xff] %v325_v24  ;;  %v516_v36 = vunpack.c.l.bf16 %v569_v22  ;;  %v517_v37 = vunpack.c.h.bf16 %v569_v22 }
  0x32   :  { %v330_v34 = vmax.f32 %v266_v25, 0.0  ;;  %v331_v35 = vmax.f32 %v267_v26, 0.0  ;;  %390 = vst [vmem:[%s1026_s3 + $0x150] sm:$0xff] %v326_v29  ;;  %391 = vst [vmem:[%s1026_s3 + $0x158] sm:$0xff] %v327_v30  ;;  %v520_v38 = vunpack.c.l.bf16 %v570_v27  ;;  %v521_v39 = vunpack.c.h.bf16 %v570_v27 }
  0x33   :  { %392 = vst [vmem:[%s1026_s3 + $0x160] sm:$0xff] %v328_v31  ;;  %393 = vst [vmem:[%s1026_s3 + $0x168] sm:$0xff] %v329_v32  ;;  %v524_v40 = vunpack.c.l.bf16 %v571_v28  ;;  %v525_v41 = vunpack.c.h.bf16 %v571_v28  ;;  %v197_v42 = vmul.f32 %v516_v36, %v603_v1  ;;  %v198_v43 = vmul.f32 %v517_v37, %v603_v1 }
  0x34   :  { %394 = vst [vmem:[%s1026_s3 + $0x170] sm:$0xff] %v330_v34  ;;  %395 = vst [vmem:[%s1026_s3 + $0x178] sm:$0xff] %v331_v35  ;;  %v528_v44 = vunpack.c.l.bf16 %v572_v33  ;;  %v529_v45 = vunpack.c.h.bf16 %v572_v33  ;;  %v199_v46 = vmul.f32 %v520_v38, %v603_v1  ;;  %v200_v47 = vmul.f32 %v521_v39, %v603_v1 }
  0x35   :  { %v201_v48 = vmul.f32 %v524_v40, %v603_v1  ;;  %v202_v49 = vmul.f32 %v525_v41, %v603_v1  ;;  %v268_v50 = vadd.f32 %v617_v7, %v197_v42  ;;  %v269_v51 = vadd.f32 %v617_v7, %v198_v43 }
  0x36   :  { %v203_v52 = vmul.f32 %v528_v44, %v603_v1  ;;  %v204_v53 = vmul.f32 %v529_v45, %v603_v1  ;;  %v270_v54 = vadd.f32 %v617_v7, %v199_v46  ;;  %v271_v55 = vadd.f32 %v617_v7, %v200_v47 }
  0x37   :  { %v272_v56 = vadd.f32 %v617_v7, %v201_v48  ;;  %v273_v57 = vadd.f32 %v617_v7, %v202_v49  ;;  %v332_v59 = vmax.f32 %v268_v50, 0.0  ;;  %v333_v60 = vmax.f32 %v269_v51, 0.0 }
  0x38   :  { %v274_v61 = vadd.f32 %v617_v7, %v203_v52  ;;  %v275_v62 = vadd.f32 %v617_v7, %v204_v53  ;;  %v334_v2 = vmax.f32 %v270_v54, 0.0  ;;  %v335_v3 = vmax.f32 %v271_v55, 0.0 }
  0x39   :  { %v336_v4 = vmax.f32 %v272_v56, 0.0  ;;  %v337_v5 = vmax.f32 %v273_v57, 0.0  ;;  %396 = vst [vmem:[%s1026_s3 + $0x180] sm:$0xff] %v332_v59  ;;  %397 = vst [vmem:[%s1026_s3 + $0x188] sm:$0xff] %v333_v60  ;;  %v532_v10 = vunpack.c.l.bf16 %v573_v58  ;;  %v533_v11 = vunpack.c.h.bf16 %v573_v58 }
  0x3a   :  { %v338_v8 = vmax.f32 %v274_v61, 0.0  ;;  %v339_v9 = vmax.f32 %v275_v62, 0.0  ;;  %398 = vst [vmem:[%s1026_s3 + $0x190] sm:$0xff] %v334_v2  ;;  %399 = vst [vmem:[%s1026_s3 + $0x198] sm:$0xff] %v335_v3  ;;  %v536_v12 = vunpack.c.l.bf16 %v574_v63  ;;  %v537_v13 = vunpack.c.h.bf16 %v574_v63 }
  0x3b   :  { %400 = vst [vmem:[%s1026_s3 + $0x1a0] sm:$0xff] %v336_v4  ;;  %401 = vst [vmem:[%s1026_s3 + $0x1a8] sm:$0xff] %v337_v5  ;;  %v540_v14 = vunpack.c.l.bf16 %v575_v0  ;;  %v541_v15 = vunpack.c.h.bf16 %v575_v0  ;;  %v205_v16 = vmul.f32 %v532_v10, %v603_v1  ;;  %v206_v17 = vmul.f32 %v533_v11, %v603_v1 }
  0x3c   :  { %402 = vst [vmem:[%s1026_s3 + $0x1b0] sm:$0xff] %v338_v8  ;;  %403 = vst [vmem:[%s1026_s3 + $0x1b8] sm:$0xff] %v339_v9  ;;  %v544_v18 = vunpack.c.l.bf16 %v576_v6  ;;  %v545_v19 = vunpack.c.h.bf16 %v576_v6  ;;  %v207_v20 = vmul.f32 %v536_v12, %v603_v1  ;;  %v208_v21 = vmul.f32 %v537_v13, %v603_v1 }
  0x3d   :  { %v209_v22 = vmul.f32 %v540_v14, %v603_v1  ;;  %v210_v23 = vmul.f32 %v541_v15, %v603_v1  ;;  %v276_v24 = vadd.f32 %v617_v7, %v205_v16  ;;  %v277_v25 = vadd.f32 %v617_v7, %v206_v17 }
  0x3e   :  { %v211_v26 = vmul.f32 %v544_v18, %v603_v1  ;;  %v212_v27 = vmul.f32 %v545_v19, %v603_v1  ;;  %v278_v28 = vadd.f32 %v617_v7, %v207_v20  ;;  %v279_v29 = vadd.f32 %v617_v7, %v208_v21 }
  0x3f   :  { %v280_v30 = vadd.f32 %v617_v7, %v209_v22  ;;  %v281_v31 = vadd.f32 %v617_v7, %v210_v23  ;;  %v340_v32 = vmax.f32 %v276_v24, 0.0  ;;  %v341_v33 = vmax.f32 %v277_v25, 0.0 }
  0x40   :  { %v282_v34 = vadd.f32 %v617_v7, %v211_v26  ;;  %v283_v35 = vadd.f32 %v617_v7, %v212_v27  ;;  %v342_v36 = vmax.f32 %v278_v28, 0.0  ;;  %v343_v37 = vmax.f32 %v279_v29, 0.0 }
  0x41   :  { %v344_v38 = vmax.f32 %v280_v30, 0.0  ;;  %v345_v39 = vmax.f32 %v281_v31, 0.0  ;;  %404 = vst [vmem:[%s1026_s3 + $0x1c0] sm:$0xff] %v340_v32  ;;  %405 = vst [vmem:[%s1026_s3 + $0x1c8] sm:$0xff] %v341_v33 }
  0x42   :  { %v346_v1 = vmax.f32 %v282_v34, 0.0  ;;  %v347_v40 = vmax.f32 %v283_v35, 0.0  ;;  %406 = vst [vmem:[%s1026_s3 + $0x1d0] sm:$0xff] %v342_v36  ;;  %407 = vst [vmem:[%s1026_s3 + $0x1d8] sm:$0xff] %v343_v37 }
  0x43   :  { %408 = vst [vmem:[%s1026_s3 + $0x1e0] sm:$0xff] %v344_v38  ;;  %409 = vst [vmem:[%s1026_s3 + $0x1e8] sm:$0xff] %v345_v39 }
  0x44   :  { %410 = vst [vmem:[%s1026_s3 + $0x1f0] sm:$0xff] %v346_v1  ;;  %411 = vst [vmem:[%s1026_s3 + $0x1f8] sm:$0xff] %v347_v40 }

// kernel: up_forward.8
= control target key start
LH: loop header
LB: loop body
LE: loop exit
PB: predicated region body
PF: predicated region fallthrough
CT: control target
= control target key end

     0   :  { %s4022_s15 = smov 0   ;;  %s4024_s16 = smov 0   ;;  %s5047_s0 = inlined_call_operand.vmem [shape: bf16[512,1536], index: 0, kind: input, shape index: {}]   ;;  %s5048_s1 = inlined_call_operand.vmem [shape: bf16[1536,128], index: 1, kind: input, shape index: {}]   ;;  %s5049_s2 = inlined_call_operand.vmem [shape: bf16[512,128], index: 2, kind: output, shape index: {0}]   ;;  %s5050_s3 = inlined_call_operand.vmem [shape: f32[1,1,128], index: 3, kind: output, shape index: {1}]   ;;  %s5051_s4 = inlined_call_operand.vmem [shape: f32[1,1,128], index: 4, kind: output, shape index: {2}]  }
   0x1   :  { %s4026_s17 = smov 0   ;;  %s4028_s18 = smov 0  }
   0x2   :  { %s4030_s19 = smov 0  }
   0x3 LB: > { %s27_s20 = sadd.s32 1, %s3989_s18  ;;  %p50_p1 = scmp.ne.s32.totalorder %s3981_s16, %s3977_s15  ;;  %s3993_s19 = sphi %s4030_s19, %s15_s19   ;;  %s3989_s18 = sphi %s4028_s18, %s5055_s18   ;;  %s3985_s17 = sphi %s4026_s17, %s5054_s17   ;;  %s3981_s16 = sphi %s4024_s16, %s5053_s16   ;;  %s3977_s15 = sphi %s4022_s15, %s5052_s15  }
   0x4   : > { %p28_p0 = scmp.ge.s32.totalorder %s27_s20, 3  ;;  %p51_p2 = scmp.eq.s32.totalorder %s3993_s19, 0 }
   0x5   : > { %s43_s22 = sadd.s32 1, %s3981_s16  ;;  %p3193_p5 = scmp.ge.s32.totalorder %s3993_s19, 3 }
   0x6   : > { %s5057_s20 = smov (%p28_p0, %s27_s20), 0  ;;  %p52_p3 = por %p51_p2, %p50_p1 }
   0x7   : > { %s39_s21 = ssub.s32 %s3989_s18, %s5057_s20  ;;  %188 = sbr.rel (%p3193_p5) target bundleno = 82 (0x52), region = 16 }
   0x8   : > { %p41_p4 = scmp.eq.s32.totalorder %s39_s21, 0 }
   0xa   : > { %s4057_s23 = scalar_select %p41_p4, %s3981_s16, %s43_s22  }
   0xe   : > { %191 = sbr.rel (!%p52_p3) target bundleno = 82 (0x52), region = 20  ;;  %s193_s24 = sand.u32 (%p52_p3), 1, %s3981_s16  }
   0xf   : > { %s3433_s25 = sshll.u32 (%p52_p3), %s3989_s18, 4  ;;  %s3194_s26 = sshll.u32 (%p52_p3), %s193_s24, 10 }
  0x10   : > { %s4065_s29 = scalar_lea.vmem (%p52_p3), %s5047_s0, %s3433_s25  ;;  %s4070_s30 = scalar_lea.vmem (%p52_p3), [#allocation3], %s3194_s26 }
  0x11   : > { %v214_v0 = vld [vmem:[%s4065_s29] sm:$0xff] (%p52_p3)  ;;  %v216_v1 = vld [vmem:[%s4065_s29 + $0x8] sm:$0xff] (%p52_p3)  ;;  %v218_v2 = vld [vmem:[%s4065_s29 + $0x30] sm:$0xff] (%p52_p3) }
  0x12   : > { %215 = vst [vmem:[%s4070_s30] sm:$0xff] (%p52_p3), %v214_v0  ;;  %217 = vst [vmem:[%s4070_s30 + $0x8] sm:$0xff] (%p52_p3), %v216_v1  ;;  %v220_v3 = vld [vmem:[%s4065_s29 + $0x38] sm:$0xff] (%p52_p3)  ;;  %v222_v4 = vld [vmem:[%s4065_s29 + $0x60] sm:$0xff] (%p52_p3) }
  0x13   : > { %219 = vst [vmem:[%s4070_s30 + $0x10] sm:$0xff] (%p52_p3), %v218_v2  ;;  %v224_v5 = vld [vmem:[%s4065_s29 + $0x68] sm:$0xff] (%p52_p3)  ;;  %221 = vst [vmem:[%s4070_s30 + $0x18] sm:$0xff] (%p52_p3), %v220_v3  ;;  %v226_v6 = vld [vmem:[%s4065_s29 + $0x90] sm:$0xff] (%p52_p3) }
  0x14   : > { %223 = vst [vmem:[%s4070_s30 + $0x20] sm:$0xff] (%p52_p3), %v222_v4  ;;  %225 = vst [vmem:[%s4070_s30 + $0x28] sm:$0xff] (%p52_p3), %v224_v5  ;;  %v228_v7 = vld [vmem:[%s4065_s29 + $0x98] sm:$0xff] (%p52_p3)  ;;  %v230_v8 = vld [vmem:[%s4065_s29 + $0xc0] sm:$0xff] (%p52_p3) }
  0x15   : > { %227 = vst [vmem:[%s4070_s30 + $0x30] sm:$0xff] %v226_v6  ;;  %229 = vst [vmem:[%s4070_s30 + $0x38] sm:$0xff] %v228_v7  ;;  %v232_v9 = vld [vmem:[%s4065_s29 + $0xc8] sm:$0xff]  ;;  %v234_v10 = vld [vmem:[%s4065_s29 + $0xf0] sm:$0xff] }
  0x16   : > { %231 = vst [vmem:[%s4070_s30 + $0x40] sm:$0xff] %v230_v8  ;;  %v236_v11 = vld [vmem:[%s4065_s29 + $0xf8] sm:$0xff]  ;;  %233 = vst [vmem:[%s4070_s30 + $0x48] sm:$0xff] %v232_v9  ;;  %v238_v12 = vld [vmem:[%s4065_s29 + $0x120] sm:$0xff] }
  0x17   : > { %235 = vst [vmem:[%s4070_s30 + $0x50] sm:$0xff] %v234_v10  ;;  %237 = vst [vmem:[%s4070_s30 + $0x58] sm:$0xff] %v236_v11  ;;  %v240_v13 = vld [vmem:[%s4065_s29 + $0x128] sm:$0xff]  ;;  %v242_v14 = vld [vmem:[%s4065_s29 + $0x150] sm:$0xff] }
  0x18   : > { %239 = vst [vmem:[%s4070_s30 + $0x60] sm:$0xff] %v238_v12  ;;  %241 = vst [vmem:[%s4070_s30 + $0x68] sm:$0xff] %v240_v13  ;;  %v244_v15 = vld [vmem:[%s4065_s29 + $0x158] sm:$0xff]  ;;  %v246_v16 = vld [vmem:[%s4065_s29 + $0x180] sm:$0xff] }
  0x19   : > { %243 = vst [vmem:[%s4070_s30 + $0x70] sm:$0xff] %v242_v14  ;;  %v248_v17 = vld [vmem:[%s4065_s29 + $0x188] sm:$0xff]  ;;  %245 = vst [vmem:[%s4070_s30 + $0x78] sm:$0xff] %v244_v15  ;;  %v250_v18 = vld [vmem:[%s4065_s29 + $0x1b0] sm:$0xff] }
  0x1a   : > { %247 = vst [vmem:[%s4070_s30 + $0x80] sm:$0xff] %v246_v16  ;;  %249 = vst [vmem:[%s4070_s30 + $0x88] sm:$0xff] %v248_v17  ;;  %v252_v19 = vld [vmem:[%s4065_s29 + $0x1b8] sm:$0xff]  ;;  %v254_v20 = vld [vmem:[%s4065_s29 + $0x1e0] sm:$0xff] }
  0x1b   : > { %251 = vst [vmem:[%s4070_s30 + $0x90] sm:$0xff] %v250_v18  ;;  %253 = vst [vmem:[%s4070_s30 + $0x98] sm:$0xff] %v252_v19  ;;  %v256_v21 = vld [vmem:[%s4065_s29 + $0x1e8] sm:$0xff]  ;;  %v258_v22 = vld [vmem:[%s4065_s29 + $0x210] sm:$0xff] }
  0x1c   : > { %255 = vst [vmem:[%s4070_s30 + $0xa0] sm:$0xff] %v254_v20  ;;  %v260_v23 = vld [vmem:[%s4065_s29 + $0x218] sm:$0xff]  ;;  %257 = vst [vmem:[%s4070_s30 + $0xa8] sm:$0xff] %v256_v21  ;;  %v262_v24 = vld [vmem:[%s4065_s29 + $0x240] sm:$0xff] }
  0x1d   : > { %259 = vst [vmem:[%s4070_s30 + $0xb0] sm:$0xff] %v258_v22  ;;  %261 = vst [vmem:[%s4070_s30 + $0xb8] sm:$0xff] %v260_v23  ;;  %v264_v25 = vld [vmem:[%s4065_s29 + $0x248] sm:$0xff]  ;;  %v266_v26 = vld [vmem:[%s4065_s29 + $0x270] sm:$0xff] }
  0x1e   : > { %263 = vst [vmem:[%s4070_s30 + $0xc0] sm:$0xff] %v262_v24  ;;  %265 = vst [vmem:[%s4070_s30 + $0xc8] sm:$0xff] %v264_v25  ;;  %v268_v27 = vld [vmem:[%s4065_s29 + $0x278] sm:$0xff]  ;;  %v270_v28 = vld [vmem:[%s4065_s29 + $0x2a0] sm:$0xff] }
  0x1f   : > { %267 = vst [vmem:[%s4070_s30 + $0xd0] sm:$0xff] %v266_v26  ;;  %v272_v29 = vld [vmem:[%s4065_s29 + $0x2a8] sm:$0xff]  ;;  %269 = vst [vmem:[%s4070_s30 + $0xd8] sm:$0xff] %v268_v27  ;;  %v274_v30 = vld [vmem:[%s4065_s29 + $0x2d0] sm:$0xff] }
  0x20   : > { %271 = vst [vmem:[%s4070_s30 + $0xe0] sm:$0xff] %v270_v28  ;;  %273 = vst [vmem:[%s4070_s30 + $0xe8] sm:$0xff] %v272_v29  ;;  %v276_v31 = vld [vmem:[%s4065_s29 + $0x2d8] sm:$0xff]  ;;  %v278_v32 = vld [vmem:[%s4065_s29 + $0x300] sm:$0xff] }
  0x21   : > { %275 = vst [vmem:[%s4070_s30 + $0xf0] sm:$0xff] %v274_v30  ;;  %277 = vst [vmem:[%s4070_s30 + $0xf8] sm:$0xff] %v276_v31  ;;  %v280_v33 = vld [vmem:[%s4065_s29 + $0x308] sm:$0xff]  ;;  %v282_v34 = vld [vmem:[%s4065_s29 + $0x330] sm:$0xff] }
  0x22   : > { %279 = vst [vmem:[%s4070_s30 + $0x100] sm:$0xff] %v278_v32  ;;  %v284_v35 = vld [vmem:[%s4065_s29 + $0x338] sm:$0xff]  ;;  %281 = vst [vmem:[%s4070_s30 + $0x108] sm:$0xff] %v280_v33  ;;  %v286_v36 = vld [vmem:[%s4065_s29 + $0x360] sm:$0xff] }
  0x23   : > { %283 = vst [vmem:[%s4070_s30 + $0x110] sm:$0xff] %v282_v34  ;;  %285 = vst [vmem:[%s4070_s30 + $0x118] sm:$0xff] %v284_v35  ;;  %v288_v37 = vld [vmem:[%s4065_s29 + $0x368] sm:$0xff]  ;;  %v290_v38 = vld [vmem:[%s4065_s29 + $0x390] sm:$0xff] }
  0x24   : > { %287 = vst [vmem:[%s4070_s30 + $0x120] sm:$0xff] %v286_v36  ;;  %289 = vst [vmem:[%s4070_s30 + $0x128] sm:$0xff] %v288_v37  ;;  %v292_v39 = vld [vmem:[%s4065_s29 + $0x398] sm:$0xff]  ;;  %v294_v40 = vld [vmem:[%s4065_s29 + $0x3c0] sm:$0xff] }
  0x25   : > { %291 = vst [vmem:[%s4070_s30 + $0x130] sm:$0xff] %v290_v38  ;;  %v296_v41 = vld [vmem:[%s4065_s29 + $0x3c8] sm:$0xff]  ;;  %293 = vst [vmem:[%s4070_s30 + $0x138] sm:$0xff] %v292_v39  ;;  %v298_v42 = vld [vmem:[%s4065_s29 + $0x3f0] sm:$0xff] }
  0x26   : > { %295 = vst [vmem:[%s4070_s30 + $0x140] sm:$0xff] %v294_v40  ;;  %297 = vst [vmem:[%s4070_s30 + $0x148] sm:$0xff] %v296_v41  ;;  %v300_v43 = vld [vmem:[%s4065_s29 + $0x3f8] sm:$0xff]  ;;  %v302_v44 = vld [vmem:[%s4065_s29 + $0x420] sm:$0xff] }
  0x27   : > { %299 = vst [vmem:[%s4070_s30 + $0x150] sm:$0xff] %v298_v42  ;;  %301 = vst [vmem:[%s4070_s30 + $0x158] sm:$0xff] %v300_v43  ;;  %v304_v45 = vld [vmem:[%s4065_s29 + $0x428] sm:$0xff]  ;;  %v306_v46 = vld [vmem:[%s4065_s29 + $0x450] sm:$0xff] }
  0x28   : > { %303 = vst [vmem:[%s4070_s30 + $0x160] sm:$0xff] %v302_v44  ;;  %v308_v47 = vld [vmem:[%s4065_s29 + $0x458] sm:$0xff]  ;;  %305 = vst [vmem:[%s4070_s30 + $0x168] sm:$0xff] %v304_v45  ;;  %v310_v48 = vld [vmem:[%s4065_s29 + $0x480] sm:$0xff] }
  0x29   : > { %307 = vst [vmem:[%s4070_s30 + $0x170] sm:$0xff] %v306_v46  ;;  %309 = vst [vmem:[%s4070_s30 + $0x178] sm:$0xff] %v308_v47  ;;  %v312_v49 = vld [vmem:[%s4065_s29 + $0x488] sm:$0xff]  ;;  %v314_v50 = vld [vmem:[%s4065_s29 + $0x4b0] sm:$0xff] }
  0x2a   : > { %311 = vst [vmem:[%s4070_s30 + $0x180] sm:$0xff] %v310_v48  ;;  %313 = vst [vmem:[%s4070_s30 + $0x188] sm:$0xff] %v312_v49  ;;  %v316_v51 = vld [vmem:[%s4065_s29 + $0x4b8] sm:$0xff]  ;;  %v318_v52 = vld [vmem:[%s4065_s29 + $0x4e0] sm:$0xff] }
  0x2b   : > { %315 = vst [vmem:[%s4070_s30 + $0x190] sm:$0xff] %v314_v50  ;;  %v320_v53 = vld [vmem:[%s4065_s29 + $0x4e8] sm:$0xff]  ;;  %317 = vst [vmem:[%s4070_s30 + $0x198] sm:$0xff] %v316_v51  ;;  %v322_v54 = vld [vmem:[%s4065_s29 + $0x510] sm:$0xff] }
  0x2c   : > { %319 = vst [vmem:[%s4070_s30 + $0x1a0] sm:$0xff] %v318_v52  ;;  %321 = vst [vmem:[%s4070_s30 + $0x1a8] sm:$0xff] %v320_v53  ;;  %v324_v55 = vld [vmem:[%s4065_s29 + $0x518] sm:$0xff]  ;;  %v326_v56 = vld [vmem:[%s4065_s29 + $0x540] sm:$0xff] }
  0x2d   : > { %323 = vst [vmem:[%s4070_s30 + $0x1b0] sm:$0xff] %v322_v54  ;;  %325 = vst [vmem:[%s4070_s30 + $0x1b8] sm:$0xff] %v324_v55  ;;  %v328_v57 = vld [vmem:[%s4065_s29 + $0x548] sm:$0xff]  ;;  %v330_v58 = vld [vmem:[%s4065_s29 + $0x570] sm:$0xff] }
  0x2e   : > { %327 = vst [vmem:[%s4070_s30 + $0x1c0] sm:$0xff] %v326_v56  ;;  %v332_v59 = vld [vmem:[%s4065_s29 + $0x578] sm:$0xff]  ;;  %329 = vst [vmem:[%s4070_s30 + $0x1c8] sm:$0xff] %v328_v57  ;;  %v334_v60 = vld [vmem:[%s4065_s29 + $0x5a0] sm:$0xff] }
  0x2f   : > { %331 = vst [vmem:[%s4070_s30 + $0x1d0] sm:$0xff] %v330_v58  ;;  %333 = vst [vmem:[%s4070_s30 + $0x1d8] sm:$0xff] %v332_v59  ;;  %v336_v61 = vld [vmem:[%s4065_s29 + $0x5a8] sm:$0xff]  ;;  %v338_v62 = vld [vmem:[%s4065_s29 + $0x5d0] sm:$0xff] }
  0x30   : > { %335 = vst [vmem:[%s4070_s30 + $0x1e0] sm:$0xff] %v334_v60  ;;  %337 = vst [vmem:[%s4070_s30 + $0x1e8] sm:$0xff] %v336_v61  ;;  %v340_v63 = vld [vmem:[%s4065_s29 + $0x5d8] sm:$0xff]  ;;  %v342_v0 = vld [vmem:[%s4065_s29 + $0x600] sm:$0xff] }
  0x31   : > { %339 = vst [vmem:[%s4070_s30 + $0x1f0] sm:$0xff] %v338_v62  ;;  %v344_v1 = vld [vmem:[%s4065_s29 + $0x608] sm:$0xff]  ;;  %341 = vst [vmem:[%s4070_s30 + $0x1f8] sm:$0xff] %v340_v63  ;;  %v346_v2 = vld [vmem:[%s4065_s29 + $0x630] sm:$0xff] }
  0x32   : > { %343 = vst [vmem:[%s4070_s30 + $0x200] sm:$0xff] %v342_v0  ;;  %345 = vst [vmem:[%s4070_s30 + $0x208] sm:$0xff] %v344_v1  ;;  %v348_v3 = vld [vmem:[%s4065_s29 + $0x638] sm:$0xff]  ;;  %v350_v4 = vld [vmem:[%s4065_s29 + $0x660] sm:$0xff] }
  0x33   : > { %347 = vst [vmem:[%s4070_s30 + $0x210] sm:$0xff] %v346_v2  ;;  %349 = vst [vmem:[%s4070_s30 + $0x218] sm:$0xff] %v348_v3  ;;  %v352_v5 = vld [vmem:[%s4065_s29 + $0x668] sm:$0xff]  ;;  %v354_v6 = vld [vmem:[%s4065_s29 + $0x690] sm:$0xff] }
  0x34   : > { %351 = vst [vmem:[%s4070_s30 + $0x220] sm:$0xff] %v350_v4  ;;  %v356_v7 = vld [vmem:[%s4065_s29 + $0x698] sm:$0xff]  ;;  %353 = vst [vmem:[%s4070_s30 + $0x228] sm:$0xff] %v352_v5  ;;  %v358_v8 = vld [vmem:[%s4065_s29 + $0x6c0] sm:$0xff] }
  0x35   : > { %355 = vst [vmem:[%s4070_s30 + $0x230] sm:$0xff] %v354_v6  ;;  %357 = vst [vmem:[%s4070_s30 + $0x238] sm:$0xff] %v356_v7  ;;  %v360_v9 = vld [vmem:[%s4065_s29 + $0x6c8] sm:$0xff]  ;;  %v362_v10 = vld [vmem:[%s4065_s29 + $0x6f0] sm:$0xff] }
  0x36   : > { %359 = vst [vmem:[%s4070_s30 + $0x240] sm:$0xff] %v358_v8  ;;  %361 = vst [vmem:[%s4070_s30 + $0x248] sm:$0xff] %v360_v9  ;;  %v364_v11 = vld [vmem:[%s4065_s29 + $0x6f8] sm:$0xff]  ;;  %v366_v12 = vld [vmem:[%s4065_s29 + $0x720] sm:$0xff] }
  0x37   : > { %363 = vst [vmem:[%s4070_s30 + $0x250] sm:$0xff] %v362_v10  ;;  %v368_v13 = vld [vmem:[%s4065_s29 + $0x728] sm:$0xff]  ;;  %365 = vst [vmem:[%s4070_s30 + $0x258] sm:$0xff] %v364_v11  ;;  %v370_v14 = vld [vmem:[%s4065_s29 + $0x750] sm:$0xff] }
  0x38   : > { %367 = vst [vmem:[%s4070_s30 + $0x260] sm:$0xff] %v366_v12  ;;  %369 = vst [vmem:[%s4070_s30 + $0x268] sm:$0xff] %v368_v13  ;;  %v372_v15 = vld [vmem:[%s4065_s29 + $0x758] sm:$0xff]  ;;  %v374_v16 = vld [vmem:[%s4065_s29 + $0x780] sm:$0xff] }
  0x39   : > { %371 = vst [vmem:[%s4070_s30 + $0x270] sm:$0xff] %v370_v14  ;;  %373 = vst [vmem:[%s4070_s30 + $0x278] sm:$0xff] %v372_v15  ;;  %v376_v17 = vld [vmem:[%s4065_s29 + $0x788] sm:$0xff]  ;;  %v378_v18 = vld [vmem:[%s4065_s29 + $0x7b0] sm:$0xff] }
  0x3a   : > { %375 = vst [vmem:[%s4070_s30 + $0x280] sm:$0xff] %v374_v16  ;;  %v380_v19 = vld [vmem:[%s4065_s29 + $0x7b8] sm:$0xff]  ;;  %377 = vst [vmem:[%s4070_s30 + $0x288] sm:$0xff] %v376_v17  ;;  %v382_v20 = vld [vmem:[%s4065_s29 + $0x7e0] sm:$0xff] }
  0x3b   : > { %379 = vst [vmem:[%s4070_s30 + $0x290] sm:$0xff] %v378_v18  ;;  %381 = vst [vmem:[%s4070_s30 + $0x298] sm:$0xff] %v380_v19  ;;  %v384_v21 = vld [vmem:[%s4065_s29 + $0x7e8] sm:$0xff]  ;;  %v386_v22 = vld [vmem:[%s4065_s29 + $0x810] sm:$0xff] }
  0x3c   : > { %383 = vst [vmem:[%s4070_s30 + $0x2a0] sm:$0xff] %v382_v20  ;;  %385 = vst [vmem:[%s4070_s30 + $0x2a8] sm:$0xff] %v384_v21  ;;  %v388_v23 = vld [vmem:[%s4065_s29 + $0x818] sm:$0xff]  ;;  %v390_v24 = vld [vmem:[%s4065_s29 + $0x840] sm:$0xff] }
  0x3d   : > { %387 = vst [vmem:[%s4070_s30 + $0x2b0] sm:$0xff] %v386_v22  ;;  %v392_v25 = vld [vmem:[%s4065_s29 + $0x848] sm:$0xff]  ;;  %389 = vst [vmem:[%s4070_s30 + $0x2b8] sm:$0xff] %v388_v23  ;;  %v394_v26 = vld [vmem:[%s4065_s29 + $0x870] sm:$0xff] }
  0x3e   : > { %391 = vst [vmem:[%s4070_s30 + $0x2c0] sm:$0xff] %v390_v24  ;;  %393 = vst [vmem:[%s4070_s30 + $0x2c8] sm:$0xff] %v392_v25  ;;  %v396_v27 = vld [vmem:[%s4065_s29 + $0x878] sm:$0xff]  ;;  %v398_v28 = vld [vmem:[%s4065_s29 + $0x8a0] sm:$0xff] }
  0x3f   : > { %395 = vst [vmem:[%s4070_s30 + $0x2d0] sm:$0xff] %v394_v26  ;;  %397 = vst [vmem:[%s4070_s30 + $0x2d8] sm:$0xff] %v396_v27  ;;  %v400_v29 = vld [vmem:[%s4065_s29 + $0x8a8] sm:$0xff]  ;;  %v402_v30 = vld [vmem:[%s4065_s29 + $0x8d0] sm:$0xff] }
  0x40   : > { %399 = vst [vmem:[%s4070_s30 + $0x2e0] sm:$0xff] %v398_v28  ;;  %v404_v31 = vld [vmem:[%s4065_s29 + $0x8d8] sm:$0xff]  ;;  %401 = vst [vmem:[%s4070_s30 + $0x2e8] sm:$0xff] %v400_v29  ;;  %v406_v32 = vld [vmem:[%s4065_s29 + $0x900] sm:$0xff] }
  0x41   : > { %403 = vst [vmem:[%s4070_s30 + $0x2f0] sm:$0xff] %v402_v30  ;;  %405 = vst [vmem:[%s4070_s30 + $0x2f8] sm:$0xff] %v404_v31  ;;  %v408_v33 = vld [vmem:[%s4065_s29 + $0x908] sm:$0xff]  ;;  %v410_v34 = vld [vmem:[%s4065_s29 + $0x930] sm:$0xff] }
  0x42   : > { %407 = vst [vmem:[%s4070_s30 + $0x300] sm:$0xff] %v406_v32  ;;  %409 = vst [vmem:[%s4070_s30 + $0x308] sm:$0xff] %v408_v33  ;;  %v412_v35 = vld [vmem:[%s4065_s29 + $0x938] sm:$0xff]  ;;  %v414_v36 = vld [vmem:[%s4065_s29 + $0x960] sm:$0xff] }
  0x43   : > { %411 = vst [vmem:[%s4070_s30 + $0x310] sm:$0xff] %v410_v34  ;;  %v416_v37 = vld [vmem:[%s4065_s29 + $0x968] sm:$0xff]  ;;  %413 = vst [vmem:[%s4070_s30 + $0x318] sm:$0xff] %v412_v35  ;;  %v418_v38 = vld [vmem:[%s4065_s29 + $0x990] sm:$0xff] }
  0x44   : > { %415 = vst [vmem:[%s4070_s30 + $0x320] sm:$0xff] %v414_v36  ;;  %417 = vst [vmem:[%s4070_s30 + $0x328] sm:$0xff] %v416_v37  ;;  %v420_v39 = vld [vmem:[%s4065_s29 + $0x998] sm:$0xff]  ;;  %v422_v40 = vld [vmem:[%s4065_s29 + $0x9c0] sm:$0xff] }
  0x45   : > { %419 = vst [vmem:[%s4070_s30 + $0x330] sm:$0xff] %v418_v38  ;;  %421 = vst [vmem:[%s4070_s30 + $0x338] sm:$0xff] %v420_v39  ;;  %v424_v41 = vld [vmem:[%s4065_s29 + $0x9c8] sm:$0xff]  ;;  %v426_v42 = vld [vmem:[%s4065_s29 + $0x9f0] sm:$0xff] }
  0x46   : > { %423 = vst [vmem:[%s4070_s30 + $0x340] sm:$0xff] %v422_v40  ;;  %v428_v43 = vld [vmem:[%s4065_s29 + $0x9f8] sm:$0xff]  ;;  %425 = vst [vmem:[%s4070_s30 + $0x348] sm:$0xff] %v424_v41  ;;  %v430_v44 = vld [vmem:[%s4065_s29 + $0xa20] sm:$0xff] }
  0x47   : > { %427 = vst [vmem:[%s4070_s30 + $0x350] sm:$0xff] %v426_v42  ;;  %429 = vst [vmem:[%s4070_s30 + $0x358] sm:$0xff] %v428_v43  ;;  %v432_v45 = vld [vmem:[%s4065_s29 + $0xa28] sm:$0xff]  ;;  %v434_v46 = vld [vmem:[%s4065_s29 + $0xa50] sm:$0xff] }
  0x48   : > { %431 = vst [vmem:[%s4070_s30 + $0x360] sm:$0xff] %v430_v44  ;;  %433 = vst [vmem:[%s4070_s30 + $0x368] sm:$0xff] %v432_v45  ;;  %v436_v47 = vld [vmem:[%s4065_s29 + $0xa58] sm:$0xff]  ;;  %v438_v48 = vld [vmem:[%s4065_s29 + $0xa80] sm:$0xff] }
  0x49   : > { %435 = vst [vmem:[%s4070_s30 + $0x370] sm:$0xff] %v434_v46  ;;  %v440_v49 = vld [vmem:[%s4065_s29 + $0xa88] sm:$0xff]  ;;  %437 = vst [vmem:[%s4070_s30 + $0x378] sm:$0xff] %v436_v47  ;;  %v442_v50 = vld [vmem:[%s4065_s29 + $0xab0] sm:$0xff] }
  0x4a   : > { %439 = vst [vmem:[%s4070_s30 + $0x380] sm:$0xff] %v438_v48  ;;  %441 = vst [vmem:[%s4070_s30 + $0x388] sm:$0xff] %v440_v49  ;;  %v444_v51 = vld [vmem:[%s4065_s29 + $0xab8] sm:$0xff]  ;;  %v446_v52 = vld [vmem:[%s4065_s29 + $0xae0] sm:$0xff] }
  0x4b   : > { %443 = vst [vmem:[%s4070_s30 + $0x390] sm:$0xff] %v442_v50  ;;  %445 = vst [vmem:[%s4070_s30 + $0x398] sm:$0xff] %v444_v51  ;;  %v448_v53 = vld [vmem:[%s4065_s29 + $0xae8] sm:$0xff]  ;;  %v450_v54 = vld [vmem:[%s4065_s29 + $0xb10] sm:$0xff] }
  0x4c   : > { %447 = vst [vmem:[%s4070_s30 + $0x3a0] sm:$0xff] %v446_v52  ;;  %v452_v55 = vld [vmem:[%s4065_s29 + $0xb18] sm:$0xff]  ;;  %449 = vst [vmem:[%s4070_s30 + $0x3a8] sm:$0xff] %v448_v53  ;;  %v454_v56 = vld [vmem:[%s4065_s29 + $0xb40] sm:$0xff] }
  0x4d   : > { %451 = vst [vmem:[%s4070_s30 + $0x3b0] sm:$0xff] %v450_v54  ;;  %453 = vst [vmem:[%s4070_s30 + $0x3b8] sm:$0xff] %v452_v55  ;;  %v456_v57 = vld [vmem:[%s4065_s29 + $0xb48] sm:$0xff]  ;;  %v458_v58 = vld [vmem:[%s4065_s29 + $0xb70] sm:$0xff] }
  0x4e   : > { %455 = vst [vmem:[%s4070_s30 + $0x3c0] sm:$0xff] %v454_v56  ;;  %457 = vst [vmem:[%s4070_s30 + $0x3c8] sm:$0xff] %v456_v57  ;;  %v460_v59 = vld [vmem:[%s4065_s29 + $0xb78] sm:$0xff]  ;;  %v462_v60 = vld [vmem:[%s4065_s29 + $0xba0] sm:$0xff] }
  0x4f   : > { %459 = vst [vmem:[%s4070_s30 + $0x3d0] sm:$0xff] %v458_v58  ;;  %v464_v61 = vld [vmem:[%s4065_s29 + $0xba8] sm:$0xff]  ;;  %461 = vst [vmem:[%s4070_s30 + $0x3d8] sm:$0xff] %v460_v59  ;;  %v466_v62 = vld [vmem:[%s4065_s29 + $0xbd0] sm:$0xff] }
  0x50   : > { %463 = vst [vmem:[%s4070_s30 + $0x3e0] sm:$0xff] %v462_v60  ;;  %465 = vst [vmem:[%s4070_s30 + $0x3e8] sm:$0xff] %v464_v61  ;;  %v468_v63 = vld [vmem:[%s4065_s29 + $0xbd8] sm:$0xff] }
  0x51   : > { %467 = vst [vmem:[%s4070_s30 + $0x3f0] sm:$0xff] %v466_v62  ;;  %469 = vst [vmem:[%s4070_s30 + $0x3f8] sm:$0xff] %v468_v63 }
  0x52 PF: > { %p3197_p6 = scmp.ge.s32.totalorder %s3993_s19, 1  ;;  %p486_p7 = scmp.lt.s32.totalorder %s3993_s19, 4 }
  0x54   : > { %p487_p8 = pnand %p3197_p6, %p486_p7 }
  0x55   : > { %s493_s5 = sand.u32 (!%p487_p8), 1, %s3977_s15   ;;  %s3199_s6 = sshll.u32 (!%p487_p8), %s3985_s17, 6 }
  0x56   : > { %490 = sbr.rel (%p487_p8) target bundleno = 785 (0x311), region = 47  ;;  %s3198_s7 = sshll.u32 (!%p487_p8), %s493_s5, 10 }
  0x57   : > { %p544_p9 = scmp.lt.s32.totalorder (!%p487_p8), %s3199_s6, 191  ;;  %s4334_s12 = scalar_lea.vmem (!%p487_p8), [#allocation3], %s3198_s7 }
  0x58   : > { %p3201_p10 = scmp.ne.s32.totalorder (!%p487_p8), %s3985_s17, 0 }
  0x5d   : > { %s5059_s6 = smov (!%p544_p9, %s3199_s6), 191  ;;  %577 = sbr.rel (%p3201_p10) target bundleno = 127 (0x7f), region = 55 }
  0x5e   : > { %s3200_s8 = sshll.u32 %s5059_s6, 2  ;;  %v3995_v0 = vmov (!%p3201_p10), 0.0  }
  0x5f   : > { %s4332_s11 = scalar_lea.vmem %s5048_s1, %s3200_s8  ;;  %578 = vst [vmem:[#allocation2] sm:$0xff] (!%p3201_p10), %v3995_v0  ;;  %579 = vst [vmem:[#allocation2 + $0x8] sm:$0xff] (!%p3201_p10), %v3995_v0 }
  0x60   : > { %580 = vst [vmem:[#allocation2 + $0x10] sm:$0xff] (!%p3201_p10), %v3995_v0  ;;  %581 = vst [vmem:[#allocation2 + $0x18] sm:$0xff] (!%p3201_p10), %v3995_v0 }
  0x61   : > { %582 = vst [vmem:[#allocation2 + $0x20] sm:$0xff] (!%p3201_p10), %v3995_v0  ;;  %583 = vst [vmem:[#allocation2 + $0x28] sm:$0xff] (!%p3201_p10), %v3995_v0 }
  0x62   : > { %584 = vst [vmem:[#allocation2 + $0x30] sm:$0xff] (!%p3201_p10), %v3995_v0  ;;  %585 = vst [vmem:[#allocation2 + $0x38] sm:$0xff] (!%p3201_p10), %v3995_v0 }
  0x63   : > { %586 = vst [vmem:[#allocation2 + $0x40] sm:$0xff] (!%p3201_p10), %v3995_v0  ;;  %587 = vst [vmem:[#allocation2 + $0x48] sm:$0xff] (!%p3201_p10), %v3995_v0 }
  0x64   : > { %588 = vst [vmem:[#allocation2 + $0x50] sm:$0xff] %v3995_v0  ;;  %589 = vst [vmem:[#allocation2 + $0x58] sm:$0xff] %v3995_v0 }
  0x65   : > { %590 = vst [vmem:[#allocation2 + $0x60] sm:$0xff] %v3995_v0  ;;  %591 = vst [vmem:[#allocation2 + $0x68] sm:$0xff] %v3995_v0 }
  0x66   : > { %592 = vst [vmem:[#allocation2 + $0x70] sm:$0xff] %v3995_v0  ;;  %593 = vst [vmem:[#allocation2 + $0x78] sm:$0xff] %v3995_v0 }
  0x67   : > { %594 = vst [vmem:[#allocation2 + $0x80] sm:$0xff] %v3995_v0  ;;  %595 = vst [vmem:[#allocation2 + $0x88] sm:$0xff] %v3995_v0 }
  0x68   : > { %596 = vst [vmem:[#allocation2 + $0x90] sm:$0xff] %v3995_v0  ;;  %597 = vst [vmem:[#allocation2 + $0x98] sm:$0xff] %v3995_v0 }
  0x69   : > { %598 = vst [vmem:[#allocation2 + $0xa0] sm:$0xff] %v3995_v0  ;;  %599 = vst [vmem:[#allocation2 + $0xa8] sm:$0xff] %v3995_v0 }
  0x6a   : > { %600 = vst [vmem:[#allocation2 + $0xb0] sm:$0xff] %v3995_v0  ;;  %601 = vst [vmem:[#allocation2 + $0xb8] sm:$0xff] %v3995_v0 }
  0x6b   : > { %602 = vst [vmem:[#allocation2 + $0xc0] sm:$0xff] %v3995_v0  ;;  %603 = vst [vmem:[#allocation2 + $0xc8] sm:$0xff] %v3995_v0 }
  0x6c   : > { %604 = vst [vmem:[#allocation2 + $0xd0] sm:$0xff] %v3995_v0  ;;  %605 = vst [vmem:[#allocation2 + $0xd8] sm:$0xff] %v3995_v0 }
  0x6d   : > { %606 = vst [vmem:[#allocation2 + $0xe0] sm:$0xff] %v3995_v0  ;;  %607 = vst [vmem:[#allocation2 + $0xe8] sm:$0xff] %v3995_v0 }
  0x6e   : > { %608 = vst [vmem:[#allocation2 + $0xf0] sm:$0xff] %v3995_v0  ;;  %609 = vst [vmem:[#allocation2 + $0xf8] sm:$0xff] %v3995_v0 }
  0x6f   : > { %610 = vst [vmem:[#allocation2 + $0x100] sm:$0xff] %v3995_v0  ;;  %611 = vst [vmem:[#allocation2 + $0x108] sm:$0xff] %v3995_v0 }
  0x70   : > { %612 = vst [vmem:[#allocation2 + $0x110] sm:$0xff] %v3995_v0  ;;  %613 = vst [vmem:[#allocation2 + $0x118] sm:$0xff] %v3995_v0 }
  0x71   : > { %614 = vst [vmem:[#allocation2 + $0x120] sm:$0xff] %v3995_v0  ;;  %615 = vst [vmem:[#allocation2 + $0x128] sm:$0xff] %v3995_v0 }
  0x72   : > { %616 = vst [vmem:[#allocation2 + $0x130] sm:$0xff] %v3995_v0  ;;  %617 = vst [vmem:[#allocation2 + $0x138] sm:$0xff] %v3995_v0 }
  0x73   : > { %618 = vst [vmem:[#allocation2 + $0x140] sm:$0xff] %v3995_v0  ;;  %619 = vst [vmem:[#allocation2 + $0x148] sm:$0xff] %v3995_v0 }
  0x74   : > { %620 = vst [vmem:[#allocation2 + $0x150] sm:$0xff] %v3995_v0  ;;  %621 = vst [vmem:[#allocation2 + $0x158] sm:$0xff] %v3995_v0 }
  0x75   : > { %622 = vst [vmem:[#allocation2 + $0x160] sm:$0xff] %v3995_v0  ;;  %623 = vst [vmem:[#allocation2 + $0x168] sm:$0xff] %v3995_v0 }
  0x76   : > { %624 = vst [vmem:[#allocation2 + $0x170] sm:$0xff] %v3995_v0  ;;  %625 = vst [vmem:[#allocation2 + $0x178] sm:$0xff] %v3995_v0 }
  0x77   : > { %626 = vst [vmem:[#allocation2 + $0x180] sm:$0xff] %v3995_v0  ;;  %627 = vst [vmem:[#allocation2 + $0x188] sm:$0xff] %v3995_v0 }
  0x78   : > { %628 = vst [vmem:[#allocation2 + $0x190] sm:$0xff] %v3995_v0  ;;  %629 = vst [vmem:[#allocation2 + $0x198] sm:$0xff] %v3995_v0 }
  0x79   : > { %630 = vst [vmem:[#allocation2 + $0x1a0] sm:$0xff] %v3995_v0  ;;  %631 = vst [vmem:[#allocation2 + $0x1a8] sm:$0xff] %v3995_v0 }
  0x7a   : > { %632 = vst [vmem:[#allocation2 + $0x1b0] sm:$0xff] %v3995_v0  ;;  %633 = vst [vmem:[#allocation2 + $0x1b8] sm:$0xff] %v3995_v0 }
  0x7b   : > { %634 = vst [vmem:[#allocation2 + $0x1c0] sm:$0xff] %v3995_v0  ;;  %635 = vst [vmem:[#allocation2 + $0x1c8] sm:$0xff] %v3995_v0 }
  0x7c   : > { %636 = vst [vmem:[#allocation2 + $0x1d0] sm:$0xff] %v3995_v0  ;;  %637 = vst [vmem:[#allocation2 + $0x1d8] sm:$0xff] %v3995_v0 }
  0x7d   : > { %638 = vst [vmem:[#allocation2 + $0x1e0] sm:$0xff] %v3995_v0  ;;  %639 = vst [vmem:[#allocation2 + $0x1e8] sm:$0xff] %v3995_v0 }
  0x7e   : > { %640 = vst [vmem:[#allocation2 + $0x1f0] sm:$0xff] %v3995_v0  ;;  %641 = vst [vmem:[#allocation2 + $0x1f8] sm:$0xff] %v3995_v0 }
  0x7f PF: > { %v3731_v1 = vld [vmem:[%s4332_s11] sm:$0xff]   ;;  %v3996_v2 = vmov 0   ;;  %v3733_v4 = vld [vmem:[%s4332_s11 + $0x8] sm:$0xff]   ;;  %v3735_v6 = vld [vmem:[%s4332_s11 + $0x10] sm:$0xff]   ;;  %p3362_p11 = scmp.ne.s32.totalorder %s3985_s17, 2 }
  0x80   : > { %1730 = vmatprep.subr.bf16.mxu0 %v3996_v2  ;;  %2019 = vmatprep.subr.bf16.mxu1 %v3996_v2  ;;  %v3732_v3 = vld [vmem:[%s4332_s11 + $0x80] sm:$0xff]   ;;  %v3734_v5 = vld [vmem:[%s4332_s11 + $0x88] sm:$0xff]   ;;  %v3736_v7 = vld [vmem:[%s4332_s11 + $0x90] sm:$0xff]  }
  0x81   : > { %1731 = vmatpush1.bf16.msra.mxu0 %v3731_v1  ;;  %2020 = vmatpush1.bf16.msra.mxu1 %v3732_v3  ;;  %v3737_v8 = vld [vmem:[%s4332_s11 + $0x18] sm:$0xff]   ;;  %v3739_v10 = vld [vmem:[%s4332_s11 + $0x20] sm:$0xff]   ;;  %v3741_v12 = vld [vmem:[%s4332_s11 + $0x28] sm:$0xff]  }
  0x82   : > { %1732 = vmatprep.subr.bf16.mxu0 %v3996_v2  ;;  %2021 = vmatprep.subr.bf16.mxu1 %v3996_v2  ;;  %v3738_v9 = vld [vmem:[%s4332_s11 + $0x98] sm:$0xff]   ;;  %v3740_v11 = vld [vmem:[%s4332_s11 + $0xa0] sm:$0xff]   ;;  %v3742_v13 = vld [vmem:[%s4332_s11 + $0xa8] sm:$0xff]  }
  0x83   : > { %v3743_v14 = vld [vmem:[%s4332_s11 + $0x30] sm:$0xff]   ;;  %v3745_v16 = vld [vmem:[%s4332_s11 + $0x38] sm:$0xff]   ;;  %v3747_v18 = vld [vmem:[%s4332_s11 + $0x40] sm:$0xff]  }
  0x84   : > { %v3744_v15 = vld [vmem:[%s4332_s11 + $0xb0] sm:$0xff]   ;;  %v3746_v17 = vld [vmem:[%s4332_s11 + $0xb8] sm:$0xff]   ;;  %v3748_v19 = vld [vmem:[%s4332_s11 + $0xc0] sm:$0xff]  }
  0x85   : > { %1733 = vmatpush1.bf16.msra.mxu0 %v3733_v4  ;;  %2022 = vmatpush1.bf16.msra.mxu1 %v3734_v5  ;;  %v3765_v20 = vld [vmem:[%s4334_s12 + $0x4] ss:$16 sps:$4 sm:$0xff]   ;;  %v3749_v21 = vld [vmem:[%s4332_s11 + $0x48] sm:$0xff]   ;;  %v3753_v26 = vld [vmem:[%s4332_s11 + $0x58] sm:$0xff]  }
  0x86   : > { %1734 = vmatprep.subr.bf16.mxu0 %v3996_v2  ;;  %2023 = vmatprep.subr.bf16.mxu1 %v3996_v2  ;;  %v3768_v22 = vld [vmem:[%s4334_s12 + $0xc] ss:$16 sps:$4 sm:$0xff]   ;;  %v3751_v24 = vld [vmem:[%s4332_s11 + $0x50] sm:$0xff]   ;;  %v3755_v28 = vld [vmem:[%s4332_s11 + $0x60] sm:$0xff]  }
  0x87   : > { %v3750_v23 = vld [vmem:[%s4332_s11 + $0xc8] sm:$0xff]   ;;  %1762 = vmatprep.mubr.bf16.mxu0 %v3765_v20  ;;  %2051 = vmatprep.mubr.bf16.mxu1 %v3768_v22  ;;  %v3752_v25 = vld [vmem:[%s4332_s11 + $0xd0] sm:$0xff]   ;;  %v3754_v27 = vld [vmem:[%s4332_s11 + $0xd8] sm:$0xff]  }
  0x88   : > { %v3756_v29 = vld [vmem:[%s4332_s11 + $0xe0] sm:$0xff]   ;;  %v3757_v30 = vld [vmem:[%s4332_s11 + $0x68] sm:$0xff]   ;;  %v3759_v32 = vld [vmem:[%s4332_s11 + $0x70] sm:$0xff]  }
  0x89   : > { %1735 = vmatpush1.bf16.msra.mxu0 %v3735_v6  ;;  %2024 = vmatpush1.bf16.msra.mxu1 %v3736_v7  ;;  %v3758_v31 = vld [vmem:[%s4332_s11 + $0xe8] sm:$0xff]   ;;  %v3760_v33 = vld [vmem:[%s4332_s11 + $0xf0] sm:$0xff]   ;;  %v3761_v34 = vld [vmem:[%s4332_s11 + $0x78] sm:$0xff]  }
  0x8a   : > { %1736 = vmatprep.subr.bf16.mxu0 %v3996_v2  ;;  %2025 = vmatprep.subr.bf16.mxu1 %v3996_v2  ;;  %v3762_v35 = vld [vmem:[%s4332_s11 + $0xf8] sm:$0xff]   ;;  %v3763_v36 = vld [vmem:[%s4334_s12] ss:$16 sps:$4 sm:$0xff]   ;;  %v3769_v38 = vld [vmem:[%s4334_s12 + $0x24] ss:$16 sps:$4 sm:$0xff]  }
  0x8b   : > { %v3766_v37 = vld [vmem:[%s4334_s12 + $0x8] ss:$16 sps:$4 sm:$0xff]   ;;  %v3771_v39 = vld [vmem:[%s4334_s12 + $0x2c] ss:$16 sps:$4 sm:$0xff]   ;;  %v3773_v40 = vld [vmem:[%s4334_s12 + $0x20] ss:$16 sps:$4 sm:$0xff]  }
  0x8c   : > { %v3774_v41 = vld [vmem:[%s4334_s12 + $0x28] ss:$16 sps:$4 sm:$0xff]   ;;  %v3775_v42 = vld [vmem:[%s4334_s12 + $0x44] ss:$16 sps:$4 sm:$0xff]   ;;  %v3777_v43 = vld [vmem:[%s4334_s12 + $0x4c] ss:$16 sps:$4 sm:$0xff]  }
  0x8d   : > { %1737 = vmatpush1.bf16.msra.mxu0 %v3737_v8  ;;  %2026 = vmatpush1.bf16.msra.mxu1 %v3738_v9  ;;  %v3779_v44 = vld [vmem:[%s4334_s12 + $0x40] ss:$16 sps:$4 sm:$0xff]   ;;  %v3780_v45 = vld [vmem:[%s4334_s12 + $0x48] ss:$16 sps:$4 sm:$0xff]   ;;  %v3781_v46 = vld [vmem:[%s4334_s12 + $0x64] ss:$16 sps:$4 sm:$0xff]  }
  0x8e   : > { %1738 = vmatprep.subr.bf16.mxu0 %v3996_v2  ;;  %2027 = vmatprep.subr.bf16.mxu1 %v3996_v2  ;;  %v3783_v47 = vld [vmem:[%s4334_s12 + $0x6c] ss:$16 sps:$4 sm:$0xff]   ;;  %v3785_v48 = vld [vmem:[%s4334_s12 + $0x60] ss:$16 sps:$4 sm:$0xff]   ;;  %v3786_v49 = vld [vmem:[%s4334_s12 + $0x68] ss:$16 sps:$4 sm:$0xff]  }
  0x8f   : > { %v3787_v50 = vld [vmem:[%s4334_s12 + $0x84] ss:$16 sps:$4 sm:$0xff]   ;;  %v3789_v51 = vld [vmem:[%s4334_s12 + $0x8c] ss:$16 sps:$4 sm:$0xff]   ;;  %v3791_v52 = vld [vmem:[%s4334_s12 + $0x80] ss:$16 sps:$4 sm:$0xff]  }
  0x90   : > { %v3792_v53 = vld [vmem:[%s4334_s12 + $0x88] ss:$16 sps:$4 sm:$0xff]   ;;  %v3793_v54 = vld [vmem:[%s4334_s12 + $0xa4] ss:$16 sps:$4 sm:$0xff]   ;;  %v3795_v55 = vld [vmem:[%s4334_s12 + $0xac] ss:$16 sps:$4 sm:$0xff]  }
  0x91   : > { %1739 = vmatpush1.bf16.msra.mxu0 %v3739_v10  ;;  %2028 = vmatpush1.bf16.msra.mxu1 %v3740_v11  ;;  %v3797_v56 = vld [vmem:[%s4334_s12 + $0xa0] ss:$16 sps:$4 sm:$0xff]   ;;  %v3798_v57 = vld [vmem:[%s4334_s12 + $0xa8] ss:$16 sps:$4 sm:$0xff]   ;;  %v3799_v58 = vld [vmem:[%s4334_s12 + $0xc4] ss:$16 sps:$4 sm:$0xff]  }
  0x92   : > { %1740 = vmatprep.subr.bf16.mxu0 %v3996_v2  ;;  %2029 = vmatprep.subr.bf16.mxu1 %v3996_v2  ;;  %v3801_v59 = vld [vmem:[%s4334_s12 + $0xcc] ss:$16 sps:$4 sm:$0xff]   ;;  %v3803_v60 = vld [vmem:[%s4334_s12 + $0xc0] ss:$16 sps:$4 sm:$0xff]   ;;  %v3804_v61 = vld [vmem:[%s4334_s12 + $0xc8] ss:$16 sps:$4 sm:$0xff]  }
  0x93   : > { %v3805_v62 = vld [vmem:[%s4334_s12 + $0xe4] ss:$16 sps:$4 sm:$0xff]   ;;  %v3807_v63 = vld [vmem:[%s4334_s12 + $0xec] ss:$16 sps:$4 sm:$0xff]   ;;  %v3809_v0 = vld [vmem:[%s4334_s12 + $0xe0] ss:$16 sps:$4 sm:$0xff]  }
  0x94   : > { %v3810_v1 = vld [vmem:[%s4334_s12 + $0xe8] ss:$16 sps:$4 sm:$0xff]   ;;  %v3813_v3 = vld [vmem:[%s4334_s12 + $0x10c] ss:$16 sps:$4 sm:$0xff]   ;;  %v3815_v4 = vld [vmem:[%s4334_s12 + $0x100] ss:$16 sps:$4 sm:$0xff]  }
  0x95   : > { %1741 = vmatpush1.bf16.msra.mxu0 %v3741_v12  ;;  %2030 = vmatpush1.bf16.msra.mxu1 %v3742_v13  ;;  %v3816_v5 = vld [vmem:[%s4334_s12 + $0x108] ss:$16 sps:$4 sm:$0xff]   ;;  %v3817_v6 = vld [vmem:[%s4334_s12 + $0x124] ss:$16 sps:$4 sm:$0xff]   ;;  %v3819_v7 = vld [vmem:[%s4334_s12 + $0x12c] ss:$16 sps:$4 sm:$0xff]  }
  0x96   : > { %1742 = vmatprep.subr.bf16.mxu0 %v3996_v2  ;;  %2031 = vmatprep.subr.bf16.mxu1 %v3996_v2  ;;  %v3821_v8 = vld [vmem:[%s4334_s12 + $0x120] ss:$16 sps:$4 sm:$0xff]   ;;  %v3822_v9 = vld [vmem:[%s4334_s12 + $0x128] ss:$16 sps:$4 sm:$0xff]   ;;  %v3823_v10 = vld [vmem:[%s4334_s12 + $0x144] ss:$16 sps:$4 sm:$0xff]  }
  0x97   : > { %v3825_v11 = vld [vmem:[%s4334_s12 + $0x14c] ss:$16 sps:$4 sm:$0xff]   ;;  %v3827_v12 = vld [vmem:[%s4334_s12 + $0x140] ss:$16 sps:$4 sm:$0xff]   ;;  %v3828_v13 = vld [vmem:[%s4334_s12 + $0x148] ss:$16 sps:$4 sm:$0xff]  }
  0x98   : > { %v3839_v20 = vld [vmem:[%s4334_s12 + $0x180] ss:$16 sps:$4 sm:$0xff]   ;;  %v3841_v22 = vld [vmem:[%s4334_s12 + $0x1a4] ss:$16 sps:$4 sm:$0xff]  }
  0x99   : > { %1743 = vmatpush1.bf16.msra.mxu0 %v3743_v14  ;;  %2032 = vmatpush1.bf16.msra.mxu1 %v3744_v15  ;;  %v3829_v14 = vld [vmem:[%s4334_s12 + $0x164] ss:$16 sps:$4 sm:$0xff]   ;;  %v3831_v15 = vld [vmem:[%s4334_s12 + $0x16c] ss:$16 sps:$4 sm:$0xff]  }
  0x9a   : > { %1744 = vmatprep.subr.bf16.mxu0 %v3996_v2  ;;  %2033 = vmatprep.subr.bf16.mxu1 %v3996_v2 }
  0x9d   : > { %1745 = vmatpush1.bf16.msra.mxu0 %v3745_v16  ;;  %2034 = vmatpush1.bf16.msra.mxu1 %v3746_v17  ;;  %v3833_v16 = vld [vmem:[%s4334_s12 + $0x160] ss:$16 sps:$4 sm:$0xff]   ;;  %v3834_v17 = vld [vmem:[%s4334_s12 + $0x168] ss:$16 sps:$4 sm:$0xff]  }
  0x9e   : > { %1746 = vmatprep.subr.bf16.mxu0 %v3996_v2  ;;  %2035 = vmatprep.subr.bf16.mxu1 %v3996_v2 }
  0xa1   : > { %1747 = vmatpush1.bf16.msra.mxu0 %v3747_v18  ;;  %2036 = vmatpush1.bf16.msra.mxu1 %v3748_v19  ;;  %v3835_v18 = vld [vmem:[%s4334_s12 + $0x184] ss:$16 sps:$4 sm:$0xff]   ;;  %v3837_v19 = vld [vmem:[%s4334_s12 + $0x18c] ss:$16 sps:$4 sm:$0xff]  }
  0xa2   : > { %1748 = vmatprep.subr.bf16.mxu0 %v3996_v2  ;;  %2037 = vmatprep.subr.bf16.mxu1 %v3996_v2 }
  0xa5   : > { %1749 = vmatpush1.bf16.msra.mxu0 %v3749_v21  ;;  %2038 = vmatpush1.bf16.msra.mxu1 %v3750_v23  ;;  %v3840_v21 = vld [vmem:[%s4334_s12 + $0x188] ss:$16 sps:$4 sm:$0xff]   ;;  %v3843_v23 = vld [vmem:[%s4334_s12 + $0x1ac] ss:$16 sps:$4 sm:$0xff]  }
  0xa6   : > { %1750 = vmatprep.subr.bf16.mxu0 %v3996_v2  ;;  %2039 = vmatprep.subr.bf16.mxu1 %v3996_v2 }
  0xa9   : > { %1751 = vmatpush1.bf16.msra.mxu0 %v3751_v24  ;;  %2040 = vmatpush1.bf16.msra.mxu1 %v3752_v25  ;;  %v3845_v24 = vld [vmem:[%s4334_s12 + $0x1a0] ss:$16 sps:$4 sm:$0xff]   ;;  %v3846_v25 = vld [vmem:[%s4334_s12 + $0x1a8] ss:$16 sps:$4 sm:$0xff]  }
  0xaa   : > { %1752 = vmatprep.subr.bf16.mxu0 %v3996_v2  ;;  %2041 = vmatprep.subr.bf16.mxu1 %v3996_v2 }
  0xad   : > { %1753 = vmatpush1.bf16.msra.mxu0 %v3753_v26  ;;  %2042 = vmatpush1.bf16.msra.mxu1 %v3754_v27  ;;  %v3847_v26 = vld [vmem:[%s4334_s12 + $0x1c4] ss:$16 sps:$4 sm:$0xff]   ;;  %v3849_v27 = vld [vmem:[%s4334_s12 + $0x1cc] ss:$16 sps:$4 sm:$0xff]  }
  0xae   : > { %1754 = vmatprep.subr.bf16.mxu0 %v3996_v2  ;;  %2043 = vmatprep.subr.bf16.mxu1 %v3996_v2 }
  0xb1   : > { %1755 = vmatpush1.bf16.msra.mxu0 %v3755_v28  ;;  %2044 = vmatpush1.bf16.msra.mxu1 %v3756_v29  ;;  %v3851_v28 = vld [vmem:[%s4334_s12 + $0x1c0] ss:$16 sps:$4 sm:$0xff]   ;;  %v3852_v29 = vld [vmem:[%s4334_s12 + $0x1c8] ss:$16 sps:$4 sm:$0xff]  }
  0xb2   : > { %1756 = vmatprep.subr.bf16.mxu0 %v3996_v2  ;;  %2045 = vmatprep.subr.bf16.mxu1 %v3996_v2 }
  0xb5   : > { %1757 = vmatpush1.bf16.msra.mxu0 %v3757_v30  ;;  %2046 = vmatpush1.bf16.msra.mxu1 %v3758_v31  ;;  %v3853_v30 = vld [vmem:[%s4334_s12 + $0x1e4] ss:$16 sps:$4 sm:$0xff]   ;;  %v3855_v31 = vld [vmem:[%s4334_s12 + $0x1ec] ss:$16 sps:$4 sm:$0xff]  }
  0xb6   : > { %1758 = vmatprep.subr.bf16.mxu0 %v3996_v2  ;;  %2047 = vmatprep.subr.bf16.mxu1 %v3996_v2 }
  0xb9   : > { %1759 = vmatpush1.bf16.msra.mxu0 %v3759_v32  ;;  %2048 = vmatpush1.bf16.msra.mxu1 %v3760_v33  ;;  %v3857_v32 = vld [vmem:[%s4334_s12 + $0x1e0] ss:$16 sps:$4 sm:$0xff]   ;;  %v3858_v33 = vld [vmem:[%s4334_s12 + $0x1e8] ss:$16 sps:$4 sm:$0xff]  }
  0xba   : > { %1760 = vmatprep.subr.bf16.mxu0 %v3996_v2  ;;  %2049 = vmatprep.subr.bf16.mxu1 %v3996_v2  ;;  %v3811_v2 = vld [vmem:[%s4334_s12 + $0x104] ss:$16 sps:$4 sm:$0xff]  }
  0xbd   : > { %1761 = vmatpush1.bf16.msra.mxu0 %v3761_v34  ;;  %2050 = vmatpush1.bf16.msra.mxu1 %v3762_v35  ;;  %v3859_v34 = vld [vmem:[%s4334_s12 + $0x204] ss:$16 sps:$4 sm:$0xff]   ;;  %v3861_v35 = vld [vmem:[%s4334_s12 + $0x20c] ss:$16 sps:$4 sm:$0xff]  }
  0xc0   : > { %1763 = vmatmul.mubr.bf16.vlgmr.msra.gmra.mrb[0].mxu0 %v3763_v36  ;;  %2052 = vmatmul.mubr.bf16.vlgmr.msra.gmra.mrb[0].mxu1 %v3766_v37  ;;  %v3863_v36 = vld [vmem:[%s4334_s12 + $0x200] ss:$16 sps:$4 sm:$0xff]   ;;  %v3864_v37 = vld [vmem:[%s4334_s12 + $0x208] ss:$16 sps:$4 sm:$0xff]  }
  0xc1   : > { %1770 = vmatprep.mubr.bf16.mxu0 %v3769_v38  ;;  %2059 = vmatprep.mubr.bf16.mxu1 %v3771_v39  ;;  %v3865_v38 = vld [vmem:[%s4334_s12 + $0x224] ss:$16 sps:$4 sm:$0xff]   ;;  %v3867_v39 = vld [vmem:[%s4334_s12 + $0x22c] ss:$16 sps:$4 sm:$0xff]  }
  0xc8   : > { %1771 = vmatmul.mubr.bf16.gmra.mrb[4].mxu0 %v3773_v40  ;;  %2060 = vmatmul.mubr.bf16.gmra.mrb[4].mxu1 %v3774_v41  ;;  %v3869_v40 = vld [vmem:[%s4334_s12 + $0x220] ss:$16 sps:$4 sm:$0xff]   ;;  %v3870_v41 = vld [vmem:[%s4334_s12 + $0x228] ss:$16 sps:$4 sm:$0xff]  }
  0xc9   : > { %1778 = vmatprep.mubr.bf16.mxu0 %v3775_v42  ;;  %2067 = vmatprep.mubr.bf16.mxu1 %v3777_v43  ;;  %v3871_v42 = vld [vmem:[%s4334_s12 + $0x244] ss:$16 sps:$4 sm:$0xff]   ;;  %v3873_v43 = vld [vmem:[%s4334_s12 + $0x24c] ss:$16 sps:$4 sm:$0xff]  }
  0xd0   : > { %1779 = vmatmul.mubr.bf16.gmra.mrb[8].mxu0 %v3779_v44  ;;  %2068 = vmatmul.mubr.bf16.gmra.mrb[8].mxu1 %v3780_v45  ;;  %v3875_v44 = vld [vmem:[%s4334_s12 + $0x240] ss:$16 sps:$4 sm:$0xff]   ;;  %v3876_v45 = vld [vmem:[%s4334_s12 + $0x248] ss:$16 sps:$4 sm:$0xff]  }
  0xd1   : > { %1786 = vmatprep.mubr.bf16.mxu0 %v3781_v46  ;;  %2075 = vmatprep.mubr.bf16.mxu1 %v3783_v47  ;;  %v3877_v46 = vld [vmem:[%s4334_s12 + $0x264] ss:$16 sps:$4 sm:$0xff]   ;;  %v3879_v47 = vld [vmem:[%s4334_s12 + $0x26c] ss:$16 sps:$4 sm:$0xff]  }
  0xd8   : > { %1787 = vmatmul.mubr.bf16.gmra.mrb[12].mxu0 %v3785_v48  ;;  %2076 = vmatmul.mubr.bf16.gmra.mrb[12].mxu1 %v3786_v49  ;;  %v3881_v48 = vld [vmem:[%s4334_s12 + $0x260] ss:$16 sps:$4 sm:$0xff]   ;;  %v3882_v49 = vld [vmem:[%s4334_s12 + $0x268] ss:$16 sps:$4 sm:$0xff]  }
  0xd9   : > { %1794 = vmatprep.mubr.bf16.mxu0 %v3787_v50  ;;  %2083 = vmatprep.mubr.bf16.mxu1 %v3789_v51  ;;  %v3883_v50 = vld [vmem:[%s4334_s12 + $0x284] ss:$16 sps:$4 sm:$0xff]   ;;  %v3885_v51 = vld [vmem:[%s4334_s12 + $0x28c] ss:$16 sps:$4 sm:$0xff]  }
  0xe0   : > { %1795 = vmatmul.mubr.bf16.gmra.mrb[16].mxu0 %v3791_v52  ;;  %2084 = vmatmul.mubr.bf16.gmra.mrb[16].mxu1 %v3792_v53  ;;  %v3887_v52 = vld [vmem:[%s4334_s12 + $0x280] ss:$16 sps:$4 sm:$0xff]   ;;  %v3888_v53 = vld [vmem:[%s4334_s12 + $0x288] ss:$16 sps:$4 sm:$0xff]  }
  0xe1   : > { %1802 = vmatprep.mubr.bf16.mxu0 %v3793_v54  ;;  %2091 = vmatprep.mubr.bf16.mxu1 %v3795_v55  ;;  %v3889_v54 = vld [vmem:[%s4334_s12 + $0x2a4] ss:$16 sps:$4 sm:$0xff]   ;;  %v3891_v55 = vld [vmem:[%s4334_s12 + $0x2ac] ss:$16 sps:$4 sm:$0xff]  }
  0xe8   : > { %1803 = vmatmul.mubr.bf16.gmra.mrb[20].mxu0 %v3797_v56  ;;  %2092 = vmatmul.mubr.bf16.gmra.mrb[20].mxu1 %v3798_v57  ;;  %v3893_v56 = vld [vmem:[%s4334_s12 + $0x2a0] ss:$16 sps:$4 sm:$0xff]   ;;  %v3894_v57 = vld [vmem:[%s4334_s12 + $0x2a8] ss:$16 sps:$4 sm:$0xff]  }
  0xe9   : > { %1810 = vmatprep.mubr.bf16.mxu0 %v3799_v58  ;;  %2099 = vmatprep.mubr.bf16.mxu1 %v3801_v59  ;;  %v3895_v58 = vld [vmem:[%s4334_s12 + $0x2c4] ss:$16 sps:$4 sm:$0xff]   ;;  %v3897_v59 = vld [vmem:[%s4334_s12 + $0x2cc] ss:$16 sps:$4 sm:$0xff]  }
  0xf0   : > { %1811 = vmatmul.mubr.bf16.gmra.mrb[24].mxu0 %v3803_v60  ;;  %2100 = vmatmul.mubr.bf16.gmra.mrb[24].mxu1 %v3804_v61  ;;  %v3899_v60 = vld [vmem:[%s4334_s12 + $0x2c0] ss:$16 sps:$4 sm:$0xff]   ;;  %v3900_v61 = vld [vmem:[%s4334_s12 + $0x2c8] ss:$16 sps:$4 sm:$0xff]  }
  0xf1   : > { %1818 = vmatprep.mubr.bf16.mxu0 %v3805_v62  ;;  %2107 = vmatprep.mubr.bf16.mxu1 %v3807_v63  ;;  %v3901_v62 = vld [vmem:[%s4334_s12 + $0x2e4] ss:$16 sps:$4 sm:$0xff]   ;;  %v3903_v63 = vld [vmem:[%s4334_s12 + $0x2ec] ss:$16 sps:$4 sm:$0xff]  }
  0xf8   : > { %1819 = vmatmul.mubr.bf16.gmra.mrb[28].mxu0 %v3809_v0  ;;  %2108 = vmatmul.mubr.bf16.gmra.mrb[28].mxu1 %v3810_v1  ;;  %v3905_v0 = vld [vmem:[%s4334_s12 + $0x2e0] ss:$16 sps:$4 sm:$0xff]   ;;  %v3906_v1 = vld [vmem:[%s4334_s12 + $0x2e8] ss:$16 sps:$4 sm:$0xff]  }
  0xf9   : > { %1826 = vmatprep.mubr.bf16.mxu0 %v3811_v2  ;;  %2115 = vmatprep.mubr.bf16.mxu1 %v3813_v3  ;;  %v3907_v2 = vld [vmem:[%s4334_s12 + $0x304] ss:$16 sps:$4 sm:$0xff]   ;;  %v3909_v3 = vld [vmem:[%s4334_s12 + $0x30c] ss:$16 sps:$4 sm:$0xff]  }
 0x100   : > { %1827 = vmatmul.mubr.bf16.gmra.mrb[32].mxu0 %v3815_v4  ;;  %2116 = vmatmul.mubr.bf16.gmra.mrb[32].mxu1 %v3816_v5  ;;  %v3911_v4 = vld [vmem:[%s4334_s12 + $0x300] ss:$16 sps:$4 sm:$0xff]   ;;  %v3912_v5 = vld [vmem:[%s4334_s12 + $0x308] ss:$16 sps:$4 sm:$0xff]  }
 0x101   : > { %1834 = vmatprep.mubr.bf16.mxu0 %v3817_v6  ;;  %2123 = vmatprep.mubr.bf16.mxu1 %v3819_v7  ;;  %v3913_v6 = vld [vmem:[%s4334_s12 + $0x324] ss:$16 sps:$4 sm:$0xff]   ;;  %v3915_v7 = vld [vmem:[%s4334_s12 + $0x32c] ss:$16 sps:$4 sm:$0xff]  }
 0x108   : > { %1835 = vmatmul.mubr.bf16.gmra.mrb[36].mxu0 %v3821_v8  ;;  %2124 = vmatmul.mubr.bf16.gmra.mrb[36].mxu1 %v3822_v9  ;;  %v3917_v8 = vld [vmem:[%s4334_s12 + $0x320] ss:$16 sps:$4 sm:$0xff]   ;;  %v3918_v9 = vld [vmem:[%s4334_s12 + $0x328] ss:$16 sps:$4 sm:$0xff]  }
 0x109   : > { %1842 = vmatprep.mubr.bf16.mxu0 %v3823_v10  ;;  %2131 = vmatprep.mubr.bf16.mxu1 %v3825_v11  ;;  %v3919_v10 = vld [vmem:[%s4334_s12 + $0x344] ss:$16 sps:$4 sm:$0xff]   ;;  %v3921_v11 = vld [vmem:[%s4334_s12 + $0x34c] ss:$16 sps:$4 sm:$0xff]  }
 0x110   : > { %1843 = vmatmul.mubr.bf16.gmra.mrb[40].mxu0 %v3827_v12  ;;  %2132 = vmatmul.mubr.bf16.gmra.mrb[40].mxu1 %v3828_v13  ;;  %v3923_v12 = vld [vmem:[%s4334_s12 + $0x340] ss:$16 sps:$4 sm:$0xff]   ;;  %v3924_v13 = vld [vmem:[%s4334_s12 + $0x348] ss:$16 sps:$4 sm:$0xff]  }
 0x111   : > { %1850 = vmatprep.mubr.bf16.mxu0 %v3829_v14  ;;  %2139 = vmatprep.mubr.bf16.mxu1 %v3831_v15  ;;  %v3925_v14 = vld [vmem:[%s4334_s12 + $0x364] ss:$16 sps:$4 sm:$0xff]   ;;  %v3927_v15 = vld [vmem:[%s4334_s12 + $0x36c] ss:$16 sps:$4 sm:$0xff]  }
 0x118   : > { %1851 = vmatmul.mubr.bf16.gmra.mrb[44].mxu0 %v3833_v16  ;;  %2140 = vmatmul.mubr.bf16.gmra.mrb[44].mxu1 %v3834_v17  ;;  %v642_v17 = vld [vmem:[#allocation2] sm:$0xff] }
 0x119   : > { %1858 = vmatprep.mubr.bf16.mxu0 %v3835_v18  ;;  %2147 = vmatprep.mubr.bf16.mxu1 %v3837_v19 }
 0x120   : > { %1859 = vmatmul.mubr.bf16.gmra.mrb[48].mxu0 %v3839_v20  ;;  %2148 = vmatmul.mubr.bf16.gmra.mrb[48].mxu1 %v3840_v21  ;;  %v3929_v20 = vld [vmem:[%s4334_s12 + $0x360] ss:$16 sps:$4 sm:$0xff]  }
 0x121   : > { %1866 = vmatprep.mubr.bf16.mxu0 %v3841_v22  ;;  %2155 = vmatprep.mubr.bf16.mxu1 %v3843_v23 }
 0x128   : > { %1867 = vmatmul.mubr.bf16.gmra.mrb[52].mxu0 %v3845_v24  ;;  %2156 = vmatmul.mubr.bf16.gmra.mrb[52].mxu1 %v3846_v25  ;;  %v3930_v24 = vld [vmem:[%s4334_s12 + $0x368] ss:$16 sps:$4 sm:$0xff]   ;;  %v3931_v25 = vld [vmem:[%s4334_s12 + $0x384] ss:$16 sps:$4 sm:$0xff]  }
 0x129   : > { %1874 = vmatprep.mubr.bf16.mxu0 %v3847_v26  ;;  %2163 = vmatprep.mubr.bf16.mxu1 %v3849_v27  ;;  %v643_v26 = vld [vmem:[#allocation2 + $0x8] sm:$0xff] }
 0x130   : > { %1875 = vmatmul.mubr.bf16.gmra.mrb[56].mxu0 %v3851_v28  ;;  %2164 = vmatmul.mubr.bf16.gmra.mrb[56].mxu1 %v3852_v29  ;;  %v3933_v29 = vld [vmem:[%s4334_s12 + $0x38c] ss:$16 sps:$4 sm:$0xff]  }
 0x131   : > { %1882 = vmatprep.mubr.bf16.mxu0 %v3853_v30  ;;  %2171 = vmatprep.mubr.bf16.mxu1 %v3855_v31 }
 0x138   : > { %1883 = vmatmul.mubr.bf16.gmra.mrb[60].mxu0 %v3857_v32  ;;  %2172 = vmatmul.mubr.bf16.gmra.mrb[60].mxu1 %v3858_v33 }
 0x139   : > { %1890 = vmatprep.mubr.bf16.mxu0 %v3859_v34  ;;  %2179 = vmatprep.mubr.bf16.mxu1 %v3861_v35  ;;  %v644_v35 = vld [vmem:[#allocation2 + $0x10] sm:$0xff] }
 0x140   : > { %1891 = vmatmul.mubr.bf16.gmra.mrb[64].mxu0 %v3863_v36  ;;  %2180 = vmatmul.mubr.bf16.gmra.mrb[64].mxu1 %v3864_v37 }
 0x141   : > { %1898 = vmatprep.mubr.bf16.mxu0 %v3865_v38  ;;  %2187 = vmatprep.mubr.bf16.mxu1 %v3867_v39  ;;  %v3935_v38 = vld [vmem:[%s4334_s12 + $0x380] ss:$16 sps:$4 sm:$0xff]  }
 0x148   : > { %1899 = vmatmul.mubr.bf16.gmra.mrb[68].mxu0 %v3869_v40  ;;  %2188 = vmatmul.mubr.bf16.gmra.mrb[68].mxu1 %v3870_v41 }
 0x149   : > { %1906 = vmatprep.mubr.bf16.mxu0 %v3871_v42  ;;  %2195 = vmatprep.mubr.bf16.mxu1 %v3873_v43  ;;  %v3936_v42 = vld [vmem:[%s4334_s12 + $0x388] ss:$16 sps:$4 sm:$0xff]   ;;  %v3937_v43 = vld [vmem:[%s4334_s12 + $0x3a4] ss:$16 sps:$4 sm:$0xff]  }
 0x150   : > { %1907 = vmatmul.mubr.bf16.gmra.mrb[72].mxu0 %v3875_v44  ;;  %2196 = vmatmul.mubr.bf16.gmra.mrb[72].mxu1 %v3876_v45  ;;  %v645_v44 = vld [vmem:[#allocation2 + $0x18] sm:$0xff] }
 0x151   : > { %1914 = vmatprep.mubr.bf16.mxu0 %v3877_v46  ;;  %2203 = vmatprep.mubr.bf16.mxu1 %v3879_v47  ;;  %v3939_v47 = vld [vmem:[%s4334_s12 + $0x3ac] ss:$16 sps:$4 sm:$0xff]  }
 0x158   : > { %1915 = vmatmul.mubr.bf16.gmra.mrb[76].mxu0 %v3881_v48  ;;  %2204 = vmatmul.mubr.bf16.gmra.mrb[76].mxu1 %v3882_v49 }
 0x159   : > { %1922 = vmatprep.mubr.bf16.mxu0 %v3883_v50  ;;  %2211 = vmatprep.mubr.bf16.mxu1 %v3885_v51 }
 0x160   : > { %1923 = vmatmul.mubr.bf16.gmra.mrb[80].mxu0 %v3887_v52  ;;  %2212 = vmatmul.mubr.bf16.gmra.mrb[80].mxu1 %v3888_v53  ;;  %v646_v53 = vld [vmem:[#allocation2 + $0x20] sm:$0xff] }
 0x161   : > { %1930 = vmatprep.mubr.bf16.mxu0 %v3889_v54  ;;  %2219 = vmatprep.mubr.bf16.mxu1 %v3891_v55 }
 0x168   : > { %1931 = vmatmul.mubr.bf16.gmra.mrb[84].mxu0 %v3893_v56  ;;  %2220 = vmatmul.mubr.bf16.gmra.mrb[84].mxu1 %v3894_v57  ;;  %v3941_v56 = vld [vmem:[%s4334_s12 + $0x3a0] ss:$16 sps:$4 sm:$0xff]  }
 0x169   : > { %1938 = vmatprep.mubr.bf16.mxu0 %v3895_v58  ;;  %2227 = vmatprep.mubr.bf16.mxu1 %v3897_v59 }
 0x170   : > { %1939 = vmatmul.mubr.bf16.gmra.mrb[88].mxu0 %v3899_v60  ;;  %2228 = vmatmul.mubr.bf16.gmra.mrb[88].mxu1 %v3900_v61  ;;  %v3942_v60 = vld [vmem:[%s4334_s12 + $0x3a8] ss:$16 sps:$4 sm:$0xff]   ;;  %v3943_v61 = vld [vmem:[%s4334_s12 + $0x3c4] ss:$16 sps:$4 sm:$0xff]  }
 0x171   : > { %1946 = vmatprep.mubr.bf16.mxu0 %v3901_v62  ;;  %2235 = vmatprep.mubr.bf16.mxu1 %v3903_v63  ;;  %v647_v62 = vld [vmem:[#allocation2 + $0x28] sm:$0xff] }
 0x178   : > { %1947 = vmatmul.mubr.bf16.gmra.mrb[92].mxu0 %v3905_v0  ;;  %2236 = vmatmul.mubr.bf16.gmra.mrb[92].mxu1 %v3906_v1  ;;  %v3945_v1 = vld [vmem:[%s4334_s12 + $0x3cc] ss:$16 sps:$4 sm:$0xff]  }
 0x179   : > { %1954 = vmatprep.mubr.bf16.mxu0 %v3907_v2  ;;  %2243 = vmatprep.mubr.bf16.mxu1 %v3909_v3 }
 0x180   : > { %1955 = vmatmul.mubr.bf16.gmra.mrb[96].mxu0 %v3911_v4  ;;  %2244 = vmatmul.mubr.bf16.gmra.mrb[96].mxu1 %v3912_v5 }
 0x181   : > { %1962 = vmatprep.mubr.bf16.mxu0 %v3913_v6  ;;  %2251 = vmatprep.mubr.bf16.mxu1 %v3915_v7  ;;  %v648_v7 = vld [vmem:[#allocation2 + $0x30] sm:$0xff] }
 0x188   : > { %1963 = vmatmul.mubr.bf16.gmra.mrb[100].mxu0 %v3917_v8  ;;  %2252 = vmatmul.mubr.bf16.gmra.mrb[100].mxu1 %v3918_v9 }
 0x189   : > { %1970 = vmatprep.mubr.bf16.mxu0 %v3919_v10  ;;  %2259 = vmatprep.mubr.bf16.mxu1 %v3921_v11  ;;  %v3947_v10 = vld [vmem:[%s4334_s12 + $0x3c0] ss:$16 sps:$4 sm:$0xff]  }
 0x190   : > { %1971 = vmatmul.mubr.bf16.gmra.mrb[104].mxu0 %v3923_v12  ;;  %2260 = vmatmul.mubr.bf16.gmra.mrb[104].mxu1 %v3924_v13 }
 0x191   : > { %1978 = vmatprep.mubr.bf16.mxu0 %v3925_v14  ;;  %2267 = vmatprep.mubr.bf16.mxu1 %v3927_v15  ;;  %v3948_v14 = vld [vmem:[%s4334_s12 + $0x3c8] ss:$16 sps:$4 sm:$0xff]   ;;  %v3949_v15 = vld [vmem:[%s4334_s12 + $0x3e4] ss:$16 sps:$4 sm:$0xff]  }
 0x193   : > { %v1764_v16 = vpop.f32.mrb[0].mxu0  ;;  %v2053_v18 = vpop.f32.mrb[0].mxu1 }
 0x194   : > { %v1766_v19 = vpop.f32.mrb[1].mxu0  ;;  %v2054_v21 = vadd.f32 %v2053_v18, %v1764_v16  ;;  %v2055_v22 = vpop.f32.mrb[1].mxu1  ;;  %v649_v16 = vld [vmem:[#allocation2 + $0x38] sm:$0xff] }
 0x195   : > { %v1767_v23 = vpop.f32.mrb[2].mxu0  ;;  %v2056_v27 = vpop.f32.mrb[2].mxu1  ;;  %v3951_v19 = vld [vmem:[%s4334_s12 + $0x3ec] ss:$16 sps:$4 sm:$0xff]  }
 0x196   : > { %v1769_v28 = vpop.f32.mrb[3].mxu0  ;;  %v2308_v30 = vadd.f32 %v2054_v21, %v642_v17  ;;  %v2057_v31 = vadd.f32 %v2056_v27, %v1767_v23  ;;  %v2058_v32 = vpop.f32.mrb[3].mxu1 }
 0x197   : > { %v3953_v28 = vld [vmem:[%s4334_s12 + $0x3e0] ss:$16 sps:$4 sm:$0xff]   ;;  %v3954_v32 = vld [vmem:[%s4334_s12 + $0x3e8] ss:$16 sps:$4 sm:$0xff]  }
 0x198   : > { %1979 = vmatmul.mubr.bf16.gmra.mrb[108].mxu0 %v3929_v20  ;;  %2372 = vst [vmem:[#allocation2] sm:$0xff] %v2308_v30  ;;  %v2309_v33 = vadd.f32 %v2057_v31, %v643_v26  ;;  %2268 = vmatmul.mubr.bf16.gmra.mrb[108].mxu1 %v3930_v24 }
 0x199   : > { %1986 = vmatprep.mubr.bf16.mxu0 %v3931_v25  ;;  %2275 = vmatprep.mubr.bf16.mxu1 %v3933_v29  ;;  %v650_v25 = vld [vmem:[#allocation2 + $0x40] sm:$0xff] }
 0x19a   : > { %2373 = vst [vmem:[#allocation2 + $0x8] sm:$0xff] %v2309_v33  ;;  %v651_v33 = vld [vmem:[#allocation2 + $0x48] sm:$0xff] }
 0x19b   : > { %v1772_v34 = vpop.f32.mrb[4].mxu0  ;;  %v2061_v36 = vpop.f32.mrb[4].mxu1 }
 0x19c   : > { %v1774_v37 = vpop.f32.mrb[5].mxu0  ;;  %v2062_v39 = vadd.f32 %v2061_v36, %v1772_v34  ;;  %v2063_v40 = vpop.f32.mrb[5].mxu1 }
 0x19d   : > { %v1775_v41 = vpop.f32.mrb[6].mxu0  ;;  %v2064_v45 = vpop.f32.mrb[6].mxu1 }
 0x19e   : > { %v1777_v46 = vpop.f32.mrb[7].mxu0  ;;  %v2310_v48 = vadd.f32 %v2062_v39, %v644_v35  ;;  %v2065_v49 = vadd.f32 %v2064_v45, %v1775_v41  ;;  %v2066_v50 = vpop.f32.mrb[7].mxu1  ;;  %v652_v41 = vld [vmem:[#allocation2 + $0x50] sm:$0xff] }
 0x1a0   : > { %1987 = vmatmul.mubr.bf16.gmra.mrb[112].mxu0 %v3935_v38  ;;  %2374 = vst [vmem:[#allocation2 + $0x10] sm:$0xff] %v2310_v48  ;;  %v2311_v51 = vadd.f32 %v2065_v49, %v645_v44  ;;  %2276 = vmatmul.mubr.bf16.gmra.mrb[112].mxu1 %v3936_v42 }
 0x1a1   : > { %1994 = vmatprep.mubr.bf16.mxu0 %v3937_v43  ;;  %2283 = vmatprep.mubr.bf16.mxu1 %v3939_v47  ;;  %v653_v47 = vld [vmem:[#allocation2 + $0x58] sm:$0xff] }
 0x1a2   : > { %2375 = vst [vmem:[#allocation2 + $0x18] sm:$0xff] %v2311_v51 }
 0x1a3   : > { %v1780_v52 = vpop.f32.mrb[8].mxu0  ;;  %v2069_v54 = vpop.f32.mrb[8].mxu1 }
 0x1a4   : > { %v1782_v55 = vpop.f32.mrb[9].mxu0  ;;  %v2070_v57 = vadd.f32 %v2069_v54, %v1780_v52  ;;  %v2071_v58 = vpop.f32.mrb[9].mxu1 }
 0x1a5   : > { %v1783_v59 = vpop.f32.mrb[10].mxu0  ;;  %v2072_v63 = vpop.f32.mrb[10].mxu1  ;;  %v654_v55 = vld [vmem:[#allocation2 + $0x60] sm:$0xff] }
 0x1a6   : > { %v1785_v0 = vpop.f32.mrb[11].mxu0  ;;  %v2312_v2 = vadd.f32 %v2070_v57, %v646_v53  ;;  %v2073_v3 = vadd.f32 %v2072_v63, %v1783_v59  ;;  %v2074_v4 = vpop.f32.mrb[11].mxu1 }
 0x1a8   : > { %1995 = vmatmul.mubr.bf16.gmra.mrb[116].mxu0 %v3941_v56  ;;  %2376 = vst [vmem:[#allocation2 + $0x20] sm:$0xff] %v2312_v2  ;;  %v2313_v5 = vadd.f32 %v2073_v3, %v647_v62  ;;  %2284 = vmatmul.mubr.bf16.gmra.mrb[116].mxu1 %v3942_v60 }
 0x1a9   : > { %2002 = vmatprep.mubr.bf16.mxu0 %v3943_v61  ;;  %2291 = vmatprep.mubr.bf16.mxu1 %v3945_v1  ;;  %v655_v61 = vld [vmem:[#allocation2 + $0x68] sm:$0xff] }
 0x1aa   : > { %2377 = vst [vmem:[#allocation2 + $0x28] sm:$0xff] %v2313_v5  ;;  %v656_v5 = vld [vmem:[#allocation2 + $0x70] sm:$0xff] }
 0x1ab   : > { %v1788_v6 = vpop.f32.mrb[12].mxu0  ;;  %v2077_v8 = vpop.f32.mrb[12].mxu1 }
 0x1ac   : > { %v1790_v9 = vpop.f32.mrb[13].mxu0  ;;  %v2078_v11 = vadd.f32 %v2077_v8, %v1788_v6  ;;  %v2079_v12 = vpop.f32.mrb[13].mxu1 }
 0x1ad   : > { %v1791_v13 = vpop.f32.mrb[14].mxu0  ;;  %v2080_v17 = vpop.f32.mrb[14].mxu1 }
 0x1ae   : > { %v1793_v18 = vpop.f32.mrb[15].mxu0  ;;  %v2314_v20 = vadd.f32 %v2078_v11, %v648_v7  ;;  %v2081_v21 = vadd.f32 %v2080_v17, %v1791_v13  ;;  %v2082_v22 = vpop.f32.mrb[15].mxu1  ;;  %v657_v11 = vld [vmem:[#allocation2 + $0x78] sm:$0xff] }
 0x1b0   : > { %2003 = vmatmul.mubr.bf16.gmra.mrb[120].mxu0 %v3947_v10  ;;  %2378 = vst [vmem:[#allocation2 + $0x30] sm:$0xff] %v2314_v20  ;;  %v2315_v23 = vadd.f32 %v2081_v21, %v649_v16  ;;  %2292 = vmatmul.mubr.bf16.gmra.mrb[120].mxu1 %v3948_v14 }
 0x1b1   : > { %2010 = vmatprep.mubr.bf16.mxu0 %v3949_v15  ;;  %2299 = vmatprep.mubr.bf16.mxu1 %v3951_v19  ;;  %v658_v19 = vld [vmem:[#allocation2 + $0x80] sm:$0xff] }
 0x1b2   : > { %2379 = vst [vmem:[#allocation2 + $0x38] sm:$0xff] %v2315_v23 }
 0x1b3   : > { %v1796_v24 = vpop.f32.mrb[16].mxu0  ;;  %v2085_v26 = vpop.f32.mrb[16].mxu1 }
 0x1b4   : > { %v1798_v27 = vpop.f32.mrb[17].mxu0  ;;  %v2086_v29 = vadd.f32 %v2085_v26, %v1796_v24  ;;  %v2087_v30 = vpop.f32.mrb[17].mxu1 }
 0x1b5   : > { %v1799_v31 = vpop.f32.mrb[18].mxu0  ;;  %v2088_v34 = vpop.f32.mrb[18].mxu1 }
 0x1b6   : > { %v1801_v35 = vpop.f32.mrb[19].mxu0  ;;  %v2316_v36 = vadd.f32 %v2086_v29, %v650_v25  ;;  %v2089_v37 = vadd.f32 %v2088_v34, %v1799_v31  ;;  %v2090_v38 = vpop.f32.mrb[19].mxu1  ;;  %v659_v25 = vld [vmem:[#allocation2 + $0x88] sm:$0xff] }
 0x1b8   : > { %2011 = vmatmul.mubr.bf16.gmra.mrb[124].mxu0 %v3953_v28  ;;  %2380 = vst [vmem:[#allocation2 + $0x40] sm:$0xff] %v2316_v36  ;;  %v2317_v39 = vadd.f32 %v2089_v37, %v651_v33  ;;  %2300 = vmatmul.mubr.bf16.gmra.mrb[124].mxu1 %v3954_v32  ;;  %v660_v33 = vld [vmem:[#allocation2 + $0x90] sm:$0xff] }
 0x1ba   : > { %2381 = vst [vmem:[#allocation2 + $0x48] sm:$0xff] %v2317_v39  ;;  %v661_v39 = vld [vmem:[#allocation2 + $0x98] sm:$0xff] }
 0x1bb   : > { %v1804_v40 = vpop.f32.mrb[20].mxu0  ;;  %v2093_v42 = vpop.f32.mrb[20].mxu1 }
 0x1bc   : > { %v1806_v43 = vpop.f32.mrb[21].mxu0  ;;  %v2094_v44 = vadd.f32 %v2093_v42, %v1804_v40  ;;  %v2095_v45 = vpop.f32.mrb[21].mxu1 }
 0x1bd   : > { %v1807_v46 = vpop.f32.mrb[22].mxu0  ;;  %v2096_v48 = vpop.f32.mrb[22].mxu1 }
 0x1be   : > { %v1809_v49 = vpop.f32.mrb[23].mxu0  ;;  %v2318_v50 = vadd.f32 %v2094_v44, %v652_v41  ;;  %v2097_v51 = vadd.f32 %v2096_v48, %v1807_v46  ;;  %v2098_v52 = vpop.f32.mrb[23].mxu1 }
 0x1c0   : > { %2382 = vst [vmem:[#allocation2 + $0x50] sm:$0xff] %v2318_v50  ;;  %v2319_v53 = vadd.f32 %v2097_v51, %v653_v47  ;;  %v662_v47 = vld [vmem:[#allocation2 + $0xa0] sm:$0xff] }
 0x1c2   : > { %2383 = vst [vmem:[#allocation2 + $0x58] sm:$0xff] %v2319_v53  ;;  %v663_v53 = vld [vmem:[#allocation2 + $0xa8] sm:$0xff] }
 0x1c3   : > { %v1812_v54 = vpop.f32.mrb[24].mxu0  ;;  %v2101_v56 = vpop.f32.mrb[24].mxu1 }
 0x1c4   : > { %v1814_v57 = vpop.f32.mrb[25].mxu0  ;;  %v2102_v58 = vadd.f32 %v2101_v56, %v1812_v54  ;;  %v2103_v59 = vpop.f32.mrb[25].mxu1 }
 0x1c5   : > { %v1815_v60 = vpop.f32.mrb[26].mxu0  ;;  %v2104_v62 = vpop.f32.mrb[26].mxu1 }
 0x1c6   : > { %v1817_v63 = vpop.f32.mrb[27].mxu0  ;;  %v2320_v0 = vadd.f32 %v2102_v58, %v654_v55  ;;  %v2105_v1 = vadd.f32 %v2104_v62, %v1815_v60  ;;  %v2106_v2 = vpop.f32.mrb[27].mxu1 }
 0x1c8   : > { %2384 = vst [vmem:[#allocation2 + $0x60] sm:$0xff] %v2320_v0  ;;  %v2321_v3 = vadd.f32 %v2105_v1, %v655_v61  ;;  %v664_v61 = vld [vmem:[#allocation2 + $0xb0] sm:$0xff] }
 0x1ca   : > { %2385 = vst [vmem:[#allocation2 + $0x68] sm:$0xff] %v2321_v3  ;;  %v665_v3 = vld [vmem:[#allocation2 + $0xb8] sm:$0xff] }
 0x1cb   : > { %v1820_v4 = vpop.f32.mrb[28].mxu0  ;;  %v2109_v6 = vpop.f32.mrb[28].mxu1 }
 0x1cc   : > { %v1822_v7 = vpop.f32.mrb[29].mxu0  ;;  %v2110_v8 = vadd.f32 %v2109_v6, %v1820_v4  ;;  %v2111_v9 = vpop.f32.mrb[29].mxu1 }
 0x1cd   : > { %v1823_v10 = vpop.f32.mrb[30].mxu0  ;;  %v2112_v12 = vpop.f32.mrb[30].mxu1 }
 0x1ce   : > { %v1825_v13 = vpop.f32.mrb[31].mxu0  ;;  %v2322_v14 = vadd.f32 %v2110_v8, %v656_v5  ;;  %v2113_v15 = vadd.f32 %v2112_v12, %v1823_v10  ;;  %v2114_v16 = vpop.f32.mrb[31].mxu1 }
 0x1d0   : > { %2386 = vst [vmem:[#allocation2 + $0x70] sm:$0xff] %v2322_v14  ;;  %v2323_v17 = vadd.f32 %v2113_v15, %v657_v11  ;;  %v666_v11 = vld [vmem:[#allocation2 + $0xc0] sm:$0xff] }
 0x1d2   : > { %2387 = vst [vmem:[#allocation2 + $0x78] sm:$0xff] %v2323_v17  ;;  %v667_v17 = vld [vmem:[#allocation2 + $0xc8] sm:$0xff] }
 0x1d3   : > { %v1828_v18 = vpop.f32.mrb[32].mxu0  ;;  %v2117_v20 = vpop.f32.mrb[32].mxu1 }
 0x1d4   : > { %v1830_v21 = vpop.f32.mrb[33].mxu0  ;;  %v2118_v22 = vadd.f32 %v2117_v20, %v1828_v18  ;;  %v2119_v23 = vpop.f32.mrb[33].mxu1 }
 0x1d5   : > { %v1831_v24 = vpop.f32.mrb[34].mxu0  ;;  %v2120_v26 = vpop.f32.mrb[34].mxu1 }
 0x1d6   : > { %v1833_v27 = vpop.f32.mrb[35].mxu0  ;;  %v2324_v28 = vadd.f32 %v2118_v22, %v658_v19  ;;  %v2121_v29 = vadd.f32 %v2120_v26, %v1831_v24  ;;  %v2122_v30 = vpop.f32.mrb[35].mxu1 }
 0x1d8   : > { %2388 = vst [vmem:[#allocation2 + $0x80] sm:$0xff] %v2324_v28  ;;  %v2325_v31 = vadd.f32 %v2121_v29, %v659_v25  ;;  %v668_v25 = vld [vmem:[#allocation2 + $0xd0] sm:$0xff] }
 0x1da   : > { %2389 = vst [vmem:[#allocation2 + $0x88] sm:$0xff] %v2325_v31  ;;  %v669_v31 = vld [vmem:[#allocation2 + $0xd8] sm:$0xff] }
 0x1db   : > { %v1836_v32 = vpop.f32.mrb[36].mxu0  ;;  %v2125_v34 = vpop.f32.mrb[36].mxu1 }
 0x1dc   : > { %v1838_v35 = vpop.f32.mrb[37].mxu0  ;;  %v2126_v36 = vadd.f32 %v2125_v34, %v1836_v32  ;;  %v2127_v37 = vpop.f32.mrb[37].mxu1 }
 0x1dd   : > { %v1839_v38 = vpop.f32.mrb[38].mxu0  ;;  %v2128_v40 = vpop.f32.mrb[38].mxu1 }
 0x1de   : > { %v1841_v41 = vpop.f32.mrb[39].mxu0  ;;  %v2326_v42 = vadd.f32 %v2126_v36, %v660_v33  ;;  %v2129_v43 = vadd.f32 %v2128_v40, %v1839_v38  ;;  %v2130_v44 = vpop.f32.mrb[39].mxu1 }
 0x1e0   : > { %2390 = vst [vmem:[#allocation2 + $0x90] sm:$0xff] %v2326_v42  ;;  %v2327_v45 = vadd.f32 %v2129_v43, %v661_v39  ;;  %v670_v39 = vld [vmem:[#allocation2 + $0xe0] sm:$0xff] }
 0x1e2   : > { %2391 = vst [vmem:[#allocation2 + $0x98] sm:$0xff] %v2327_v45  ;;  %v671_v45 = vld [vmem:[#allocation2 + $0xe8] sm:$0xff] }
 0x1e3   : > { %v1844_v46 = vpop.f32.mrb[40].mxu0  ;;  %v2133_v48 = vpop.f32.mrb[40].mxu1 }
 0x1e4   : > { %v1846_v49 = vpop.f32.mrb[41].mxu0  ;;  %v2134_v50 = vadd.f32 %v2133_v48, %v1844_v46  ;;  %v2135_v51 = vpop.f32.mrb[41].mxu1 }
 0x1e5   : > { %v1847_v52 = vpop.f32.mrb[42].mxu0  ;;  %v2136_v54 = vpop.f32.mrb[42].mxu1 }
 0x1e6   : > { %v1849_v55 = vpop.f32.mrb[43].mxu0  ;;  %v2328_v56 = vadd.f32 %v2134_v50, %v662_v47  ;;  %v2137_v57 = vadd.f32 %v2136_v54, %v1847_v52  ;;  %v2138_v58 = vpop.f32.mrb[43].mxu1 }
 0x1e8   : > { %2392 = vst [vmem:[#allocation2 + $0xa0] sm:$0xff] %v2328_v56  ;;  %v2329_v59 = vadd.f32 %v2137_v57, %v663_v53  ;;  %v672_v53 = vld [vmem:[#allocation2 + $0xf0] sm:$0xff] }
 0x1ea   : > { %2393 = vst [vmem:[#allocation2 + $0xa8] sm:$0xff] %v2329_v59  ;;  %v673_v59 = vld [vmem:[#allocation2 + $0xf8] sm:$0xff] }
 0x1eb   : > { %v1852_v60 = vpop.f32.mrb[44].mxu0  ;;  %v2141_v62 = vpop.f32.mrb[44].mxu1 }
 0x1ec   : > { %v1854_v63 = vpop.f32.mrb[45].mxu0  ;;  %v2142_v0 = vadd.f32 %v2141_v62, %v1852_v60  ;;  %v2143_v1 = vpop.f32.mrb[45].mxu1 }
 0x1ed   : > { %v1855_v2 = vpop.f32.mrb[46].mxu0  ;;  %v2144_v4 = vpop.f32.mrb[46].mxu1 }
 0x1ee   : > { %v1857_v5 = vpop.f32.mrb[47].mxu0  ;;  %v2330_v6 = vadd.f32 %v2142_v0, %v664_v61  ;;  %v2145_v7 = vadd.f32 %v2144_v4, %v1855_v2  ;;  %v2146_v8 = vpop.f32.mrb[47].mxu1 }
 0x1f0   : > { %2394 = vst [vmem:[#allocation2 + $0xb0] sm:$0xff] %v2330_v6  ;;  %v2331_v9 = vadd.f32 %v2145_v7, %v665_v3  ;;  %v674_v3 = vld [vmem:[#allocation2 + $0x100] sm:$0xff] }
 0x1f2   : > { %2395 = vst [vmem:[#allocation2 + $0xb8] sm:$0xff] %v2331_v9  ;;  %v675_v9 = vld [vmem:[#allocation2 + $0x108] sm:$0xff] }
 0x1f3   : > { %v1860_v10 = vpop.f32.mrb[48].mxu0  ;;  %v2149_v12 = vpop.f32.mrb[48].mxu1 }
 0x1f4   : > { %v1862_v13 = vpop.f32.mrb[49].mxu0  ;;  %v2150_v14 = vadd.f32 %v2149_v12, %v1860_v10  ;;  %v2151_v15 = vpop.f32.mrb[49].mxu1 }
 0x1f5   : > { %v1863_v16 = vpop.f32.mrb[50].mxu0  ;;  %v2152_v18 = vpop.f32.mrb[50].mxu1 }
 0x1f6   : > { %v1865_v19 = vpop.f32.mrb[51].mxu0  ;;  %v2332_v20 = vadd.f32 %v2150_v14, %v666_v11  ;;  %v2153_v21 = vadd.f32 %v2152_v18, %v1863_v16  ;;  %v2154_v22 = vpop.f32.mrb[51].mxu1 }
 0x1f8   : > { %2396 = vst [vmem:[#allocation2 + $0xc0] sm:$0xff] %v2332_v20  ;;  %v2333_v23 = vadd.f32 %v2153_v21, %v667_v17  ;;  %v676_v17 = vld [vmem:[#allocation2 + $0x110] sm:$0xff] }
 0x1fa   : > { %2397 = vst [vmem:[#allocation2 + $0xc8] sm:$0xff] %v2333_v23  ;;  %v677_v23 = vld [vmem:[#allocation2 + $0x118] sm:$0xff] }
 0x1fb   : > { %v1868_v24 = vpop.f32.mrb[52].mxu0  ;;  %v2157_v26 = vpop.f32.mrb[52].mxu1 }
 0x1fc   : > { %v1870_v27 = vpop.f32.mrb[53].mxu0  ;;  %v2158_v28 = vadd.f32 %v2157_v26, %v1868_v24  ;;  %v2159_v29 = vpop.f32.mrb[53].mxu1 }
 0x1fd   : > { %v1871_v30 = vpop.f32.mrb[54].mxu0  ;;  %v2160_v32 = vpop.f32.mrb[54].mxu1 }
 0x1fe   : > { %v1873_v33 = vpop.f32.mrb[55].mxu0  ;;  %v2334_v34 = vadd.f32 %v2158_v28, %v668_v25  ;;  %v2161_v35 = vadd.f32 %v2160_v32, %v1871_v30  ;;  %v2162_v36 = vpop.f32.mrb[55].mxu1 }
 0x200   : > { %2398 = vst [vmem:[#allocation2 + $0xd0] sm:$0xff] %v2334_v34  ;;  %v2335_v37 = vadd.f32 %v2161_v35, %v669_v31  ;;  %v678_v31 = vld [vmem:[#allocation2 + $0x120] sm:$0xff] }
 0x202   : > { %2399 = vst [vmem:[#allocation2 + $0xd8] sm:$0xff] %v2335_v37  ;;  %v679_v37 = vld [vmem:[#allocation2 + $0x128] sm:$0xff] }
 0x203   : > { %v1876_v38 = vpop.f32.mrb[56].mxu0  ;;  %v2165_v40 = vpop.f32.mrb[56].mxu1 }
 0x204   : > { %v1878_v41 = vpop.f32.mrb[57].mxu0  ;;  %v2166_v42 = vadd.f32 %v2165_v40, %v1876_v38  ;;  %v2167_v43 = vpop.f32.mrb[57].mxu1 }
 0x205   : > { %v1879_v44 = vpop.f32.mrb[58].mxu0  ;;  %v2168_v46 = vpop.f32.mrb[58].mxu1 }
 0x206   : > { %v1881_v47 = vpop.f32.mrb[59].mxu0  ;;  %v2336_v48 = vadd.f32 %v2166_v42, %v670_v39  ;;  %v2169_v49 = vadd.f32 %v2168_v46, %v1879_v44  ;;  %v2170_v50 = vpop.f32.mrb[59].mxu1 }
 0x208   : > { %2400 = vst [vmem:[#allocation2 + $0xe0] sm:$0xff] %v2336_v48  ;;  %v2337_v51 = vadd.f32 %v2169_v49, %v671_v45  ;;  %v680_v45 = vld [vmem:[#allocation2 + $0x130] sm:$0xff] }
 0x20a   : > { %2401 = vst [vmem:[#allocation2 + $0xe8] sm:$0xff] %v2337_v51  ;;  %v681_v51 = vld [vmem:[#allocation2 + $0x138] sm:$0xff] }
 0x20b   : > { %v1884_v52 = vpop.f32.mrb[60].mxu0  ;;  %v2173_v54 = vpop.f32.mrb[60].mxu1 }
 0x20c   : > { %v1886_v55 = vpop.f32.mrb[61].mxu0  ;;  %v2174_v56 = vadd.f32 %v2173_v54, %v1884_v52  ;;  %v2175_v57 = vpop.f32.mrb[61].mxu1 }
 0x20d   : > { %v1887_v58 = vpop.f32.mrb[62].mxu0  ;;  %v2176_v60 = vpop.f32.mrb[62].mxu1 }
 0x20e   : > { %v1889_v61 = vpop.f32.mrb[63].mxu0  ;;  %v2338_v62 = vadd.f32 %v2174_v56, %v672_v53  ;;  %v2177_v63 = vadd.f32 %v2176_v60, %v1887_v58  ;;  %v2178_v0 = vpop.f32.mrb[63].mxu1 }
 0x210   : > { %2402 = vst [vmem:[#allocation2 + $0xf0] sm:$0xff] %v2338_v62  ;;  %v2339_v1 = vadd.f32 %v2177_v63, %v673_v59  ;;  %v682_v59 = vld [vmem:[#allocation2 + $0x140] sm:$0xff] }
 0x212   : > { %2403 = vst [vmem:[#allocation2 + $0xf8] sm:$0xff] %v2339_v1  ;;  %v683_v1 = vld [vmem:[#allocation2 + $0x148] sm:$0xff] }
 0x213   : > { %v1892_v2 = vpop.f32.mrb[64].mxu0  ;;  %v2181_v4 = vpop.f32.mrb[64].mxu1 }
 0x214   : > { %v1894_v5 = vpop.f32.mrb[65].mxu0  ;;  %v2182_v6 = vadd.f32 %v2181_v4, %v1892_v2  ;;  %v2183_v7 = vpop.f32.mrb[65].mxu1 }
 0x215   : > { %v1895_v8 = vpop.f32.mrb[66].mxu0  ;;  %v2184_v10 = vpop.f32.mrb[66].mxu1 }
 0x216   : > { %v1897_v11 = vpop.f32.mrb[67].mxu0  ;;  %v2340_v12 = vadd.f32 %v2182_v6, %v674_v3  ;;  %v2185_v13 = vadd.f32 %v2184_v10, %v1895_v8  ;;  %v2186_v14 = vpop.f32.mrb[67].mxu1 }
 0x218   : > { %2404 = vst [vmem:[#allocation2 + $0x100] sm:$0xff] %v2340_v12  ;;  %v2341_v15 = vadd.f32 %v2185_v13, %v675_v9  ;;  %v684_v9 = vld [vmem:[#allocation2 + $0x150] sm:$0xff] }
 0x21a   : > { %2405 = vst [vmem:[#allocation2 + $0x108] sm:$0xff] %v2341_v15  ;;  %v685_v15 = vld [vmem:[#allocation2 + $0x158] sm:$0xff] }
 0x21b   : > { %v1900_v16 = vpop.f32.mrb[68].mxu0  ;;  %v2189_v18 = vpop.f32.mrb[68].mxu1 }
 0x21c   : > { %v1902_v19 = vpop.f32.mrb[69].mxu0  ;;  %v2190_v20 = vadd.f32 %v2189_v18, %v1900_v16  ;;  %v2191_v21 = vpop.f32.mrb[69].mxu1 }
 0x21d   : > { %v1903_v22 = vpop.f32.mrb[70].mxu0  ;;  %v2192_v24 = vpop.f32.mrb[70].mxu1 }
 0x21e   : > { %v1905_v25 = vpop.f32.mrb[71].mxu0  ;;  %v2342_v26 = vadd.f32 %v2190_v20, %v676_v17  ;;  %v2193_v27 = vadd.f32 %v2192_v24, %v1903_v22  ;;  %v2194_v28 = vpop.f32.mrb[71].mxu1 }
 0x220   : > { %2406 = vst [vmem:[#allocation2 + $0x110] sm:$0xff] %v2342_v26  ;;  %v2343_v29 = vadd.f32 %v2193_v27, %v677_v23  ;;  %v686_v23 = vld [vmem:[#allocation2 + $0x160] sm:$0xff] }
 0x222   : > { %2407 = vst [vmem:[#allocation2 + $0x118] sm:$0xff] %v2343_v29  ;;  %v687_v29 = vld [vmem:[#allocation2 + $0x168] sm:$0xff] }
 0x223   : > { %v1908_v30 = vpop.f32.mrb[72].mxu0  ;;  %v2197_v32 = vpop.f32.mrb[72].mxu1 }
 0x224   : > { %v1910_v33 = vpop.f32.mrb[73].mxu0  ;;  %v2198_v34 = vadd.f32 %v2197_v32, %v1908_v30  ;;  %v2199_v35 = vpop.f32.mrb[73].mxu1 }
 0x225   : > { %v1911_v36 = vpop.f32.mrb[74].mxu0  ;;  %v2200_v38 = vpop.f32.mrb[74].mxu1 }
 0x226   : > { %v1913_v39 = vpop.f32.mrb[75].mxu0  ;;  %v2344_v40 = vadd.f32 %v2198_v34, %v678_v31  ;;  %v2201_v41 = vadd.f32 %v2200_v38, %v1911_v36  ;;  %v2202_v42 = vpop.f32.mrb[75].mxu1 }
 0x228   : > { %2408 = vst [vmem:[#allocation2 + $0x120] sm:$0xff] %v2344_v40  ;;  %v2345_v43 = vadd.f32 %v2201_v41, %v679_v37  ;;  %v688_v37 = vld [vmem:[#allocation2 + $0x170] sm:$0xff] }
 0x22a   : > { %2409 = vst [vmem:[#allocation2 + $0x128] sm:$0xff] %v2345_v43  ;;  %v689_v43 = vld [vmem:[#allocation2 + $0x178] sm:$0xff] }
 0x22b   : > { %v1916_v44 = vpop.f32.mrb[76].mxu0  ;;  %v2205_v46 = vpop.f32.mrb[76].mxu1 }
 0x22c   : > { %v1918_v47 = vpop.f32.mrb[77].mxu0  ;;  %v2206_v48 = vadd.f32 %v2205_v46, %v1916_v44  ;;  %v2207_v49 = vpop.f32.mrb[77].mxu1 }
 0x22d   : > { %v1919_v50 = vpop.f32.mrb[78].mxu0  ;;  %v2208_v52 = vpop.f32.mrb[78].mxu1 }
 0x22e   : > { %v1921_v53 = vpop.f32.mrb[79].mxu0  ;;  %v2346_v54 = vadd.f32 %v2206_v48, %v680_v45  ;;  %v2209_v55 = vadd.f32 %v2208_v52, %v1919_v50  ;;  %v2210_v56 = vpop.f32.mrb[79].mxu1 }
 0x230   : > { %2410 = vst [vmem:[#allocation2 + $0x130] sm:$0xff] %v2346_v54  ;;  %v2347_v57 = vadd.f32 %v2209_v55, %v681_v51  ;;  %v690_v51 = vld [vmem:[#allocation2 + $0x180] sm:$0xff] }
 0x232   : > { %2411 = vst [vmem:[#allocation2 + $0x138] sm:$0xff] %v2347_v57  ;;  %v691_v57 = vld [vmem:[#allocation2 + $0x188] sm:$0xff] }
 0x233   : > { %v1924_v58 = vpop.f32.mrb[80].mxu0  ;;  %v2213_v60 = vpop.f32.mrb[80].mxu1 }
 0x234   : > { %v1926_v61 = vpop.f32.mrb[81].mxu0  ;;  %v2214_v62 = vadd.f32 %v2213_v60, %v1924_v58  ;;  %v2215_v63 = vpop.f32.mrb[81].mxu1 }
 0x235   : > { %v1927_v0 = vpop.f32.mrb[82].mxu0  ;;  %v2216_v2 = vpop.f32.mrb[82].mxu1 }
 0x236   : > { %v1929_v3 = vpop.f32.mrb[83].mxu0  ;;  %v2348_v4 = vadd.f32 %v2214_v62, %v682_v59  ;;  %v2217_v5 = vadd.f32 %v2216_v2, %v1927_v0  ;;  %v2218_v6 = vpop.f32.mrb[83].mxu1 }
 0x238   : > { %2412 = vst [vmem:[#allocation2 + $0x140] sm:$0xff] %v2348_v4  ;;  %v2349_v7 = vadd.f32 %v2217_v5, %v683_v1  ;;  %v692_v1 = vld [vmem:[#allocation2 + $0x190] sm:$0xff] }
 0x23a   : > { %2413 = vst [vmem:[#allocation2 + $0x148] sm:$0xff] %v2349_v7  ;;  %v693_v7 = vld [vmem:[#allocation2 + $0x198] sm:$0xff] }
 0x23b   : > { %v1932_v8 = vpop.f32.mrb[84].mxu0  ;;  %v2221_v10 = vpop.f32.mrb[84].mxu1 }
 0x23c   : > { %v1934_v11 = vpop.f32.mrb[85].mxu0  ;;  %v2222_v12 = vadd.f32 %v2221_v10, %v1932_v8  ;;  %v2223_v13 = vpop.f32.mrb[85].mxu1 }
 0x23d   : > { %v1935_v14 = vpop.f32.mrb[86].mxu0  ;;  %v2224_v16 = vpop.f32.mrb[86].mxu1 }
 0x23e   : > { %v1937_v17 = vpop.f32.mrb[87].mxu0  ;;  %v2350_v18 = vadd.f32 %v2222_v12, %v684_v9  ;;  %v2225_v19 = vadd.f32 %v2224_v16, %v1935_v14  ;;  %v2226_v20 = vpop.f32.mrb[87].mxu1 }
 0x240   : > { %2414 = vst [vmem:[#allocation2 + $0x150] sm:$0xff] %v2350_v18  ;;  %v2351_v21 = vadd.f32 %v2225_v19, %v685_v15  ;;  %v694_v15 = vld [vmem:[#allocation2 + $0x1a0] sm:$0xff] }
 0x242   : > { %2415 = vst [vmem:[#allocation2 + $0x158] sm:$0xff] %v2351_v21  ;;  %v695_v21 = vld [vmem:[#allocation2 + $0x1a8] sm:$0xff] }
 0x243   : > { %v1940_v22 = vpop.f32.mrb[88].mxu0  ;;  %v2229_v24 = vpop.f32.mrb[88].mxu1 }
 0x244   : > { %v1942_v25 = vpop.f32.mrb[89].mxu0  ;;  %v2230_v26 = vadd.f32 %v2229_v24, %v1940_v22  ;;  %v2231_v27 = vpop.f32.mrb[89].mxu1 }
 0x245   : > { %v1943_v28 = vpop.f32.mrb[90].mxu0  ;;  %v2232_v30 = vpop.f32.mrb[90].mxu1 }
 0x246   : > { %v1945_v31 = vpop.f32.mrb[91].mxu0  ;;  %v2352_v32 = vadd.f32 %v2230_v26, %v686_v23  ;;  %v2233_v33 = vadd.f32 %v2232_v30, %v1943_v28  ;;  %v2234_v34 = vpop.f32.mrb[91].mxu1 }
 0x248   : > { %2416 = vst [vmem:[#allocation2 + $0x160] sm:$0xff] %v2352_v32  ;;  %v2353_v35 = vadd.f32 %v2233_v33, %v687_v29  ;;  %v696_v29 = vld [vmem:[#allocation2 + $0x1b0] sm:$0xff] }
 0x24a   : > { %2417 = vst [vmem:[#allocation2 + $0x168] sm:$0xff] %v2353_v35  ;;  %v697_v35 = vld [vmem:[#allocation2 + $0x1b8] sm:$0xff] }
 0x24b   : > { %v1948_v36 = vpop.f32.mrb[92].mxu0  ;;  %v2237_v38 = vpop.f32.mrb[92].mxu1 }
 0x24c   : > { %v1950_v39 = vpop.f32.mrb[93].mxu0  ;;  %v2238_v40 = vadd.f32 %v2237_v38, %v1948_v36  ;;  %v2239_v41 = vpop.f32.mrb[93].mxu1 }
 0x24d   : > { %v1951_v42 = vpop.f32.mrb[94].mxu0  ;;  %v2240_v44 = vpop.f32.mrb[94].mxu1 }
 0x24e   : > { %v1953_v45 = vpop.f32.mrb[95].mxu0  ;;  %v2354_v46 = vadd.f32 %v2238_v40, %v688_v37  ;;  %v2241_v47 = vadd.f32 %v2240_v44, %v1951_v42  ;;  %v2242_v48 = vpop.f32.mrb[95].mxu1 }
 0x250   : > { %2418 = vst [vmem:[#allocation2 + $0x170] sm:$0xff] %v2354_v46  ;;  %v2355_v49 = vadd.f32 %v2241_v47, %v689_v43  ;;  %v698_v43 = vld [vmem:[#allocation2 + $0x1c0] sm:$0xff] }
 0x252   : > { %2419 = vst [vmem:[#allocation2 + $0x178] sm:$0xff] %v2355_v49  ;;  %v699_v49 = vld [vmem:[#allocation2 + $0x1c8] sm:$0xff] }
 0x253   : > { %v1956_v50 = vpop.f32.mrb[96].mxu0  ;;  %v2245_v52 = vpop.f32.mrb[96].mxu1 }
 0x254   : > { %v1958_v53 = vpop.f32.mrb[97].mxu0  ;;  %v2246_v54 = vadd.f32 %v2245_v52, %v1956_v50  ;;  %v2247_v55 = vpop.f32.mrb[97].mxu1 }
 0x255   : > { %v1959_v56 = vpop.f32.mrb[98].mxu0  ;;  %v2248_v58 = vpop.f32.mrb[98].mxu1 }
 0x256   : > { %v1961_v59 = vpop.f32.mrb[99].mxu0  ;;  %v2356_v60 = vadd.f32 %v2246_v54, %v690_v51  ;;  %v2249_v61 = vadd.f32 %v2248_v58, %v1959_v56  ;;  %v2250_v62 = vpop.f32.mrb[99].mxu1 }
 0x258   : > { %2420 = vst [vmem:[#allocation2 + $0x180] sm:$0xff] %v2356_v60  ;;  %v2357_v63 = vadd.f32 %v2249_v61, %v691_v57  ;;  %v700_v57 = vld [vmem:[#allocation2 + $0x1d0] sm:$0xff] }
 0x25a   : > { %2421 = vst [vmem:[#allocation2 + $0x188] sm:$0xff] %v2357_v63  ;;  %v701_v63 = vld [vmem:[#allocation2 + $0x1d8] sm:$0xff] }
 0x25b   : > { %v1964_v0 = vpop.f32.mrb[100].mxu0  ;;  %v2253_v2 = vpop.f32.mrb[100].mxu1 }
 0x25c   : > { %v1966_v3 = vpop.f32.mrb[101].mxu0  ;;  %v2254_v4 = vadd.f32 %v2253_v2, %v1964_v0  ;;  %v2255_v5 = vpop.f32.mrb[101].mxu1 }
 0x25d   : > { %v1967_v6 = vpop.f32.mrb[102].mxu0  ;;  %v2256_v8 = vpop.f32.mrb[102].mxu1 }
 0x25e   : > { %v1969_v9 = vpop.f32.mrb[103].mxu0  ;;  %v2358_v10 = vadd.f32 %v2254_v4, %v692_v1  ;;  %v2257_v11 = vadd.f32 %v2256_v8, %v1967_v6  ;;  %v2258_v12 = vpop.f32.mrb[103].mxu1 }
 0x260   : > { %2422 = vst [vmem:[#allocation2 + $0x190] sm:$0xff] %v2358_v10  ;;  %v2359_v13 = vadd.f32 %v2257_v11, %v693_v7  ;;  %v702_v7 = vld [vmem:[#allocation2 + $0x1e0] sm:$0xff] }
 0x262   : > { %2423 = vst [vmem:[#allocation2 + $0x198] sm:$0xff] %v2359_v13  ;;  %v703_v13 = vld [vmem:[#allocation2 + $0x1e8] sm:$0xff] }
 0x263   : > { %v1972_v14 = vpop.f32.mrb[104].mxu0  ;;  %v2261_v16 = vpop.f32.mrb[104].mxu1 }
 0x264   : > { %v1974_v17 = vpop.f32.mrb[105].mxu0  ;;  %v2262_v18 = vadd.f32 %v2261_v16, %v1972_v14  ;;  %v2263_v19 = vpop.f32.mrb[105].mxu1 }
 0x265   : > { %v1975_v20 = vpop.f32.mrb[106].mxu0  ;;  %v2264_v22 = vpop.f32.mrb[106].mxu1 }
 0x266   : > { %v1977_v23 = vpop.f32.mrb[107].mxu0  ;;  %v2360_v24 = vadd.f32 %v2262_v18, %v694_v15  ;;  %v2265_v25 = vadd.f32 %v2264_v22, %v1975_v20  ;;  %v2266_v26 = vpop.f32.mrb[107].mxu1 }
 0x268   : > { %2424 = vst [vmem:[#allocation2 + $0x1a0] sm:$0xff] %v2360_v24  ;;  %v2361_v27 = vadd.f32 %v2265_v25, %v695_v21  ;;  %v704_v21 = vld [vmem:[#allocation2 + $0x1f0] sm:$0xff] }
 0x26a   : > { %2425 = vst [vmem:[#allocation2 + $0x1a8] sm:$0xff] %v2361_v27  ;;  %v705_v27 = vld [vmem:[#allocation2 + $0x1f8] sm:$0xff] }
 0x26b   : > { %v1980_v28 = vpop.f32.mrb[108].mxu0  ;;  %v2269_v30 = vpop.f32.mrb[108].mxu1 }
 0x26c   : > { %v1982_v31 = vpop.f32.mrb[109].mxu0  ;;  %v2270_v32 = vadd.f32 %v2269_v30, %v1980_v28  ;;  %v2271_v33 = vpop.f32.mrb[109].mxu1 }
 0x26d   : > { %v1983_v34 = vpop.f32.mrb[110].mxu0  ;;  %v2272_v36 = vpop.f32.mrb[110].mxu1 }
 0x26e   : > { %v1985_v37 = vpop.f32.mrb[111].mxu0  ;;  %v2362_v38 = vadd.f32 %v2270_v32, %v696_v29  ;;  %v2273_v39 = vadd.f32 %v2272_v36, %v1983_v34  ;;  %v2274_v40 = vpop.f32.mrb[111].mxu1  ;;  %v2440_v34 = vld [vmem:[#allocation2] sm:$0xff] (!%p3362_p11)  ;;  %v2442_v36 = vld [vmem:[#allocation2 + $0x10] sm:$0xff] (!%p3362_p11) }
 0x270   : > { %2426 = vst [vmem:[#allocation2 + $0x1b0] sm:$0xff] %v2362_v38  ;;  %v2363_v41 = vadd.f32 %v2273_v39, %v697_v35  ;;  %v2441_v35 = vld [vmem:[#allocation2 + $0x8] sm:$0xff] (!%p3362_p11)  ;;  %v2894_v39 = vmul.f32 (!%p3362_p11), %v2440_v34, %v2440_v34 }
 0x271   : > { %v3501_v37 = vpack.c.bf16 (!%p3362_p11), %v2441_v35, %v2440_v34  ;;  %v2824_v38 = vadd.f32 (!%p3362_p11), %v2441_v35, %v2440_v34  ;;  %v2895_v40 = vmul.f32 (!%p3362_p11), %v2441_v35, %v2441_v35  ;;  %v4689_v34 = vld [vmem:[#allocation2 + $0xe8] sm:$0xff] (!%p3362_p11) }
 0x272   : > { %2427 = vst [vmem:[#allocation2 + $0x1b8] sm:$0xff] %v2363_v41  ;;  %v2443_v41 = vld [vmem:[#allocation2 + $0x18] sm:$0xff] (!%p3362_p11) }
 0x273   : > { %v1988_v42 = vpop.f32.mrb[112].mxu0  ;;  %v2277_v44 = vpop.f32.mrb[112].mxu1  ;;  %3502 = vst [vmem:[%s5049_s2] sm:$0xff] (!%p3362_p11), %v3501_v37   ;;  %v4701_v37 = vld [vmem:[#allocation2 + $0xf0] sm:$0xff] (!%p3362_p11) }
 0x274   : > { %v1990_v45 = vpop.f32.mrb[113].mxu0  ;;  %v2278_v46 = vadd.f32 %v2277_v44, %v1988_v42  ;;  %v2279_v47 = vpop.f32.mrb[113].mxu1  ;;  %v2444_v42 = vld [vmem:[#allocation2 + $0x20] sm:$0xff] (!%p3362_p11)  ;;  %v3506_v44 = vpack.c.bf16 (!%p3362_p11), %v2443_v41, %v2442_v36 }
 0x275   : > { %v1991_v48 = vpop.f32.mrb[114].mxu0  ;;  %v2280_v50 = vpop.f32.mrb[114].mxu1  ;;  %v2896_v45 = vmul.f32 (!%p3362_p11), %v2442_v36, %v2442_v36  ;;  %v2446_v47 = vld [vmem:[#allocation2 + $0x30] sm:$0xff] (!%p3362_p11) }
 0x276   : > { %v1993_v51 = vpop.f32.mrb[115].mxu0  ;;  %v2364_v52 = vadd.f32 %v2278_v46, %v698_v43  ;;  %v2281_v53 = vadd.f32 %v2280_v50, %v1991_v48  ;;  %v2282_v54 = vpop.f32.mrb[115].mxu1  ;;  %v2445_v43 = vld [vmem:[#allocation2 + $0x28] sm:$0xff] (!%p3362_p11)  ;;  %v2958_v48 = vadd.f32 (!%p3362_p11), %v2895_v40, %v2894_v39  ;;  %v2897_v50 = vmul.f32 (!%p3362_p11), %v2443_v41, %v2443_v41  ;;  %3658 = vst [vmem:[%s5049_s2 + $0x8] sm:$0xff] (!%p3362_p11), %v3506_v44  }
 0x277   : > { %v3511_v46 = vpack.c.bf16 (!%p3362_p11), %v2445_v43, %v2444_v42  ;;  %v2447_v51 = vld [vmem:[#allocation2 + $0x38] sm:$0xff] (!%p3362_p11) }
 0x278   : > { %2428 = vst [vmem:[#allocation2 + $0x1c0] sm:$0xff] %v2364_v52  ;;  %v2365_v55 = vadd.f32 %v2281_v53, %v699_v49  ;;  %v2825_v49 = vadd.f32 (!%p3362_p11), %v2824_v38, %v2442_v36  ;;  %v4597_v52 = vld [vmem:[#allocation2 + $0x40] sm:$0xff] (!%p3362_p11)  ;;  %v4599_v53 = vld [vmem:[#allocation2 + $0x48] sm:$0xff] (!%p3362_p11)  ;;  %v3516_v54 = vpack.c.bf16 (!%p3362_p11), %v2447_v51, %v2446_v47 }
 0x279   : > { %3659 = vst [vmem:[%s5049_s2 + $0x10] sm:$0xff] (!%p3362_p11), %v3511_v46   ;;  %v2903_v40 = vmul.f32 (!%p3362_p11), %v4599_v53, %v4599_v53  ;;  %v4722_v46 = vld [vmem:[#allocation2 + $0x110] sm:$0xff] (!%p3362_p11) }
 0x27a   : > { %2429 = vst [vmem:[#allocation2 + $0x1c8] sm:$0xff] %v2365_v55  ;;  %v3521_v55 = vpack.c.bf16 (!%p3362_p11), %v4599_v53, %v4597_v52  ;;  %3660 = vst [vmem:[%s5049_s2 + $0x18] sm:$0xff] (!%p3362_p11), %v3516_v54  }
 0x27b   : > { %v1996_v56 = vpop.f32.mrb[116].mxu0  ;;  %v2285_v58 = vpop.f32.mrb[116].mxu1 }
 0x27c   : > { %v1998_v59 = vpop.f32.mrb[117].mxu0  ;;  %v2286_v60 = vadd.f32 %v2285_v58, %v1996_v56  ;;  %v2287_v61 = vpop.f32.mrb[117].mxu1  ;;  %v4609_v56 = vld [vmem:[#allocation2 + $0x50] sm:$0xff] (!%p3362_p11)  ;;  %v2959_v58 = vadd.f32 (!%p3362_p11), %v2958_v48, %v2896_v45  ;;  %3661 = vst [vmem:[%s5049_s2 + $0x20] sm:$0xff] (!%p3362_p11), %v3521_v55  }
 0x27d   : > { %v1999_v62 = vpop.f32.mrb[118].mxu0  ;;  %v2288_v0 = vpop.f32.mrb[118].mxu1  ;;  %v2898_v59 = vmul.f32 (!%p3362_p11), %v2444_v42, %v2444_v42  ;;  %v4613_v61 = vld [vmem:[#allocation2 + $0x60] sm:$0xff] (!%p3362_p11)  ;;  %v4743_v55 = vld [vmem:[#allocation2 + $0x130] sm:$0xff] (!%p3362_p11) }
 0x27e   : > { %v2001_v1 = vpop.f32.mrb[119].mxu0  ;;  %v2366_v2 = vadd.f32 %v2286_v60, %v700_v57  ;;  %v2289_v3 = vadd.f32 %v2288_v0, %v1999_v62  ;;  %v2290_v4 = vpop.f32.mrb[119].mxu1  ;;  %v2826_v57 = vadd.f32 (!%p3362_p11), %v2825_v49, %v2443_v41  ;;  %v4611_v60 = vld [vmem:[#allocation2 + $0x58] sm:$0xff] (!%p3362_p11)  ;;  %v4615_v62 = vld [vmem:[#allocation2 + $0x68] sm:$0xff] (!%p3362_p11)  ;;  %v2904_v49 = vmul.f32 (!%p3362_p11), %v4609_v56, %v4609_v56 }
 0x27f   : > { %v3531_v0 = vpack.c.bf16 (!%p3362_p11), %v4615_v62, %v4613_v61  ;;  %v4627_v1 = vld [vmem:[#allocation2 + $0x70] sm:$0xff] (!%p3362_p11)  ;;  %v2899_v4 = vmul.f32 (!%p3362_p11), %v2445_v43, %v2445_v43  ;;  %v4706_v41 = vld [vmem:[#allocation2 + $0xf8] sm:$0xff] (!%p3362_p11) }
 0x280   : > { %2430 = vst [vmem:[#allocation2 + $0x1d0] sm:$0xff] %v2366_v2  ;;  %v2367_v5 = vadd.f32 %v2289_v3, %v701_v63  ;;  %v3526_v63 = vpack.c.bf16 (!%p3362_p11), %v4611_v60, %v4609_v56  ;;  %v2960_v2 = vadd.f32 (!%p3362_p11), %v2959_v58, %v2897_v50  ;;  %v2827_v3 = vadd.f32 (!%p3362_p11), %v2826_v57, %v2444_v42  ;;  %v4708_v42 = vld [vmem:[#allocation2 + $0x100] sm:$0xff] (!%p3362_p11)  ;;  %v4727_v50 = vld [vmem:[#allocation2 + $0x118] sm:$0xff] (!%p3362_p11) }
 0x281   : > { %3663 = vst [vmem:[%s5049_s2 + $0x30] sm:$0xff] (!%p3362_p11), %v3531_v0   ;;  %v3576_v44 = vpack.c.bf16 (!%p3362_p11), %v4706_v41, %v4701_v37  ;;  %v4750_v0 = vld [vmem:[#allocation2 + $0x140] sm:$0xff] (!%p3362_p11) }
 0x282   : > { %2431 = vst [vmem:[#allocation2 + $0x1d8] sm:$0xff] %v2367_v5  ;;  %v4629_v5 = vld [vmem:[#allocation2 + $0x78] sm:$0xff] (!%p3362_p11)  ;;  %3662 = vst [vmem:[%s5049_s2 + $0x28] sm:$0xff] (!%p3362_p11), %v3526_v63  }
 0x283   : > { %v2004_v6 = vpop.f32.mrb[120].mxu0  ;;  %v2293_v8 = vpop.f32.mrb[120].mxu1  ;;  %3672 = vst [vmem:[%s5049_s2 + $0x78] sm:$0xff] (!%p3362_p11), %v3576_v44   ;;  %v4748_v63 = vld [vmem:[#allocation2 + $0x138] sm:$0xff] (!%p3362_p11)  ;;  %v4813_v44 = vld [vmem:[#allocation2 + $0x1a0] sm:$0xff] (!%p3362_p11) }
 0x284   : > { %v2006_v9 = vpop.f32.mrb[121].mxu0  ;;  %v2294_v10 = vadd.f32 %v2293_v8, %v2004_v6  ;;  %v2295_v11 = vpop.f32.mrb[121].mxu1  ;;  %v4631_v6 = vld [vmem:[#allocation2 + $0x80] sm:$0xff] (!%p3362_p11)  ;;  %v3536_v8 = vpack.c.bf16 (!%p3362_p11), %v4629_v5, %v4627_v1 }
 0x285   : > { %v2007_v12 = vpop.f32.mrb[122].mxu0  ;;  %v2296_v14 = vpop.f32.mrb[122].mxu1  ;;  %v2828_v11 = vadd.f32 (!%p3362_p11), %v2827_v3, %v2445_v43  ;;  %v4710_v43 = vld [vmem:[#allocation2 + $0x108] sm:$0xff] (!%p3362_p11) }
 0x286   : > { %v2009_v15 = vpop.f32.mrb[123].mxu0  ;;  %v2368_v16 = vadd.f32 %v2294_v10, %v702_v7  ;;  %v2297_v17 = vadd.f32 %v2296_v14, %v2007_v12  ;;  %v2298_v18 = vpop.f32.mrb[123].mxu1  ;;  %v4633_v7 = vld [vmem:[#allocation2 + $0x88] sm:$0xff] (!%p3362_p11)  ;;  %v4645_v10 = vld [vmem:[#allocation2 + $0x90] sm:$0xff] (!%p3362_p11)  ;;  %v2961_v12 = vadd.f32 (!%p3362_p11), %v2960_v2, %v2898_v59  ;;  %v4647_v14 = vld [vmem:[#allocation2 + $0x98] sm:$0xff] (!%p3362_p11)  ;;  %3664 = vst [vmem:[%s5049_s2 + $0x38] sm:$0xff] (!%p3362_p11), %v3536_v8   ;;  %v3581_v45 = vpack.c.bf16 (!%p3362_p11), %v4710_v43, %v4708_v42 }
 0x287   : > { %v3541_v9 = vpack.c.bf16 (!%p3362_p11), %v4633_v7, %v4631_v6  ;;  %v4649_v15 = vld [vmem:[#allocation2 + $0xa0] sm:$0xff] (!%p3362_p11)  ;;  %v2905_v59 = vmul.f32 (!%p3362_p11), %v4611_v60, %v4611_v60  ;;  %v4752_v2 = vld [vmem:[#allocation2 + $0x148] sm:$0xff] (!%p3362_p11) }
 0x288   : > { %2432 = vst [vmem:[#allocation2 + $0x1e0] sm:$0xff] %v2368_v16  ;;  %v2369_v19 = vadd.f32 %v2297_v17, %v703_v13  ;;  %v2900_v13 = vmul.f32 (!%p3362_p11), %v2446_v47, %v2446_v47  ;;  %v4651_v16 = vld [vmem:[#allocation2 + $0xa8] sm:$0xff] (!%p3362_p11)  ;;  %v3546_v17 = vpack.c.bf16 (!%p3362_p11), %v4647_v14, %v4645_v10  ;;  %3673 = vst [vmem:[%s5049_s2 + $0x80] sm:$0xff] (!%p3362_p11), %v3581_v45  }
 0x289   : > { %3665 = vst [vmem:[%s5049_s2 + $0x40] sm:$0xff] (!%p3362_p11), %v3541_v9   ;;  %v3551_v18 = vpack.c.bf16 (!%p3362_p11), %v4651_v16, %v4649_v15  ;;  %v3601_v3 = vpack.c.bf16 (!%p3362_p11), %v4752_v2, %v4750_v0  ;;  %v4815_v45 = vld [vmem:[#allocation2 + $0x1a8] sm:$0xff] (!%p3362_p11) }
 0x28a   : > { %2433 = vst [vmem:[#allocation2 + $0x1e8] sm:$0xff] %v2369_v19  ;;  %v4663_v19 = vld [vmem:[#allocation2 + $0xb0] sm:$0xff] (!%p3362_p11)  ;;  %3666 = vst [vmem:[%s5049_s2 + $0x48] sm:$0xff] (!%p3362_p11), %v3546_v17   ;;  %v4773_v17 = vld [vmem:[#allocation2 + $0x168] sm:$0xff] (!%p3362_p11) }
 0x28b   : > { %v2012_v20 = vpop.f32.mrb[124].mxu0  ;;  %v2301_v22 = vpop.f32.mrb[124].mxu1  ;;  %3667 = vst [vmem:[%s5049_s2 + $0x50] sm:$0xff] (!%p3362_p11), %v3551_v18   ;;  %3677 = vst [vmem:[%s5049_s2 + $0xa0] sm:$0xff] (!%p3362_p11), %v3601_v3   ;;  %v4848_v3 = vld [vmem:[#allocation2 + $0x1d0] sm:$0xff] (!%p3362_p11) }
 0x28c   : > { %v2014_v23 = vpop.f32.mrb[125].mxu0  ;;  %v2302_v24 = vadd.f32 %v2301_v22, %v2012_v20  ;;  %v2303_v25 = vpop.f32.mrb[125].mxu1  ;;  %2439 = sbr.rel (%p3362_p11) target bundleno = 785 (0x311), region = 59  ;;  %v2962_v20 = vadd.f32 (!%p3362_p11), %v2961_v12, %v2899_v4  ;;  %v2901_v22 = vmul.f32 (!%p3362_p11), %v2447_v51, %v2447_v51  ;;  %v4764_v4 = vld [vmem:[#allocation2 + $0x150] sm:$0xff] (!%p3362_p11)  ;;  %v4769_v12 = vld [vmem:[#allocation2 + $0x158] sm:$0xff] (!%p3362_p11) }
 0x28d   : > { %v2015_v26 = vpop.f32.mrb[126].mxu0  ;;  %v2304_v28 = vpop.f32.mrb[126].mxu1  ;;  %v4665_v23 = vld [vmem:[#allocation2 + $0xb8] sm:$0xff] (!%p3362_p11)  ;;  %v4669_v25 = vld [vmem:[#allocation2 + $0xc8] sm:$0xff] (!%p3362_p11) }
 0x28e   : > { %v2017_v29 = vpop.f32.mrb[127].mxu0  ;;  %v2370_v30 = vadd.f32 %v2302_v24, %v704_v21  ;;  %v2305_v31 = vadd.f32 %v2304_v28, %v2015_v26  ;;  %v2306_v32 = vpop.f32.mrb[127].mxu1  ;;  %v2829_v21 = vadd.f32 (!%p3362_p11), %v2828_v11, %v2446_v47  ;;  %v4667_v24 = vld [vmem:[#allocation2 + $0xc0] sm:$0xff] (!%p3362_p11)  ;;  %v3556_v26 = vpack.c.bf16 (!%p3362_p11), %v4665_v23, %v4663_v19  ;;  %v4681_v28 = vld [vmem:[#allocation2 + $0xd0] sm:$0xff] (!%p3362_p11) }
 0x28f   : > { %v4685_v32 = vld [vmem:[#allocation2 + $0xd8] sm:$0xff] (!%p3362_p11)  ;;  %v2906_v11 = vmul.f32 (!%p3362_p11), %v4613_v61, %v4613_v61 }
 0x290   : > { %2434 = vst [vmem:[#allocation2 + $0x1f0] sm:$0xff] %v2370_v30  ;;  %v2371_v33 = vadd.f32 %v2305_v31, %v705_v27  ;;  %v3561_v27 = vpack.c.bf16 (!%p3362_p11), %v4669_v25, %v4667_v24  ;;  %v2830_v29 = vadd.f32 (!%p3362_p11), %v2829_v21, %v2447_v51  ;;  %v2963_v30 = vadd.f32 (!%p3362_p11), %v2962_v20, %v2900_v13  ;;  %v4729_v51 = vld [vmem:[#allocation2 + $0x120] sm:$0xff] (!%p3362_p11)  ;;  %v4785_v20 = vld [vmem:[#allocation2 + $0x170] sm:$0xff] (!%p3362_p11) }
 0x291   : > { %v2902_v31 = vmul.f32 (!%p3362_p11), %v4597_v52, %v4597_v52  ;;  %3668 = vst [vmem:[%s5049_s2 + $0x58] sm:$0xff] (!%p3362_p11), %v3556_v26   ;;  %v3566_v35 = vpack.c.bf16 (!%p3362_p11), %v4685_v32, %v4681_v28  ;;  %v4771_v13 = vld [vmem:[#allocation2 + $0x160] sm:$0xff] (!%p3362_p11)  ;;  %v2907_v26 = vmul.f32 (!%p3362_p11), %v4615_v62, %v4615_v62 }
 0x292   : > { %2435 = vst [vmem:[#allocation2 + $0x1f8] sm:$0xff] %v2371_v33  ;;  %v4687_v33 = vld [vmem:[#allocation2 + $0xe0] sm:$0xff] (!%p3362_p11)  ;;  %3669 = vst [vmem:[%s5049_s2 + $0x60] sm:$0xff] (!%p3362_p11), %v3561_v27   ;;  %v2964_v38 = vadd.f32 (!%p3362_p11), %v2963_v30, %v2901_v22  ;;  %v2831_v39 = vadd.f32 (!%p3362_p11), %v2830_v29, %v4597_v52  ;;  %v4731_v52 = vld [vmem:[#allocation2 + $0x128] sm:$0xff] (!%p3362_p11)  ;;  %v3611_v18 = vpack.c.bf16 (!%p3362_p11), %v4773_v17, %v4771_v13 }
 0x293   : > { %v3571_v36 = vpack.c.bf16 %v4689_v34, %v4687_v33  ;;  %3670 = vst [vmem:[%s5049_s2 + $0x68] sm:$0xff] %v3566_v35   ;;  %v3591_v54 = vpack.c.bf16 %v4731_v52, %v4729_v51  ;;  %v4790_v27 = vld [vmem:[#allocation2 + $0x178] sm:$0xff]  ;;  %v4792_v29 = vld [vmem:[#allocation2 + $0x180] sm:$0xff]  ;;  %v4794_v30 = vld [vmem:[#allocation2 + $0x188] sm:$0xff] }
 0x294   : > { %v2832_v47 = vadd.f32 %v2831_v39, %v4599_v53  ;;  %v2965_v48 = vadd.f32 %v2964_v38, %v2902_v31  ;;  %v3586_v53 = vpack.c.bf16 %v4727_v50, %v4722_v46  ;;  %3679 = vst [vmem:[%s5049_s2 + $0xb0] sm:$0xff] %v3611_v18   ;;  %v3621_v31 = vpack.c.bf16 %v4794_v30, %v4792_v29  ;;  %v4806_v35 = vld [vmem:[#allocation2 + $0x190] sm:$0xff]  ;;  %v4855_v18 = vld [vmem:[#allocation2 + $0x1e0] sm:$0xff] }
 0x295   : > { %3671 = vst [vmem:[%s5049_s2 + $0x70] sm:$0xff] %v3571_v36   ;;  %3675 = vst [vmem:[%s5049_s2 + $0x90] sm:$0xff] %v3591_v54   ;;  %v2908_v39 = vmul.f32 %v4627_v1, %v4627_v1  ;;  %v2909_v54 = vmul.f32 %v4629_v5, %v4629_v5 }
 0x296   : > { %v2966_v57 = vadd.f32 %v2965_v48, %v2903_v40  ;;  %v2833_v58 = vadd.f32 %v2832_v47, %v4609_v56  ;;  %3674 = vst [vmem:[%s5049_s2 + $0x88] sm:$0xff] %v3586_v53   ;;  %v3596_v56 = vpack.c.bf16 %v4748_v63, %v4743_v55  ;;  %v4811_v40 = vld [vmem:[#allocation2 + $0x198] sm:$0xff]  ;;  %3681 = vst [vmem:[%s5049_s2 + $0xc0] sm:$0xff] %v3621_v31   ;;  %v4827_v48 = vld [vmem:[#allocation2 + $0x1b0] sm:$0xff] }
 0x297   : > { %v3631_v47 = vpack.c.bf16 %v4815_v45, %v4813_v44  ;;  %v2911_v31 = vmul.f32 %v4633_v7, %v4633_v7 }
 0x298   : > { %v2834_v8 = vadd.f32 %v2833_v58, %v4611_v60  ;;  %v2967_v9 = vadd.f32 %v2966_v57, %v2904_v49  ;;  %3676 = vst [vmem:[%s5049_s2 + $0x98] sm:$0xff] %v3596_v56   ;;  %v3606_v60 = vpack.c.bf16 %v4769_v12, %v4764_v4  ;;  %v4832_v57 = vld [vmem:[#allocation2 + $0x1b8] sm:$0xff]  ;;  %v4834_v58 = vld [vmem:[#allocation2 + $0x1c0] sm:$0xff] }
 0x299   : > { %3683 = vst [vmem:[%s5049_s2 + $0xd0] sm:$0xff] %v3631_v47   ;;  %v2912_v47 = vmul.f32 %v4645_v10, %v4645_v10 }
 0x29a   : > { %v2968_v21 = vadd.f32 %v2967_v9, %v2905_v59  ;;  %v2835_v22 = vadd.f32 %v2834_v8, %v4613_v61  ;;  %3678 = vst [vmem:[%s5049_s2 + $0xa8] sm:$0xff] %v3606_v60   ;;  %v3616_v61 = vpack.c.bf16 %v4790_v27, %v4785_v20  ;;  %v4836_v59 = vld [vmem:[#allocation2 + $0x1c8] sm:$0xff]  ;;  %v4853_v60 = vld [vmem:[#allocation2 + $0x1d8] sm:$0xff] }
 0x29b   : > { %v3641_v56 = vpack.c.bf16 %v4836_v59, %v4834_v58 }
 0x29c   : > { %v2836_v36 = vadd.f32 %v2835_v22, %v4615_v62  ;;  %v2969_v38 = vadd.f32 %v2968_v21, %v2906_v11  ;;  %3680 = vst [vmem:[%s5049_s2 + $0xb8] sm:$0xff] %v3616_v61   ;;  %v3626_v62 = vpack.c.bf16 %v4811_v40, %v4806_v35  ;;  %v2910_v11 = vmul.f32 %v4631_v6, %v4631_v6  ;;  %v4857_v21 = vld [vmem:[#allocation2 + $0x1e8] sm:$0xff] }
 0x29d   : > { %3685 = vst [vmem:[%s5049_s2 + $0xe0] sm:$0xff] %v3641_v56   ;;  %v3651_v22 = vpack.c.bf16 %v4857_v21, %v4855_v18 }
 0x29e   : > { %v2970_v49 = vadd.f32 %v2969_v38, %v2907_v26  ;;  %v2837_v53 = vadd.f32 %v2836_v36, %v4627_v1  ;;  %3682 = vst [vmem:[%s5049_s2 + $0xc8] sm:$0xff] %v3626_v62   ;;  %v3636_v1 = vpack.c.bf16 %v4832_v57, %v4827_v48  ;;  %v4872_v36 = vld [vmem:[#allocation2 + $0x1f0] sm:$0xff]  ;;  %v4874_v38 = vld [vmem:[#allocation2 + $0x1f8] sm:$0xff] }
 0x29f   : > { %3687 = vst [vmem:[%s5049_s2 + $0xf0] sm:$0xff] %v3651_v22  }
 0x2a0   : > { %v2838_v8 = vadd.f32 %v2837_v53, %v4629_v5  ;;  %v2971_v9 = vadd.f32 %v2970_v49, %v2908_v39  ;;  %3684 = vst [vmem:[%s5049_s2 + $0xd8] sm:$0xff] %v3636_v1   ;;  %v3646_v5 = vpack.c.bf16 %v4853_v60, %v4848_v3  ;;  %v3656_v39 = vpack.c.bf16 %v4874_v38, %v4872_v36 }
 0x2a2   : > { %v2972_v26 = vadd.f32 %v2971_v9, %v2909_v54  ;;  %v2839_v61 = vadd.f32 %v2838_v8, %v4631_v6  ;;  %3686 = vst [vmem:[%s5049_s2 + $0xe8] sm:$0xff] %v3646_v5   ;;  %3688 = vst [vmem:[%s5049_s2 + $0xf8] sm:$0xff] %v3656_v39   ;;  %v2913_v54 = vmul.f32 %v4647_v14, %v4647_v14 }
 0x2a4   : > { %v2840_v6 = vadd.f32 %v2839_v61, %v4633_v7  ;;  %v2973_v62 = vadd.f32 %v2972_v26, %v2910_v11  ;;  %v2914_v7 = vmul.f32 %v4649_v15, %v4649_v15  ;;  %v2915_v11 = vmul.f32 %v4651_v16, %v4651_v16 }
 0x2a6   : > { %v2974_v49 = vadd.f32 %v2973_v62, %v2911_v31  ;;  %v2841_v53 = vadd.f32 %v2840_v6, %v4645_v10  ;;  %v2916_v10 = vmul.f32 %v4663_v19, %v4663_v19 }
 0x2a8   : > { %v2842_v1 = vadd.f32 %v2841_v53, %v4647_v14  ;;  %v2975_v56 = vadd.f32 %v2974_v49, %v2912_v47  ;;  %v2917_v14 = vmul.f32 %v4665_v23, %v4665_v23 }
 0x2aa   : > { %v2976_v8 = vadd.f32 %v2975_v56, %v2913_v54  ;;  %v2843_v9 = vadd.f32 %v2842_v1, %v4649_v15  ;;  %v2918_v15 = vmul.f32 %v4667_v24, %v4667_v24 }
 0x2ac   : > { %v2844_v5 = vadd.f32 %v2843_v9, %v4651_v16  ;;  %v2977_v22 = vadd.f32 %v2976_v8, %v2914_v7  ;;  %v2919_v16 = vmul.f32 %v4669_v25, %v4669_v25 }
 0x2ae   : > { %v2978_v26 = vadd.f32 %v2977_v22, %v2915_v11  ;;  %v2845_v61 = vadd.f32 %v2844_v5, %v4663_v19  ;;  %v2920_v19 = vmul.f32 %v4681_v28, %v4681_v28 }
 0x2b0   : > { %v2846_v31 = vadd.f32 %v2845_v61, %v4665_v23  ;;  %v2979_v39 = vadd.f32 %v2978_v26, %v2916_v10  ;;  %v2921_v23 = vmul.f32 %v4685_v32, %v4685_v32 }
 0x2b2   : > { %v2980_v6 = vadd.f32 %v2979_v39, %v2917_v14  ;;  %v2847_v62 = vadd.f32 %v2846_v31, %v4667_v24  ;;  %v2922_v24 = vmul.f32 %v4687_v33, %v4687_v33 }
 0x2b4   : > { %v2848_v47 = vadd.f32 %v2847_v62, %v4669_v25  ;;  %v2981_v49 = vadd.f32 %v2980_v6, %v2918_v15  ;;  %v2923_v25 = vmul.f32 %v4689_v34, %v4689_v34 }
 0x2b6   : > { %v2982_v53 = vadd.f32 %v2981_v49, %v2919_v16  ;;  %v2849_v54 = vadd.f32 %v2848_v47, %v4681_v28  ;;  %v2924_v28 = vmul.f32 %v4701_v37, %v4701_v37 }
 0x2b8   : > { %v2850_v1 = vadd.f32 %v2849_v54, %v4685_v32  ;;  %v2983_v56 = vadd.f32 %v2982_v53, %v2920_v19  ;;  %v2925_v32 = vmul.f32 %v4706_v41, %v4706_v41 }
 0x2ba   : > { %v2984_v7 = vadd.f32 %v2983_v56, %v2921_v23  ;;  %v2851_v8 = vadd.f32 %v2850_v1, %v4687_v33  ;;  %v2926_v33 = vmul.f32 %v4708_v42, %v4708_v42 }
 0x2bc   : > { %v2852_v9 = vadd.f32 %v2851_v8, %v4689_v34  ;;  %v2985_v11 = vadd.f32 %v2984_v7, %v2922_v24  ;;  %v2927_v34 = vmul.f32 %v4710_v43, %v4710_v43 }
 0x2be   : > { %v2986_v5 = vadd.f32 %v2985_v11, %v2923_v25  ;;  %v2853_v22 = vadd.f32 %v2852_v9, %v4701_v37  ;;  %v2928_v37 = vmul.f32 %v4722_v46, %v4722_v46 }
 0x2c0   : > { %v2854_v10 = vadd.f32 %v2853_v22, %v4706_v41  ;;  %v2987_v26 = vadd.f32 %v2986_v5, %v2924_v28  ;;  %v2929_v41 = vmul.f32 %v4727_v50, %v4727_v50 }
 0x2c2   : > { %v2988_v61 = vadd.f32 %v2987_v26, %v2925_v32  ;;  %v2855_v14 = vadd.f32 %v2854_v10, %v4708_v42  ;;  %v2930_v42 = vmul.f32 %v4729_v51, %v4729_v51 }
 0x2c4   : > { %v2856_v31 = vadd.f32 %v2855_v14, %v4710_v43  ;;  %v2989_v39 = vadd.f32 %v2988_v61, %v2926_v33  ;;  %v2931_v43 = vmul.f32 %v4731_v52, %v4731_v52 }
 0x2c6   : > { %v2990_v15 = vadd.f32 %v2989_v39, %v2927_v34  ;;  %v2857_v6 = vadd.f32 %v2856_v31, %v4722_v46  ;;  %v2932_v46 = vmul.f32 %v4743_v55, %v4743_v55 }
 0x2c8   : > { %v2858_v62 = vadd.f32 %v2857_v6, %v4727_v50  ;;  %v2991_v16 = vadd.f32 %v2990_v15, %v2928_v37  ;;  %v2933_v50 = vmul.f32 %v4748_v63, %v4748_v63 }
 0x2ca   : > { %v2992_v47 = vadd.f32 %v2991_v16, %v2929_v41  ;;  %v2859_v49 = vadd.f32 %v2858_v62, %v4729_v51  ;;  %v2934_v51 = vmul.f32 %v4750_v0, %v4750_v0 }
 0x2cc   : > { %v2860_v19 = vadd.f32 %v2859_v49, %v4731_v52  ;;  %v2993_v53 = vadd.f32 %v2992_v47, %v2930_v42  ;;  %v2935_v52 = vmul.f32 %v4752_v2, %v4752_v2 }
 0x2ce   : > { %v2994_v54 = vadd.f32 %v2993_v53, %v2931_v43  ;;  %v2861_v23 = vadd.f32 %v2860_v19, %v4743_v55  ;;  %v2936_v55 = vmul.f32 %v4764_v4, %v4764_v4 }
 0x2d0   : > { %v2862_v1 = vadd.f32 %v2861_v23, %v4748_v63  ;;  %v2995_v56 = vadd.f32 %v2994_v54, %v2932_v46  ;;  %v2937_v63 = vmul.f32 %v4769_v12, %v4769_v12 }
 0x2d2   : > { %v2996_v24 = vadd.f32 %v2995_v56, %v2933_v50  ;;  %v2863_v7 = vadd.f32 %v2862_v1, %v4750_v0  ;;  %v2938_v0 = vmul.f32 %v4771_v13, %v4771_v13 }
 0x2d4   : > { %v2864_v8 = vadd.f32 %v2863_v7, %v4752_v2  ;;  %v2997_v25 = vadd.f32 %v2996_v24, %v2934_v51  ;;  %v2939_v2 = vmul.f32 %v4773_v17, %v4773_v17 }
 0x2d6   : > { %v2998_v9 = vadd.f32 %v2997_v25, %v2935_v52  ;;  %v2865_v11 = vadd.f32 %v2864_v8, %v4764_v4  ;;  %v2940_v4 = vmul.f32 %v4785_v20, %v4785_v20 }
 0x2d8   : > { %v2866_v28 = vadd.f32 %v2865_v11, %v4769_v12  ;;  %v2999_v5 = vadd.f32 %v2998_v9, %v2936_v55  ;;  %v2941_v12 = vmul.f32 %v4790_v27, %v4790_v27 }
 0x2da   : > { %v3000_v22 = vadd.f32 %v2999_v5, %v2937_v63  ;;  %v2867_v32 = vadd.f32 %v2866_v28, %v4771_v13  ;;  %v2942_v13 = vmul.f32 %v4792_v29, %v4792_v29 }
 0x2dc   : > { %v2868_v10 = vadd.f32 %v2867_v32, %v4773_v17  ;;  %v3001_v26 = vadd.f32 %v3000_v22, %v2938_v0  ;;  %v2943_v17 = vmul.f32 %v4794_v30, %v4794_v30 }
 0x2de   : > { %v3002_v33 = vadd.f32 %v3001_v26, %v2939_v2  ;;  %v2869_v61 = vadd.f32 %v2868_v10, %v4785_v20  ;;  %v2944_v20 = vmul.f32 %v4806_v35, %v4806_v35 }
 0x2e0   : > { %v2870_v14 = vadd.f32 %v2869_v61, %v4790_v27  ;;  %v3003_v34 = vadd.f32 %v3002_v33, %v2940_v4  ;;  %v2945_v27 = vmul.f32 %v4811_v40, %v4811_v40 }
 0x2e2   : > { %v3004_v31 = vadd.f32 %v3003_v34, %v2941_v12  ;;  %v2871_v39 = vadd.f32 %v2870_v14, %v4792_v29  ;;  %v2946_v29 = vmul.f32 %v4813_v44, %v4813_v44 }
 0x2e4   : > { %v2872_v37 = vadd.f32 %v2871_v39, %v4794_v30  ;;  %v3005_v15 = vadd.f32 %v3004_v31, %v2942_v13  ;;  %v2947_v30 = vmul.f32 %v4815_v45, %v4815_v45 }
 0x2e6   : > { %v3006_v6 = vadd.f32 %v3005_v15, %v2943_v17  ;;  %v2873_v41 = vadd.f32 %v2872_v37, %v4806_v35  ;;  %v2948_v35 = vmul.f32 %v4827_v48, %v4827_v48 }
 0x2e8   : > { %v2874_v62 = vadd.f32 %v2873_v41, %v4811_v40  ;;  %v3007_v16 = vadd.f32 %v3006_v6, %v2944_v20  ;;  %v2949_v40 = vmul.f32 %v4832_v57, %v4832_v57 }
 0x2ea   : > { %v3008_v42 = vadd.f32 %v3007_v16, %v2945_v27  ;;  %v2875_v47 = vadd.f32 %v2874_v62, %v4813_v44  ;;  %v2950_v44 = vmul.f32 %v4834_v58, %v4834_v58 }
 0x2ec   : > { %v2876_v49 = vadd.f32 %v2875_v47, %v4815_v45  ;;  %v3009_v43 = vadd.f32 %v3008_v42, %v2946_v29  ;;  %v2951_v45 = vmul.f32 %v4836_v59, %v4836_v59 }
 0x2ee   : > { %v3010_v19 = vadd.f32 %v3009_v43, %v2947_v30  ;;  %v2877_v53 = vadd.f32 %v2876_v49, %v4827_v48  ;;  %v2952_v48 = vmul.f32 %v4848_v3, %v4848_v3 }
 0x2f0   : > { %v2878_v46 = vadd.f32 %v2877_v53, %v4832_v57  ;;  %v3011_v54 = vadd.f32 %v3010_v19, %v2948_v35  ;;  %v2953_v57 = vmul.f32 %v4853_v60, %v4853_v60 }
 0x2f2   : > { %v3012_v23 = vadd.f32 %v3011_v54, %v2949_v40  ;;  %v2879_v50 = vadd.f32 %v2878_v46, %v4834_v58  ;;  %v2954_v58 = vmul.f32 %v4855_v18, %v4855_v18 }
 0x2f4   : > { %v2880_v1 = vadd.f32 %v2879_v50, %v4836_v59  ;;  %v3013_v56 = vadd.f32 %v3012_v23, %v2950_v44  ;;  %v2955_v59 = vmul.f32 %v4857_v21, %v4857_v21 }
 0x2f6   : > { %v3014_v51 = vadd.f32 %v3013_v56, %v2951_v45  ;;  %v2881_v24 = vadd.f32 %v2880_v1, %v4848_v3  ;;  %v2956_v3 = vmul.f32 %v4872_v36, %v4872_v36 }
 0x2f8   : > { %v2882_v7 = vadd.f32 %v2881_v24, %v4853_v60  ;;  %v3015_v52 = vadd.f32 %v3014_v51, %v2952_v48  ;;  %v2957_v60 = vmul.f32 %v4874_v38, %v4874_v38 }
 0x2fa   : > { %v3016_v8 = vadd.f32 %v3015_v52, %v2953_v57  ;;  %v2883_v25 = vadd.f32 %v2882_v7, %v4855_v18 }
 0x2fc   : > { %v2884_v55 = vadd.f32 %v2883_v25, %v4857_v21  ;;  %v3017_v9 = vadd.f32 %v3016_v8, %v2954_v58 }
 0x2fe   : > { %v3018_v11 = vadd.f32 %v3017_v9, %v2955_v59  ;;  %v2885_v63 = vadd.f32 %v2884_v55, %v4872_v36 }
 0x300   : > { %v2886_v28 = vadd.f32 %v2885_v63, %v4874_v38  ;;  %v3019_v5 = vadd.f32 %v3018_v11, %v2956_v3 }
 0x302   : > { %v2887_v0 = vrot.slane %v2886_v28, 4  ;;  %v3020_v18 = vadd.f32 %v3019_v5, %v2957_v60 }
 0x304   : > { %v2888_v22 = vadd.f32 %v2887_v0, %v2886_v28  ;;  %v3021_v32 = vrot.slane %v3020_v18, 4 }
 0x306   : > { %v2889_v2 = vrot.slane %v2888_v22, 2  ;;  %v3022_v10 = vadd.f32 %v3021_v32, %v3020_v18 }
 0x308   : > { %v2890_v21 = vadd.f32 %v2889_v2, %v2888_v22  ;;  %v3023_v26 = vrot.slane %v3022_v10, 2 }
 0x30a   : > { %v2891_v4 = vrot.slane %v2890_v21, 1  ;;  %v3024_v33 = vadd.f32 %v3023_v26, %v3022_v10 }
 0x30c   : > { %v2892_v61 = vadd.f32 %v2891_v4, %v2890_v21  ;;  %v3025_v12 = vrot.slane %v3024_v33, 1 }
 0x30e   : > { %2893 = vst [vmem:[%s5050_s3] sm:$0x1] %v2892_v61  ;;  %v3026_v36 = vadd.f32 %v3025_v12, %v3024_v33 }
 0x310   : > { %3027 = vst [vmem:[%s5051_s4] sm:$0x1] %v3026_v36 }
 0x311 PF: > { %s15_s19 = sadd.s32 1, %s3993_s19   ;;  %s5052_s15 = smov %s3981_s16 }
 0x312   : > { %p12_p12 = scmp.ge.s32.totalorder %s15_s19, 5   ;;  %s5053_s16 = smov %s4057_s23 }
 0x313   : > { %s5054_s17 = smov %s3989_s18  ;;  %s5055_s18 = smov %s5057_s20 }
 0x314   :  { %14 = sbr.rel (!%p12_p12) target bundleno = 3 (0x3), region = 121 }

</bundles_post_ra>
